<compile_context>
chip_gen: v7x
topology: tpu7x:2x2x1
jax: 0.10.0
libtpu: 0.0.40
codegen_flags: <defaults>
</compile_context>

<pallas_src>
import jax
import jax.numpy as jnp
from jax import lax
from jax.experimental import pallas as pl
from jax.experimental.pallas import tpu as pltpu


_VMEM_LIMIT = 32 << 20   # 32 MiB: plenty here, leaves headroom on v7x (64 MiB/TC)


# ---------------------------------------------------------------------------
# Pallas kernels
# ---------------------------------------------------------------------------
def conv_relu_pool_kernel(p_ref, w_ref, b_ref, o_ref):
    # p_ref: (4, M, K) bf16   im2col patches, one slab per 2x2-pool position
    # w_ref: (K, Cout) bf16   HWIO-flattened conv weight
    # b_ref: (1, Cout) f32    bias
    # o_ref: (M, Cout) bf16   pooled output, rows ordered (n, h', w')
    four, m, k = p_ref.shape
    p2d = p_ref[...].reshape(four * m, k)                 # merge leading dims (layout-safe)
    y = jnp.dot(p2d, w_ref[...], preferred_element_type=jnp.float32)  # one big MXU matmul
    y = jnp.max(y.reshape(four, m, -1), axis=0)           # 2x2 max-pool (VPU)
    y = jnp.maximum(y + b_ref[...], 0.0)                  # bias once (after max), then relu
    o_ref[...] = y.astype(o_ref.dtype)


def mlp_kernel(x_ref, w1_ref, b1_ref, w2_ref, b2_ref, o_ref):
    h = jnp.dot(x_ref[...], w1_ref[...],
                preferred_element_type=jnp.float32) + b1_ref[...]
    h = jnp.maximum(h, 0.0)
    o_ref[...] = (jnp.dot(h.astype(w2_ref.dtype), w2_ref[...],
                          preferred_element_type=jnp.float32)
                  + b2_ref[...]).astype(o_ref.dtype)


# ---------------------------------------------------------------------------
# pallas_call wrappers
# ---------------------------------------------------------------------------
def conv_relu_pool(patches, w2d, bias, *, block_rows=1024):
    # patches: (4, rows, K) bf16, w2d: (K, Cout) bf16, bias: (1, Cout) f32 -> (rows, Cout) bf16
    four, rows, K = patches.shape
    Cout = w2d.shape[1]
    mblk = min(rows, block_rows)
    pad = (-rows) % mblk
    if pad:
        patches = jnp.pad(patches, ((0, 0), (0, pad), (0, 0)))
    rows_p = rows + pad

    out = pl.pallas_call(
        conv_relu_pool_kernel,
        out_shape=jax.ShapeDtypeStruct((rows_p, Cout), jnp.bfloat16),
        grid_spec=pltpu.PrefetchScalarGridSpec(
            num_scalar_prefetch=0,
            grid=(rows_p // mblk,),
            in_specs=[
                pl.BlockSpec((four, mblk, K), lambda i: (0, i, 0)),
                pl.BlockSpec((K, Cout), lambda i: (0, 0)),   # weight stays resident
                pl.BlockSpec((1, Cout), lambda i: (0, 0)),
            ],
            out_specs=pl.BlockSpec((mblk, Cout), lambda i: (i, 0)),
        ),
        compiler_params=pltpu.CompilerParams(
            dimension_semantics=("parallel",),
            vmem_limit_bytes=_VMEM_LIMIT,
        ),
    )(patches.astype(jnp.bfloat16), w2d, bias)
    return out[:rows] if pad else out


def mlp_head(x, w1, b1, w2, b2, *, block_n=256):
    N, K1 = x.shape
    H = w1.shape[1]
    O = w2.shape[1]
    nb = min(N, block_n)
    pad = (-N) % nb
    if pad:
        x = jnp.pad(x, ((0, pad), (0, 0)))
    Np = N + pad

    out = pl.pallas_call(
        mlp_kernel,
        out_shape=jax.ShapeDtypeStruct((Np, O), jnp.float32),
        grid_spec=pltpu.PrefetchScalarGridSpec(
            num_scalar_prefetch=0,
            grid=(Np // nb,),
            in_specs=[
                pl.BlockSpec((nb, K1), lambda i: (i, 0)),
                pl.BlockSpec((K1, H), lambda i: (0, 0)),   # fc1 weight stays VMEM resident
                pl.BlockSpec((1, H), lambda i: (0, 0)),
                pl.BlockSpec((H, O), lambda i: (0, 0)),
                pl.BlockSpec((1, O), lambda i: (0, 0)),
            ],
            out_specs=pl.BlockSpec((nb, O), lambda i: (i, 0)),
        ),
        compiler_params=pltpu.CompilerParams(
            dimension_semantics=("parallel",),
            vmem_limit_bytes=_VMEM_LIMIT,
        ),
    )(x.astype(jnp.bfloat16), w1, b1, w2, b2)
    return out[:N] if pad else out


# ---------------------------------------------------------------------------
# Glue (pure data movement in plain JAX)
# ---------------------------------------------------------------------------
def pool_patches(x_nhwc, ksize=3, pad=1):
    """im2col for a 3x3 / pad=1 conv, grouped by 2x2-pool position.

    Returns (4, N*(H//2)*(W//2), ksize*ksize*C); rows ordered (n, h', w'),
    columns ordered (kh, kw, c), matching an HWIO weight reshaped to (9*C, Cout).
    """
    N, H, W, C = x_nhwc.shape
    Ho, Wo = H // 2, W // 2
    xp = jnp.pad(x_nhwc, ((0, 0), (pad, pad), (pad, pad), (0, 0)))
    groups = []
    for p in range(2):
        for q in range(2):
            cols = []
            for kh in range(ksize):
                for kw in range(ksize):
                    sl = xp[:, p + kh: p + kh + H: 2, q + kw: q + kw + W: 2, :]
                    cols.append(sl.reshape(N * Ho * Wo, C))
            groups.append(jnp.concatenate(cols, axis=-1))
    return jnp.stack(groups, axis=0)  # (4, N*Ho*Wo, 9*C)


def cifarnet_forward(x_nchw, p):
    N = x_nchw.shape[0]
    x = jnp.transpose(x_nchw, (0, 2, 3, 1)).astype(jnp.bfloat16)   # NCHW -> NHWC, bf16

    # conv1(3->32, 3x3, pad 1) + relu + maxpool(2,2)
    p1 = pool_patches(x)                                    # (4, N*256, 27)
    p1 = jnp.pad(p1, ((0, 0), (0, 0), (0, 5)))              # K: 27 -> 32 (aligned loads)
    y1 = conv_relu_pool(p1, p["conv1_w"], p["conv1_b"])     # (N*256, 32) bf16
    y1 = y1.reshape(N, 16, 16, 32)                          # NHWC

    # conv2(32->64, 3x3, pad 1) + relu + maxpool(2,2)
    p2 = pool_patches(y1)                                   # (4, N*64, 288)
    y2 = conv_relu_pool(p2, p["conv2_w"], p["conv2_b"])     # (N*64, 64) bf16

    # Flatten in NHWC order; fc1 weight rows were permuted once in prepare_params
    # to NHWC order, so this equals torch's x.view(-1, 64*8*8) on NCHW features.
    feat = y2.reshape(N, 8 * 8 * 64)

    # fc1(4096->256) + relu + fc2(256->10), fused in one kernel
    return mlp_head(feat, p["fc1_w"], p["fc1_b"], p["fc2_w"], p["fc2_b"])


# ---------------------------------------------------------------------------
# Parameters
# ---------------------------------------------------------------------------
def init_params(key):
    """Raw, torch-equivalent parameters (conv HWIO, fc as (in, out))."""
    ks = jax.random.split(key, 8)
    f32 = jnp.float32
    return {
        "conv1_w": 0.10 * jax.random.normal(ks[0], (3, 3, 3, 32), f32),
        "conv1_b": 0.10 * jax.random.normal(ks[1], (32,), f32),
        "conv2_w": 0.05 * jax.random.normal(ks[2], (3, 3, 32, 64), f32),
        "conv2_b": 0.05 * jax.random.normal(ks[3], (64,), f32),
        # fc1 rows in torch's NCHW flatten order (c, h, w)
        "fc1_w": 0.02 * jax.random.normal(ks[4], (64 * 8 * 8, 256), f32),
        "fc1_b": 0.02 * jax.random.normal(ks[5], (256,), f32),
        "fc2_w": 0.05 * jax.random.normal(ks[6], (256, 10), f32),
        "fc2_b": 0.05 * jax.random.normal(ks[7], (10,), f32),
    }


def prepare_params(raw):
    """One-time kernel-ready parameter transforms (hoisted out of the forward)."""
    bf16, f32 = jnp.bfloat16, jnp.float32
    w1 = raw["conv1_w"].reshape(9 * 3, 32)
    w1 = jnp.pad(w1, ((0, 5), (0, 0))).astype(bf16)          # K: 27 -> 32
    w2 = raw["conv2_w"].reshape(9 * 32, 64).astype(bf16)
    # Permute fc1 rows from torch (c, h, w) order to NHWC (h, w, c) order once.
    fc1 = (raw["fc1_w"].reshape(64, 8, 8, 256)
           .transpose(1, 2, 0, 3).reshape(64 * 8 * 8, 256).astype(bf16))
    return {
        "conv1_w": w1, "conv1_b": raw["conv1_b"].reshape(1, 32).astype(f32),
        "conv2_w": w2, "conv2_b": raw["conv2_b"].reshape(1, 64).astype(f32),
        "fc1_w": fc1, "fc1_b": raw["fc1_b"].reshape(1, 256).astype(f32),
        "fc2_w": raw["fc2_w"].astype(bf16),
        "fc2_b": raw["fc2_b"].reshape(1, 10).astype(f32),
    }


# ---------------------------------------------------------------------------
# Pure-JAX f32 reference (matches the torch module semantics)
# ---------------------------------------------------------------------------
def cifarnet_reference(x_nchw, raw):
    dn = ("NCHW", "HWIO", "NCHW")

    def conv_relu_pool_ref(z, w, b):
        y = lax.conv_general_dilated(z, w, (1, 1), "SAME", dimension_numbers=dn)
        y = jax.nn.relu(y + b.reshape(1, -1, 1, 1))
        n, c, h, ww = y.shape
        return y.reshape(n, c, h // 2, 2, ww // 2, 2).max(axis=(3, 5))

    y = conv_relu_pool_ref(x_nchw, raw["conv1_w"], raw["conv1_b"])
    y = conv_relu_pool_ref(y, raw["conv2_w"], raw["conv2_b"])
    feat = y.reshape(x_nchw.shape[0], 64 * 8 * 8)            # NCHW flatten (torch order)
    h = jax.nn.relu(feat @ raw["fc1_w"] + raw["fc1_b"])
    return h @ raw["fc2_w"] + raw["fc2_b"]


if __name__ == "__main__":
    root = jax.random.PRNGKey(0)
    pkey, xkey = jax.random.split(root)
    raw = init_params(pkey)
    params = prepare_params(raw)
    # CIFAR geometry is forced by fc1 = 64*8*8: input must be (N, 3, 32, 32).
    x = jax.random.normal(xkey, (2, 3, 32, 32), jnp.float32)

    out = jax.jit(cifarnet_forward)(x, params)
    out = jax.block_until_ready(out)
    assert out.shape == (2, 10) and out.dtype == jnp.float32

    ref = cifarnet_reference(x, raw)
    # Loose tolerance: Pallas path stores activations / matmul inputs in bf16.
    assert jnp.allclose(out, ref, atol=1e-1, rtol=1e-1), (
        "max abs err", float(jnp.max(jnp.abs(out - ref))))
    print("KERNEL_OK")
</pallas_src>

<mosaic_0001>
module attributes {stable_mosaic.version = 11 : i64} {
  func.func @conv_relu_pool_kernel(%arg0: i32, %arg1: memref<4x512x32xbf16, #tpu.memory_space<vmem>>, %arg2: memref<32x32xbf16, #tpu.memory_space<vmem>>, %arg3: memref<1x32xf32, #tpu.memory_space<vmem>>, %arg4: memref<512x32xbf16, #tpu.memory_space<vmem>>) attributes {dimension_semantics = [#tpu.dimension_semantics<parallel>], iteration_bounds = array<i64: 1>, scalar_prefetch = 0 : i64, scratch_operands = 0 : i64, tpu.core_type = #tpu.core_type<tc>, window_params = [{transform_indices = @transform_0, window_bounds = array<i64: 4, 512, 32>}, {pipeline_mode = #tpu.pipeline_mode<synchronous>, transform_indices = @transform_1, window_bounds = array<i64: 32, 32>}, {pipeline_mode = #tpu.pipeline_mode<synchronous>, transform_indices = @transform_2, window_bounds = array<i64: 1, 32>}, {transform_indices = @transform_3, window_bounds = array<i64: 512, 32>}]} {
    %c0 = arith.constant 0 : index
    %c0_0 = arith.constant 0 : index
    %c0_1 = arith.constant 0 : index
    %0 = vector.load %arg1[%c0, %c0_0, %c0_1] : memref<4x512x32xbf16, #tpu.memory_space<vmem>>, vector<4x512x32xbf16>
    %1 = vector.shape_cast %0 : vector<4x512x32xbf16> to vector<2048x32xbf16>
    %c0_2 = arith.constant 0 : index
    %c0_3 = arith.constant 0 : index
    %2 = vector.load %arg2[%c0_2, %c0_3] : memref<32x32xbf16, #tpu.memory_space<vmem>>, vector<32x32xbf16>
    %cst = arith.constant dense<0.000000e+00> : vector<2048x32xf32>
    %3 = tpu.matmul %1, %2, %cst {dimension_numbers = #tpu.dot_dimension_numbers<[1], [0], [0], [1], [0, 0, 1, 1], [], []>} : vector<2048x32xbf16>, vector<32x32xbf16>, vector<2048x32xf32> -> vector<2048x32xf32>
    %4 = vector.shape_cast %3 : vector<2048x32xf32> to vector<4x512x32xf32>
    %cst_4 = arith.constant dense<0xFF800000> : vector<512x32xf32>
    %5 = vector.multi_reduction <maximumf>, %4, %cst_4 [0] : vector<4x512x32xf32> to vector<512x32xf32>
    %c0_5 = arith.constant 0 : index
    %c0_6 = arith.constant 0 : index
    %6 = vector.load %arg3[%c0_5, %c0_6] : memref<1x32xf32, #tpu.memory_space<vmem>>, vector<1x32xf32>
    %7 = vector.broadcast %6 : vector<1x32xf32> to vector<512x32xf32>
    %8 = arith.addf %5, %7 : vector<512x32xf32>
    %cst_7 = arith.constant 0.000000e+00 : f32
    %9 = vector.broadcast %cst_7 : f32 to vector<512x32xf32>
    %10 = arith.maximumf %8, %9 : vector<512x32xf32>
    %11 = arith.truncf %10 : vector<512x32xf32> to vector<512x32xbf16>
    %c0_8 = arith.constant 0 : index
    %c0_9 = arith.constant 0 : index
    %12 = vector.load %arg4[%c0_8, %c0_9] : memref<512x32xbf16, #tpu.memory_space<vmem>>, vector<512x32xbf16>
    tpu.vector_store %arg4[%c0_8, %c0_9], %11 {strides = array<i32>} : memref<512x32xbf16, #tpu.memory_space<vmem>>, vector<512x32xbf16>,
    return
  }
  func.func @transform_0(%arg0: i32) -> (i32, i32, i32) {
    %c0_i32 = arith.constant 0 : i32
    %c0_i32_0 = arith.constant 0 : i32
    %c0_i32_1 = arith.constant 0 : i32
    return %c0_i32, %arg0, %c0_i32_0 : i32, i32, i32
  }
  func.func @transform_1(%arg0: i32) -> (i32, i32) {
    %c0_i32 = arith.constant 0 : i32
    %c0_i32_0 = arith.constant 0 : i32
    %c0_i32_1 = arith.constant 0 : i32
    return %c0_i32, %c0_i32_0 : i32, i32
  }
  func.func @transform_2(%arg0: i32) -> (i32, i32) {
    %c0_i32 = arith.constant 0 : i32
    %c0_i32_0 = arith.constant 0 : i32
    %c0_i32_1 = arith.constant 0 : i32
    return %c0_i32, %c0_i32_0 : i32, i32
  }
  func.func @transform_3(%arg0: i32) -> (i32, i32) {
    %c0_i32 = arith.constant 0 : i32
    %c0_i32_0 = arith.constant 0 : i32
    return %arg0, %c0_i32 : i32, i32
  }
}

module attributes {stable_mosaic.version = 11 : i64} {
  func.func @conv_relu_pool_kernel(%arg0: i32, %arg1: memref<4x128x288xbf16, #tpu.memory_space<vmem>>, %arg2: memref<288x64xbf16, #tpu.memory_space<vmem>>, %arg3: memref<1x64xf32, #tpu.memory_space<vmem>>, %arg4: memref<128x64xbf16, #tpu.memory_space<vmem>>) attributes {dimension_semantics = [#tpu.dimension_semantics<parallel>], iteration_bounds = array<i64: 1>, scalar_prefetch = 0 : i64, scratch_operands = 0 : i64, tpu.core_type = #tpu.core_type<tc>, window_params = [{transform_indices = @transform_0, window_bounds = array<i64: 4, 128, 288>}, {pipeline_mode = #tpu.pipeline_mode<synchronous>, transform_indices = @transform_1, window_bounds = array<i64: 288, 64>}, {pipeline_mode = #tpu.pipeline_mode<synchronous>, transform_indices = @transform_2, window_bounds = array<i64: 1, 64>}, {transform_indices = @transform_3, window_bounds = array<i64: 128, 64>}]} {
    %c0 = arith.constant 0 : index
    %c0_0 = arith.constant 0 : index
    %c0_1 = arith.constant 0 : index
    %0 = vector.load %arg1[%c0, %c0_0, %c0_1] : memref<4x128x288xbf16, #tpu.memory_space<vmem>>, vector<4x128x288xbf16>
    %1 = vector.shape_cast %0 : vector<4x128x288xbf16> to vector<512x288xbf16>
    %c0_2 = arith.constant 0 : index
    %c0_3 = arith.constant 0 : index
    %2 = vector.load %arg2[%c0_2, %c0_3] : memref<288x64xbf16, #tpu.memory_space<vmem>>, vector<288x64xbf16>
    %cst = arith.constant dense<0.000000e+00> : vector<512x64xf32>
    %3 = tpu.matmul %1, %2, %cst {dimension_numbers = #tpu.dot_dimension_numbers<[1], [0], [0], [1], [0, 0, 1, 1], [], []>} : vector<512x288xbf16>, vector<288x64xbf16>, vector<512x64xf32> -> vector<512x64xf32>
    %4 = vector.shape_cast %3 : vector<512x64xf32> to vector<4x128x64xf32>
    %cst_4 = arith.constant dense<0xFF800000> : vector<128x64xf32>
    %5 = vector.multi_reduction <maximumf>, %4, %cst_4 [0] : vector<4x128x64xf32> to vector<128x64xf32>
    %c0_5 = arith.constant 0 : index
    %c0_6 = arith.constant 0 : index
    %6 = vector.load %arg3[%c0_5, %c0_6] : memref<1x64xf32, #tpu.memory_space<vmem>>, vector<1x64xf32>
    %7 = vector.broadcast %6 : vector<1x64xf32> to vector<128x64xf32>
    %8 = arith.addf %5, %7 : vector<128x64xf32>
    %cst_7 = arith.constant 0.000000e+00 : f32
    %9 = vector.broadcast %cst_7 : f32 to vector<128x64xf32>
    %10 = arith.maximumf %8, %9 : vector<128x64xf32>
    %11 = arith.truncf %10 : vector<128x64xf32> to vector<128x64xbf16>
    %c0_8 = arith.constant 0 : index
    %c0_9 = arith.constant 0 : index
    %12 = vector.load %arg4[%c0_8, %c0_9] : memref<128x64xbf16, #tpu.memory_space<vmem>>, vector<128x64xbf16>
    tpu.vector_store %arg4[%c0_8, %c0_9], %11 {strides = array<i32>} : memref<128x64xbf16, #tpu.memory_space<vmem>>, vector<128x64xbf16>,
    return
  }
  func.func @transform_0(%arg0: i32) -> (i32, i32, i32) {
    %c0_i32 = arith.constant 0 : i32
    %c0_i32_0 = arith.constant 0 : i32
    %c0_i32_1 = arith.constant 0 : i32
    return %c0_i32, %arg0, %c0_i32_0 : i32, i32, i32
  }
  func.func @transform_1(%arg0: i32) -> (i32, i32) {
    %c0_i32 = arith.constant 0 : i32
    %c0_i32_0 = arith.constant 0 : i32
    %c0_i32_1 = arith.constant 0 : i32
    return %c0_i32, %c0_i32_0 : i32, i32
  }
  func.func @transform_2(%arg0: i32) -> (i32, i32) {
    %c0_i32 = arith.constant 0 : i32
    %c0_i32_0 = arith.constant 0 : i32
    %c0_i32_1 = arith.constant 0 : i32
    return %c0_i32, %c0_i32_0 : i32, i32
  }
  func.func @transform_3(%arg0: i32) -> (i32, i32) {
    %c0_i32 = arith.constant 0 : i32
    %c0_i32_0 = arith.constant 0 : i32
    return %arg0, %c0_i32 : i32, i32
  }
}

module attributes {stable_mosaic.version = 11 : i64} {
  func.func @mlp_kernel(%arg0: i32, %arg1: memref<2x4096xbf16, #tpu.memory_space<vmem>>, %arg2: memref<4096x256xbf16, #tpu.memory_space<vmem>>, %arg3: memref<1x256xf32, #tpu.memory_space<vmem>>, %arg4: memref<256x10xbf16, #tpu.memory_space<vmem>>, %arg5: memref<1x10xf32, #tpu.memory_space<vmem>>, %arg6: memref<2x10xf32, #tpu.memory_space<vmem>>) attributes {dimension_semantics = [#tpu.dimension_semantics<parallel>], iteration_bounds = array<i64: 1>, scalar_prefetch = 0 : i64, scratch_operands = 0 : i64, tpu.core_type = #tpu.core_type<tc>, window_params = [{transform_indices = @transform_0, window_bounds = array<i64: 2, 4096>}, {pipeline_mode = #tpu.pipeline_mode<synchronous>, transform_indices = @transform_1, window_bounds = array<i64: 4096, 256>}, {pipeline_mode = #tpu.pipeline_mode<synchronous>, transform_indices = @transform_2, window_bounds = array<i64: 1, 256>}, {pipeline_mode = #tpu.pipeline_mode<synchronous>, transform_indices = @transform_3, window_bounds = array<i64: 256, 10>}, {pipeline_mode = #tpu.pipeline_mode<synchronous>, transform_indices = @transform_4, window_bounds = array<i64: 1, 10>}, {transform_indices = @transform_5, window_bounds = array<i64: 2, 10>}]} {
    %c0 = arith.constant 0 : index
    %c0_0 = arith.constant 0 : index
    %0 = vector.load %arg1[%c0, %c0_0] : memref<2x4096xbf16, #tpu.memory_space<vmem>>, vector<2x4096xbf16>
    %c0_1 = arith.constant 0 : index
    %c0_2 = arith.constant 0 : index
    %1 = vector.load %arg2[%c0_1, %c0_2] : memref<4096x256xbf16, #tpu.memory_space<vmem>>, vector<4096x256xbf16>
    %cst = arith.constant dense<0.000000e+00> : vector<2x256xf32>
    %2 = tpu.matmul %0, %1, %cst {dimension_numbers = #tpu.dot_dimension_numbers<[1], [0], [0], [1], [0, 0, 1, 1], [], []>} : vector<2x4096xbf16>, vector<4096x256xbf16>, vector<2x256xf32> -> vector<2x256xf32>
    %c0_3 = arith.constant 0 : index
    %c0_4 = arith.constant 0 : index
    %3 = vector.load %arg3[%c0_3, %c0_4] : memref<1x256xf32, #tpu.memory_space<vmem>>, vector<1x256xf32>
    %4 = vector.broadcast %3 : vector<1x256xf32> to vector<2x256xf32>
    %5 = arith.addf %2, %4 : vector<2x256xf32>
    %cst_5 = arith.constant 0.000000e+00 : f32
    %6 = vector.broadcast %cst_5 : f32 to vector<2x256xf32>
    %7 = arith.maximumf %5, %6 : vector<2x256xf32>
    %8 = arith.truncf %7 : vector<2x256xf32> to vector<2x256xbf16>
    %c0_6 = arith.constant 0 : index
    %c0_7 = arith.constant 0 : index
    %9 = vector.load %arg4[%c0_6, %c0_7] : memref<256x10xbf16, #tpu.memory_space<vmem>>, vector<256x10xbf16>
    %cst_8 = arith.constant dense<0.000000e+00> : vector<2x10xf32>
    %10 = tpu.matmul %8, %9, %cst_8 {dimension_numbers = #tpu.dot_dimension_numbers<[1], [0], [0], [1], [0, 0, 1, 1], [], []>} : vector<2x256xbf16>, vector<256x10xbf16>, vector<2x10xf32> -> vector<2x10xf32>
    %c0_9 = arith.constant 0 : index
    %c0_10 = arith.constant 0 : index
    %11 = vector.load %arg5[%c0_9, %c0_10] : memref<1x10xf32, #tpu.memory_space<vmem>>, vector<1x10xf32>
    %12 = vector.broadcast %11 : vector<1x10xf32> to vector<2x10xf32>
    %13 = arith.addf %10, %12 : vector<2x10xf32>
    %c0_11 = arith.constant 0 : index
    %c0_12 = arith.constant 0 : index
    %14 = vector.load %arg6[%c0_11, %c0_12] : memref<2x10xf32, #tpu.memory_space<vmem>>, vector<2x10xf32>
    tpu.vector_store %arg6[%c0_11, %c0_12], %13 {strides = array<i32>} : memref<2x10xf32, #tpu.memory_space<vmem>>, vector<2x10xf32>,
    return
  }
  func.func @transform_0(%arg0: i32) -> (i32, i32) {
    %c0_i32 = arith.constant 0 : i32
    %c0_i32_0 = arith.constant 0 : i32
    return %arg0, %c0_i32 : i32, i32
  }
  func.func @transform_1(%arg0: i32) -> (i32, i32) {
    %c0_i32 = arith.constant 0 : i32
    %c0_i32_0 = arith.constant 0 : i32
    %c0_i32_1 = arith.constant 0 : i32
    return %c0_i32, %c0_i32_0 : i32, i32
  }
  func.func @transform_2(%arg0: i32) -> (i32, i32) {
    %c0_i32 = arith.constant 0 : i32
    %c0_i32_0 = arith.constant 0 : i32
    %c0_i32_1 = arith.constant 0 : i32
    return %c0_i32, %c0_i32_0 : i32, i32
  }
  func.func @transform_3(%arg0: i32) -> (i32, i32) {
    %c0_i32 = arith.constant 0 : i32
    %c0_i32_0 = arith.constant 0 : i32
    %c0_i32_1 = arith.constant 0 : i32
    return %c0_i32, %c0_i32_0 : i32, i32
  }
  func.func @transform_4(%arg0: i32) -> (i32, i32) {
    %c0_i32 = arith.constant 0 : i32
    %c0_i32_0 = arith.constant 0 : i32
    %c0_i32_1 = arith.constant 0 : i32
    return %c0_i32, %c0_i32_0 : i32, i32
  }
  func.func @transform_5(%arg0: i32) -> (i32, i32) {
    %c0_i32 = arith.constant 0 : i32
    %c0_i32_0 = arith.constant 0 : i32
    return %arg0, %c0_i32 : i32, i32
  }
}

</mosaic_0001>

<bundles_post_ra>
// kernel: cifarnet_forward.3
= control target key start
LH: loop header
LB: loop body
LE: loop exit
PB: predicated region body
PF: predicated region fallthrough
CT: control target
= control target key end

     0   :  { %vm927_vm0 = vcmask 261120   ;;  %vm3208_vm1 = vcmask 257024   ;;  %s6078_s1 = inlined_call_operand.vmem [shape: bf16[32,32], index: 1, kind: input, shape index: {}]   ;;  %s6079_s0 = inlined_call_operand.vmem [shape: bf16[4,512,32], index: 0, kind: input, shape index: {}]   ;;  %s6080_s2 = inlined_call_operand.vmem [shape: f32[1,32], index: 2, kind: input, shape index: {}]   ;;  %s6081_s3 = inlined_call_operand.vmem [shape: bf16[512,32], index: 3, kind: output, shape index: {}]  }
   0x1   :  { %v4058_v0 = vld [vmem:[%s6078_s1] sm:$0xff]   ;;  %v4059_v1 = vld [vmem:[%s6078_s1 + $0x8] sm:$0xff]   ;;  %v4064_v6 = vld [vmem:[%s6079_s0 + $0x10] sm:$0xff]  }
   0x2   :  { %3794 = vmatprep.subr.bf16.mxu0 %v4058_v0  ;;  %4054 = vmatprep.subr.bf16.mxu1 %v4058_v0  ;;  %v4060_v2 = vld [vmem:[%s6079_s0] sm:$0xff]   ;;  %v4061_v4 = vld [vmem:[%s6079_s0 + $0x8] sm:$0xff]   ;;  %v4066_v7 = vld [vmem:[%s6079_s0 + $0x210] sm:$0xff]  }
   0x3   :  { %3795 = vmatpush3.bf16.msra.mxu0 %v4058_v0  ;;  %4056 = vmatpush3.bf16.msra.mxu1 %v4058_v0  ;;  %v4062_v3 = vld [vmem:[%s6079_s0 + $0x200] sm:$0xff]   ;;  %v4063_v5 = vld [vmem:[%s6079_s0 + $0x208] sm:$0xff]   ;;  %v4065_v8 = vld [vmem:[%s6079_s0 + $0x18] sm:$0xff]  }
   0x4   :  { %3796 = vmatprep.subr.bf16.mxu0 %v4059_v1  ;;  %4055 = vmatprep.subr.bf16.mxu1 %v4059_v1  ;;  %v4067_v9 = vld [vmem:[%s6079_s0 + $0x218] sm:$0xff]   ;;  %v4068_v10 = vld [vmem:[%s6079_s0 + $0x20] sm:$0xff]   ;;  %v4069_v12 = vld [vmem:[%s6079_s0 + $0x28] sm:$0xff]  }
   0x5   :  { %3798 = vmatprep.mubr.msk.bf16.mxu0 %vm927_vm0, %v4060_v2  ;;  %3926 = vmatprep.mubr.msk.bf16.mxu1 %vm927_vm0, %v4062_v3  ;;  %v4070_v11 = vld [vmem:[%s6079_s0 + $0x220] sm:$0xff]   ;;  %v4071_v13 = vld [vmem:[%s6079_s0 + $0x228] sm:$0xff]   ;;  %v4072_v14 = vld [vmem:[%s6079_s0 + $0x30] sm:$0xff]  }
   0x6   :  { %v4074_v15 = vld [vmem:[%s6079_s0 + $0x230] sm:$0xff]   ;;  %v4073_v16 = vld [vmem:[%s6079_s0 + $0x38] sm:$0xff]   ;;  %v4076_v18 = vld [vmem:[%s6079_s0 + $0x40] sm:$0xff]  }
   0x7   :  { %3797 = vmatpush3.bf16.msra.mxu0 %v4059_v1  ;;  %4057 = vmatpush3.bf16.msra.mxu1 %v4059_v1  ;;  %v4075_v17 = vld [vmem:[%s6079_s0 + $0x238] sm:$0xff]   ;;  %v4078_v19 = vld [vmem:[%s6079_s0 + $0x240] sm:$0xff]   ;;  %v4077_v20 = vld [vmem:[%s6079_s0 + $0x48] sm:$0xff]  }
   0x8   :  { %v4079_v21 = vld [vmem:[%s6079_s0 + $0x248] sm:$0xff]   ;;  %v4080_v22 = vld [vmem:[%s6079_s0 + $0x50] sm:$0xff]   ;;  %v4081_v24 = vld [vmem:[%s6079_s0 + $0x58] sm:$0xff]  }
   0x9   :  { %v4082_v23 = vld [vmem:[%s6079_s0 + $0x250] sm:$0xff]   ;;  %v4083_v25 = vld [vmem:[%s6079_s0 + $0x258] sm:$0xff]   ;;  %v4084_v26 = vld [vmem:[%s6079_s0 + $0x60] sm:$0xff]  }
   0xa   :  { %3799 = vmatmul.mubr.msk.bf16.vlgmr.msra.gmra.mrb[0].mxu0 %vm927_vm0, %v4061_v4  ;;  %3927 = vmatmul.mubr.msk.bf16.vlgmr.msra.gmra.mrb[0].mxu1 %vm927_vm0, %v4063_v5  ;;  %v4086_v27 = vld [vmem:[%s6079_s0 + $0x260] sm:$0xff]   ;;  %v4085_v28 = vld [vmem:[%s6079_s0 + $0x68] sm:$0xff]   ;;  %v4088_v30 = vld [vmem:[%s6079_s0 + $0x70] sm:$0xff]  }
   0xb   :  { %3802 = vmatprep.mubr.msk.bf16.mxu0 %vm927_vm0, %v4064_v6  ;;  %3930 = vmatprep.mubr.msk.bf16.mxu1 %vm927_vm0, %v4066_v7  ;;  %v4087_v29 = vld [vmem:[%s6079_s0 + $0x268] sm:$0xff]   ;;  %v4090_v31 = vld [vmem:[%s6079_s0 + $0x270] sm:$0xff]   ;;  %v4089_v32 = vld [vmem:[%s6079_s0 + $0x78] sm:$0xff]  }
   0xc   :  { %v4091_v33 = vld [vmem:[%s6079_s0 + $0x278] sm:$0xff]   ;;  %v4092_v34 = vld [vmem:[%s6079_s0 + $0x80] sm:$0xff]   ;;  %v4093_v36 = vld [vmem:[%s6079_s0 + $0x88] sm:$0xff]  }
   0xd   :  { %v4094_v35 = vld [vmem:[%s6079_s0 + $0x280] sm:$0xff]   ;;  %v4095_v37 = vld [vmem:[%s6079_s0 + $0x288] sm:$0xff]   ;;  %v4096_v38 = vld [vmem:[%s6079_s0 + $0x90] sm:$0xff]  }
   0xe   :  { %v4098_v39 = vld [vmem:[%s6079_s0 + $0x290] sm:$0xff]   ;;  %v4097_v40 = vld [vmem:[%s6079_s0 + $0x98] sm:$0xff]   ;;  %v4100_v42 = vld [vmem:[%s6079_s0 + $0xa0] sm:$0xff]  }
   0xf   :  { %v4099_v41 = vld [vmem:[%s6079_s0 + $0x298] sm:$0xff]   ;;  %v4102_v43 = vld [vmem:[%s6079_s0 + $0x2a0] sm:$0xff]   ;;  %v4101_v44 = vld [vmem:[%s6079_s0 + $0xa8] sm:$0xff]  }
  0x10   :  { %v4103_v45 = vld [vmem:[%s6079_s0 + $0x2a8] sm:$0xff]   ;;  %v4104_v46 = vld [vmem:[%s6079_s0 + $0xb0] sm:$0xff]   ;;  %v4105_v48 = vld [vmem:[%s6079_s0 + $0xb8] sm:$0xff]  }
  0x11   :  { %v4106_v47 = vld [vmem:[%s6079_s0 + $0x2b0] sm:$0xff]   ;;  %v4107_v49 = vld [vmem:[%s6079_s0 + $0x2b8] sm:$0xff]   ;;  %v4108_v50 = vld [vmem:[%s6079_s0 + $0xc0] sm:$0xff]  }
  0x12   :  { %3803 = vmatmul.mubr.msk.bf16.gmra.mrb[4].mxu0 %vm927_vm0, %v4065_v8  ;;  %3931 = vmatmul.mubr.msk.bf16.gmra.mrb[4].mxu1 %vm927_vm0, %v4067_v9  ;;  %v4110_v51 = vld [vmem:[%s6079_s0 + $0x2c0] sm:$0xff]   ;;  %v4109_v52 = vld [vmem:[%s6079_s0 + $0xc8] sm:$0xff]   ;;  %v4112_v54 = vld [vmem:[%s6079_s0 + $0xd0] sm:$0xff]  }
  0x13   :  { %3806 = vmatprep.mubr.msk.bf16.mxu0 %vm927_vm0, %v4068_v10  ;;  %3934 = vmatprep.mubr.msk.bf16.mxu1 %vm927_vm0, %v4070_v11  ;;  %v4111_v53 = vld [vmem:[%s6079_s0 + $0x2c8] sm:$0xff]   ;;  %v4114_v55 = vld [vmem:[%s6079_s0 + $0x2d0] sm:$0xff]   ;;  %v4113_v56 = vld [vmem:[%s6079_s0 + $0xd8] sm:$0xff]  }
  0x14   :  { %v4115_v57 = vld [vmem:[%s6079_s0 + $0x2d8] sm:$0xff]   ;;  %v4116_v58 = vld [vmem:[%s6079_s0 + $0xe0] sm:$0xff]   ;;  %v4117_v60 = vld [vmem:[%s6079_s0 + $0xe8] sm:$0xff]  }
  0x15   :  { %v4118_v59 = vld [vmem:[%s6079_s0 + $0x2e0] sm:$0xff]   ;;  %v4119_v61 = vld [vmem:[%s6079_s0 + $0x2e8] sm:$0xff]   ;;  %v4120_v62 = vld [vmem:[%s6079_s0 + $0xf0] sm:$0xff]  }
  0x16   :  { %v4122_v63 = vld [vmem:[%s6079_s0 + $0x2f0] sm:$0xff]   ;;  %v4121_v0 = vld [vmem:[%s6079_s0 + $0xf8] sm:$0xff]   ;;  %v4124_v2 = vld [vmem:[%s6079_s0 + $0x100] sm:$0xff]  }
  0x17   :  { %v4123_v1 = vld [vmem:[%s6079_s0 + $0x2f8] sm:$0xff]   ;;  %v4126_v3 = vld [vmem:[%s6079_s0 + $0x300] sm:$0xff]   ;;  %v4125_v4 = vld [vmem:[%s6079_s0 + $0x108] sm:$0xff]  }
  0x18   :  { %v4127_v5 = vld [vmem:[%s6079_s0 + $0x308] sm:$0xff]   ;;  %v4128_v6 = vld [vmem:[%s6079_s0 + $0x110] sm:$0xff]   ;;  %v4129_v8 = vld [vmem:[%s6079_s0 + $0x118] sm:$0xff]  }
  0x19   :  { %v4130_v7 = vld [vmem:[%s6079_s0 + $0x310] sm:$0xff]   ;;  %v4131_v9 = vld [vmem:[%s6079_s0 + $0x318] sm:$0xff]   ;;  %v4132_v10 = vld [vmem:[%s6079_s0 + $0x120] sm:$0xff]  }
  0x1a   :  { %3807 = vmatmul.mubr.msk.bf16.gmra.mrb[8].mxu0 %vm927_vm0, %v4069_v12  ;;  %3935 = vmatmul.mubr.msk.bf16.gmra.mrb[8].mxu1 %vm927_vm0, %v4071_v13  ;;  %v4134_v11 = vld [vmem:[%s6079_s0 + $0x320] sm:$0xff]   ;;  %v4133_v12 = vld [vmem:[%s6079_s0 + $0x128] sm:$0xff]  }
  0x1b   :  { %3810 = vmatprep.mubr.msk.bf16.mxu0 %vm927_vm0, %v4072_v14  ;;  %3938 = vmatprep.mubr.msk.bf16.mxu1 %vm927_vm0, %v4074_v15  ;;  %v4135_v13 = vld [vmem:[%s6079_s0 + $0x328] sm:$0xff]   ;;  %v4136_v14 = vld [vmem:[%s6079_s0 + $0x130] sm:$0xff]  }
  0x1c   :  { %v4138_v15 = vld [vmem:[%s6079_s0 + $0x330] sm:$0xff]  }
  0x22   :  { %3811 = vmatmul.mubr.msk.bf16.gmra.mrb[12].mxu0 %vm927_vm0, %v4073_v16  ;;  %3939 = vmatmul.mubr.msk.bf16.gmra.mrb[12].mxu1 %vm927_vm0, %v4075_v17  ;;  %v4137_v16 = vld [vmem:[%s6079_s0 + $0x138] sm:$0xff]  }
  0x23   :  { %3814 = vmatprep.mubr.msk.bf16.mxu0 %vm927_vm0, %v4076_v18  ;;  %3942 = vmatprep.mubr.msk.bf16.mxu1 %vm927_vm0, %v4078_v19  ;;  %v4139_v17 = vld [vmem:[%s6079_s0 + $0x338] sm:$0xff]   ;;  %v4140_v18 = vld [vmem:[%s6079_s0 + $0x140] sm:$0xff]  }
  0x24   :  { %v4142_v19 = vld [vmem:[%s6079_s0 + $0x340] sm:$0xff]  }
  0x2a   :  { %3815 = vmatmul.mubr.msk.bf16.gmra.mrb[16].mxu0 %vm927_vm0, %v4077_v20  ;;  %3943 = vmatmul.mubr.msk.bf16.gmra.mrb[16].mxu1 %vm927_vm0, %v4079_v21  ;;  %v4141_v20 = vld [vmem:[%s6079_s0 + $0x148] sm:$0xff]  }
  0x2b   :  { %3818 = vmatprep.mubr.msk.bf16.mxu0 %vm927_vm0, %v4080_v22  ;;  %3946 = vmatprep.mubr.msk.bf16.mxu1 %vm927_vm0, %v4082_v23  ;;  %v4143_v21 = vld [vmem:[%s6079_s0 + $0x348] sm:$0xff]   ;;  %v4144_v22 = vld [vmem:[%s6079_s0 + $0x150] sm:$0xff]  }
  0x2c   :  { %v4146_v23 = vld [vmem:[%s6079_s0 + $0x350] sm:$0xff]  }
  0x32   :  { %3819 = vmatmul.mubr.msk.bf16.gmra.mrb[20].mxu0 %vm927_vm0, %v4081_v24  ;;  %3947 = vmatmul.mubr.msk.bf16.gmra.mrb[20].mxu1 %vm927_vm0, %v4083_v25  ;;  %v4145_v24 = vld [vmem:[%s6079_s0 + $0x158] sm:$0xff]  }
  0x33   :  { %3822 = vmatprep.mubr.msk.bf16.mxu0 %vm927_vm0, %v4084_v26  ;;  %3950 = vmatprep.mubr.msk.bf16.mxu1 %vm927_vm0, %v4086_v27  ;;  %v4147_v25 = vld [vmem:[%s6079_s0 + $0x358] sm:$0xff]   ;;  %v4148_v26 = vld [vmem:[%s6079_s0 + $0x160] sm:$0xff]  }
  0x34   :  { %v4150_v27 = vld [vmem:[%s6079_s0 + $0x360] sm:$0xff]  }
  0x3a   :  { %3823 = vmatmul.mubr.msk.bf16.gmra.mrb[24].mxu0 %vm927_vm0, %v4085_v28  ;;  %3951 = vmatmul.mubr.msk.bf16.gmra.mrb[24].mxu1 %vm927_vm0, %v4087_v29  ;;  %v4149_v28 = vld [vmem:[%s6079_s0 + $0x168] sm:$0xff]  }
  0x3b   :  { %3826 = vmatprep.mubr.msk.bf16.mxu0 %vm927_vm0, %v4088_v30  ;;  %3954 = vmatprep.mubr.msk.bf16.mxu1 %vm927_vm0, %v4090_v31  ;;  %v4151_v29 = vld [vmem:[%s6079_s0 + $0x368] sm:$0xff]   ;;  %v4152_v30 = vld [vmem:[%s6079_s0 + $0x170] sm:$0xff]  }
  0x3c   :  { %v4154_v31 = vld [vmem:[%s6079_s0 + $0x370] sm:$0xff]  }
  0x42   :  { %3827 = vmatmul.mubr.msk.bf16.gmra.mrb[28].mxu0 %vm927_vm0, %v4089_v32  ;;  %3955 = vmatmul.mubr.msk.bf16.gmra.mrb[28].mxu1 %vm927_vm0, %v4091_v33  ;;  %v4153_v32 = vld [vmem:[%s6079_s0 + $0x178] sm:$0xff]  }
  0x43   :  { %3830 = vmatprep.mubr.msk.bf16.mxu0 %vm927_vm0, %v4092_v34  ;;  %3958 = vmatprep.mubr.msk.bf16.mxu1 %vm927_vm0, %v4094_v35  ;;  %v4155_v33 = vld [vmem:[%s6079_s0 + $0x378] sm:$0xff]   ;;  %v4156_v34 = vld [vmem:[%s6079_s0 + $0x180] sm:$0xff]  }
  0x44   :  { %v4158_v35 = vld [vmem:[%s6079_s0 + $0x380] sm:$0xff]  }
  0x4a   :  { %3831 = vmatmul.mubr.msk.bf16.gmra.mrb[32].mxu0 %vm927_vm0, %v4093_v36  ;;  %3959 = vmatmul.mubr.msk.bf16.gmra.mrb[32].mxu1 %vm927_vm0, %v4095_v37  ;;  %v4157_v36 = vld [vmem:[%s6079_s0 + $0x188] sm:$0xff]  }
  0x4b   :  { %3834 = vmatprep.mubr.msk.bf16.mxu0 %vm927_vm0, %v4096_v38  ;;  %3962 = vmatprep.mubr.msk.bf16.mxu1 %vm927_vm0, %v4098_v39  ;;  %v4159_v37 = vld [vmem:[%s6079_s0 + $0x388] sm:$0xff]   ;;  %v4160_v38 = vld [vmem:[%s6079_s0 + $0x190] sm:$0xff]  }
  0x4c   :  { %v4162_v39 = vld [vmem:[%s6079_s0 + $0x390] sm:$0xff]  }
  0x52   :  { %3835 = vmatmul.mubr.msk.bf16.gmra.mrb[36].mxu0 %vm927_vm0, %v4097_v40  ;;  %3963 = vmatmul.mubr.msk.bf16.gmra.mrb[36].mxu1 %vm927_vm0, %v4099_v41  ;;  %v4161_v40 = vld [vmem:[%s6079_s0 + $0x198] sm:$0xff]  }
  0x53   :  { %3838 = vmatprep.mubr.msk.bf16.mxu0 %vm927_vm0, %v4100_v42  ;;  %3966 = vmatprep.mubr.msk.bf16.mxu1 %vm927_vm0, %v4102_v43  ;;  %v4163_v41 = vld [vmem:[%s6079_s0 + $0x398] sm:$0xff]   ;;  %v4164_v42 = vld [vmem:[%s6079_s0 + $0x1a0] sm:$0xff]  }
  0x54   :  { %v4166_v43 = vld [vmem:[%s6079_s0 + $0x3a0] sm:$0xff]  }
  0x5a   :  { %3839 = vmatmul.mubr.msk.bf16.gmra.mrb[40].mxu0 %vm927_vm0, %v4101_v44  ;;  %3967 = vmatmul.mubr.msk.bf16.gmra.mrb[40].mxu1 %vm927_vm0, %v4103_v45  ;;  %v4165_v44 = vld [vmem:[%s6079_s0 + $0x1a8] sm:$0xff]  }
  0x5b   :  { %3842 = vmatprep.mubr.msk.bf16.mxu0 %vm927_vm0, %v4104_v46  ;;  %3970 = vmatprep.mubr.msk.bf16.mxu1 %vm927_vm0, %v4106_v47  ;;  %v4167_v45 = vld [vmem:[%s6079_s0 + $0x3a8] sm:$0xff]   ;;  %v4168_v46 = vld [vmem:[%s6079_s0 + $0x1b0] sm:$0xff]  }
  0x5c   :  { %v4170_v47 = vld [vmem:[%s6079_s0 + $0x3b0] sm:$0xff]  }
  0x62   :  { %3843 = vmatmul.mubr.msk.bf16.gmra.mrb[44].mxu0 %vm927_vm0, %v4105_v48  ;;  %3971 = vmatmul.mubr.msk.bf16.gmra.mrb[44].mxu1 %vm927_vm0, %v4107_v49 }
  0x63   :  { %3846 = vmatprep.mubr.msk.bf16.mxu0 %vm927_vm0, %v4108_v50  ;;  %3974 = vmatprep.mubr.msk.bf16.mxu1 %vm927_vm0, %v4110_v51 }
  0x6a   :  { %3847 = vmatmul.mubr.msk.bf16.gmra.mrb[48].mxu0 %vm927_vm0, %v4109_v52  ;;  %3975 = vmatmul.mubr.msk.bf16.gmra.mrb[48].mxu1 %vm927_vm0, %v4111_v53  ;;  %v4169_v52 = vld [vmem:[%s6079_s0 + $0x1b8] sm:$0xff]  }
  0x6b   :  { %3850 = vmatprep.mubr.msk.bf16.mxu0 %vm927_vm0, %v4112_v54  ;;  %3978 = vmatprep.mubr.msk.bf16.mxu1 %vm927_vm0, %v4114_v55  ;;  %v4171_v53 = vld [vmem:[%s6079_s0 + $0x3b8] sm:$0xff]  }
  0x72   :  { %3851 = vmatmul.mubr.msk.bf16.gmra.mrb[52].mxu0 %vm927_vm0, %v4113_v56  ;;  %3979 = vmatmul.mubr.msk.bf16.gmra.mrb[52].mxu1 %vm927_vm0, %v4115_v57  ;;  %v4172_v56 = vld [vmem:[%s6079_s0 + $0x1c0] sm:$0xff]  }
  0x73   :  { %3854 = vmatprep.mubr.msk.bf16.mxu0 %vm927_vm0, %v4116_v58  ;;  %3982 = vmatprep.mubr.msk.bf16.mxu1 %vm927_vm0, %v4118_v59  ;;  %v4174_v57 = vld [vmem:[%s6079_s0 + $0x3c0] sm:$0xff]  }
  0x7a   :  { %3855 = vmatmul.mubr.msk.bf16.gmra.mrb[56].mxu0 %vm927_vm0, %v4117_v60  ;;  %3983 = vmatmul.mubr.msk.bf16.gmra.mrb[56].mxu1 %vm927_vm0, %v4119_v61 }
  0x7b   :  { %3858 = vmatprep.mubr.msk.bf16.mxu0 %vm927_vm0, %v4120_v62  ;;  %3986 = vmatprep.mubr.msk.bf16.mxu1 %vm927_vm0, %v4122_v63 }
  0x82   :  { %3859 = vmatmul.mubr.msk.bf16.gmra.mrb[60].mxu0 %vm927_vm0, %v4121_v0  ;;  %3987 = vmatmul.mubr.msk.bf16.gmra.mrb[60].mxu1 %vm927_vm0, %v4123_v1  ;;  %v4173_v0 = vld [vmem:[%s6079_s0 + $0x1c8] sm:$0xff]  }
  0x83   :  { %3862 = vmatprep.mubr.msk.bf16.mxu0 %vm927_vm0, %v4124_v2  ;;  %3990 = vmatprep.mubr.msk.bf16.mxu1 %vm927_vm0, %v4126_v3  ;;  %v4175_v1 = vld [vmem:[%s6079_s0 + $0x3c8] sm:$0xff]  }
  0x8a   :  { %3863 = vmatmul.mubr.msk.bf16.gmra.mrb[64].mxu0 %vm927_vm0, %v4125_v4  ;;  %3991 = vmatmul.mubr.msk.bf16.gmra.mrb[64].mxu1 %vm927_vm0, %v4127_v5  ;;  %v4176_v4 = vld [vmem:[%s6079_s0 + $0x1d0] sm:$0xff]  }
  0x8b   :  { %3866 = vmatprep.mubr.msk.bf16.mxu0 %vm927_vm0, %v4128_v6  ;;  %3994 = vmatprep.mubr.msk.bf16.mxu1 %vm927_vm0, %v4130_v7  ;;  %v4178_v5 = vld [vmem:[%s6079_s0 + $0x3d0] sm:$0xff]  }
  0x92   :  { %3867 = vmatmul.mubr.msk.bf16.gmra.mrb[68].mxu0 %vm927_vm0, %v4129_v8  ;;  %3995 = vmatmul.mubr.msk.bf16.gmra.mrb[68].mxu1 %vm927_vm0, %v4131_v9 }
  0x93   :  { %3870 = vmatprep.mubr.msk.bf16.mxu0 %vm927_vm0, %v4132_v10  ;;  %3998 = vmatprep.mubr.msk.bf16.mxu1 %vm927_vm0, %v4134_v11 }
  0x9a   :  { %3871 = vmatmul.mubr.msk.bf16.gmra.mrb[72].mxu0 %vm927_vm0, %v4133_v12  ;;  %3999 = vmatmul.mubr.msk.bf16.gmra.mrb[72].mxu1 %vm927_vm0, %v4135_v13  ;;  %v4177_v12 = vld [vmem:[%s6079_s0 + $0x1d8] sm:$0xff]  }
  0x9b   :  { %3874 = vmatprep.mubr.msk.bf16.mxu0 %vm927_vm0, %v4136_v14  ;;  %4002 = vmatprep.mubr.msk.bf16.mxu1 %vm927_vm0, %v4138_v15  ;;  %v4179_v13 = vld [vmem:[%s6079_s0 + $0x3d8] sm:$0xff]  }
  0xa2   :  { %3875 = vmatmul.mubr.msk.bf16.gmra.mrb[76].mxu0 %vm927_vm0, %v4137_v16  ;;  %4003 = vmatmul.mubr.msk.bf16.gmra.mrb[76].mxu1 %vm927_vm0, %v4139_v17  ;;  %v4180_v16 = vld [vmem:[%s6079_s0 + $0x1e0] sm:$0xff]  }
  0xa3   :  { %3878 = vmatprep.mubr.msk.bf16.mxu0 %vm927_vm0, %v4140_v18  ;;  %4006 = vmatprep.mubr.msk.bf16.mxu1 %vm927_vm0, %v4142_v19  ;;  %v4182_v17 = vld [vmem:[%s6079_s0 + $0x3e0] sm:$0xff]  }
  0xaa   :  { %3879 = vmatmul.mubr.msk.bf16.gmra.mrb[80].mxu0 %vm927_vm0, %v4141_v20  ;;  %4007 = vmatmul.mubr.msk.bf16.gmra.mrb[80].mxu1 %vm927_vm0, %v4143_v21 }
  0xab   :  { %3882 = vmatprep.mubr.msk.bf16.mxu0 %vm927_vm0, %v4144_v22  ;;  %4010 = vmatprep.mubr.msk.bf16.mxu1 %vm927_vm0, %v4146_v23 }
  0xb2   :  { %3883 = vmatmul.mubr.msk.bf16.gmra.mrb[84].mxu0 %vm927_vm0, %v4145_v24  ;;  %4011 = vmatmul.mubr.msk.bf16.gmra.mrb[84].mxu1 %vm927_vm0, %v4147_v25  ;;  %v4181_v24 = vld [vmem:[%s6079_s0 + $0x1e8] sm:$0xff]  }
  0xb3   :  { %3886 = vmatprep.mubr.msk.bf16.mxu0 %vm927_vm0, %v4148_v26  ;;  %4014 = vmatprep.mubr.msk.bf16.mxu1 %vm927_vm0, %v4150_v27  ;;  %v4183_v25 = vld [vmem:[%s6079_s0 + $0x3e8] sm:$0xff]  }
  0xba   :  { %3887 = vmatmul.mubr.msk.bf16.gmra.mrb[88].mxu0 %vm927_vm0, %v4149_v28  ;;  %4015 = vmatmul.mubr.msk.bf16.gmra.mrb[88].mxu1 %vm927_vm0, %v4151_v29  ;;  %v4184_v28 = vld [vmem:[%s6079_s0 + $0x1f0] sm:$0xff]  }
  0xbb   :  { %3890 = vmatprep.mubr.msk.bf16.mxu0 %vm927_vm0, %v4152_v30  ;;  %4018 = vmatprep.mubr.msk.bf16.mxu1 %vm927_vm0, %v4154_v31  ;;  %v4186_v29 = vld [vmem:[%s6079_s0 + $0x3f0] sm:$0xff]  }
  0xc2   :  { %3891 = vmatmul.mubr.msk.bf16.gmra.mrb[92].mxu0 %vm927_vm0, %v4153_v32  ;;  %4019 = vmatmul.mubr.msk.bf16.gmra.mrb[92].mxu1 %vm927_vm0, %v4155_v33 }
  0xc3   :  { %3894 = vmatprep.mubr.msk.bf16.mxu0 %vm927_vm0, %v4156_v34  ;;  %4022 = vmatprep.mubr.msk.bf16.mxu1 %vm927_vm0, %v4158_v35 }
  0xca   :  { %3895 = vmatmul.mubr.msk.bf16.gmra.mrb[96].mxu0 %vm927_vm0, %v4157_v36  ;;  %4023 = vmatmul.mubr.msk.bf16.gmra.mrb[96].mxu1 %vm927_vm0, %v4159_v37  ;;  %v4185_v36 = vld [vmem:[%s6079_s0 + $0x1f8] sm:$0xff]  }
  0xcb   :  { %3898 = vmatprep.mubr.msk.bf16.mxu0 %vm927_vm0, %v4160_v38  ;;  %4026 = vmatprep.mubr.msk.bf16.mxu1 %vm927_vm0, %v4162_v39  ;;  %v4187_v37 = vld [vmem:[%s6079_s0 + $0x3f8] sm:$0xff]  }
  0xd2   :  { %3899 = vmatmul.mubr.msk.bf16.gmra.mrb[100].mxu0 %vm927_vm0, %v4161_v40  ;;  %4027 = vmatmul.mubr.msk.bf16.gmra.mrb[100].mxu1 %vm927_vm0, %v4163_v41 }
  0xd3   :  { %3902 = vmatprep.mubr.msk.bf16.mxu0 %vm927_vm0, %v4164_v42  ;;  %4030 = vmatprep.mubr.msk.bf16.mxu1 %vm927_vm0, %v4166_v43 }
  0xda   :  { %3903 = vmatmul.mubr.msk.bf16.gmra.mrb[104].mxu0 %vm927_vm0, %v4165_v44  ;;  %4031 = vmatmul.mubr.msk.bf16.gmra.mrb[104].mxu1 %vm927_vm0, %v4167_v45 }
  0xdb   :  { %3906 = vmatprep.mubr.msk.bf16.mxu0 %vm927_vm0, %v4168_v46  ;;  %4034 = vmatprep.mubr.msk.bf16.mxu1 %vm927_vm0, %v4170_v47 }
  0xdd   :  { %v4655_v48 = vpop.f32.mrb[0].mxu0  ;;  %v4657_v49 = vpop.f32.mrb[0].mxu1 }
  0xde   :  { %v4659_v50 = vpop.f32.mrb[1].mxu0  ;;  %v4661_v51 = vpop.f32.mrb[1].mxu1 }
  0xdf   :  { %v4669_v54 = vpop.f32.mrb[2].mxu0  ;;  %v4671_v55 = vpop.f32.mrb[2].mxu1 }
  0xe0   :  { %v4679_v58 = vpop.f32.mrb[3].mxu0  ;;  %v4681_v59 = vpop.f32.mrb[3].mxu1 }
  0xe2   :  { %3907 = vmatmul.mubr.msk.bf16.gmra.mrb[108].mxu0 %vm927_vm0, %v4169_v52  ;;  %4035 = vmatmul.mubr.msk.bf16.gmra.mrb[108].mxu1 %vm927_vm0, %v4171_v53 }
  0xe3   :  { %3910 = vmatprep.mubr.msk.bf16.mxu0 %vm927_vm0, %v4172_v56  ;;  %4038 = vmatprep.mubr.msk.bf16.mxu1 %vm927_vm0, %v4174_v57 }
  0xe5   :  { %v4687_v60 = vpop.f32.mrb[4].mxu0  ;;  %v4689_v61 = vpop.f32.mrb[4].mxu1 }
  0xe6   :  { %v4691_v62 = vpop.f32.mrb[5].mxu0  ;;  %v4693_v63 = vpop.f32.mrb[5].mxu1 }
  0xe7   :  { %v4701_v2 = vpop.f32.mrb[6].mxu0  ;;  %v4703_v3 = vpop.f32.mrb[6].mxu1 }
  0xe8   :  { %v4711_v6 = vpop.f32.mrb[7].mxu0  ;;  %v4713_v7 = vpop.f32.mrb[7].mxu1 }
  0xea   :  { %3911 = vmatmul.mubr.msk.bf16.gmra.mrb[112].mxu0 %vm927_vm0, %v4173_v0  ;;  %4039 = vmatmul.mubr.msk.bf16.gmra.mrb[112].mxu1 %vm927_vm0, %v4175_v1 }
  0xeb   :  { %3914 = vmatprep.mubr.msk.bf16.mxu0 %vm927_vm0, %v4176_v4  ;;  %4042 = vmatprep.mubr.msk.bf16.mxu1 %vm927_vm0, %v4178_v5 }
  0xed   :  { %v4719_v8 = vpop.f32.mrb[8].mxu0  ;;  %v4721_v9 = vpop.f32.mrb[8].mxu1 }
  0xee   :  { %v4723_v10 = vpop.f32.mrb[9].mxu0  ;;  %v4725_v11 = vpop.f32.mrb[9].mxu1 }
  0xef   :  { %v4733_v14 = vpop.f32.mrb[10].mxu0  ;;  %v4735_v15 = vpop.f32.mrb[10].mxu1 }
  0xf0   :  { %v4743_v18 = vpop.f32.mrb[11].mxu0  ;;  %v4745_v19 = vpop.f32.mrb[11].mxu1 }
  0xf2   :  { %3915 = vmatmul.mubr.msk.bf16.gmra.mrb[116].mxu0 %vm927_vm0, %v4177_v12  ;;  %4043 = vmatmul.mubr.msk.bf16.gmra.mrb[116].mxu1 %vm927_vm0, %v4179_v13 }
  0xf3   :  { %3918 = vmatprep.mubr.msk.bf16.mxu0 %vm927_vm0, %v4180_v16  ;;  %4046 = vmatprep.mubr.msk.bf16.mxu1 %vm927_vm0, %v4182_v17 }
  0xf5   :  { %v4751_v20 = vpop.f32.mrb[12].mxu0  ;;  %v4753_v21 = vpop.f32.mrb[12].mxu1 }
  0xf6   :  { %v4755_v22 = vpop.f32.mrb[13].mxu0  ;;  %v4757_v23 = vpop.f32.mrb[13].mxu1 }
  0xf7   :  { %v4765_v26 = vpop.f32.mrb[14].mxu0  ;;  %v4767_v27 = vpop.f32.mrb[14].mxu1 }
  0xf8   :  { %v4775_v30 = vpop.f32.mrb[15].mxu0  ;;  %v4777_v31 = vpop.f32.mrb[15].mxu1 }
  0xfa   :  { %3919 = vmatmul.mubr.msk.bf16.gmra.mrb[120].mxu0 %vm927_vm0, %v4181_v24  ;;  %4047 = vmatmul.mubr.msk.bf16.gmra.mrb[120].mxu1 %vm927_vm0, %v4183_v25 }
  0xfb   :  { %3922 = vmatprep.mubr.msk.bf16.mxu0 %vm927_vm0, %v4184_v28  ;;  %4050 = vmatprep.mubr.msk.bf16.mxu1 %vm927_vm0, %v4186_v29 }
  0xfd   :  { %v4783_v32 = vpop.f32.mrb[16].mxu0  ;;  %v4785_v33 = vpop.f32.mrb[16].mxu1 }
  0xfe   :  { %v4787_v34 = vpop.f32.mrb[17].mxu0  ;;  %v4789_v35 = vpop.f32.mrb[17].mxu1 }
  0xff   :  { %v4797_v38 = vpop.f32.mrb[18].mxu0  ;;  %v4799_v39 = vpop.f32.mrb[18].mxu1 }
 0x100   :  { %v4801_v40 = vpop.f32.mrb[19].mxu0  ;;  %v4803_v41 = vpop.f32.mrb[19].mxu1 }
 0x102   :  { %3923 = vmatmul.mubr.msk.bf16.gmra.mrb[124].mxu0 %vm927_vm0, %v4185_v36  ;;  %4051 = vmatmul.mubr.msk.bf16.gmra.mrb[124].mxu1 %vm927_vm0, %v4187_v37 }
 0x105   :  { %v4807_v42 = vpop.f32.mrb[20].mxu0  ;;  %v4809_v43 = vpop.f32.mrb[20].mxu1 }
 0x106   :  { %v4811_v44 = vpop.f32.mrb[21].mxu0  ;;  %v4813_v45 = vpop.f32.mrb[21].mxu1 }
 0x107   :  { %v4815_v46 = vpop.f32.mrb[22].mxu0  ;;  %v4817_v47 = vpop.f32.mrb[22].mxu1 }
 0x108   :  { %v4819_v52 = vpop.f32.mrb[23].mxu0  ;;  %v4821_v53 = vpop.f32.mrb[23].mxu1 }
 0x10d   :  { %v4823_v56 = vpop.f32.mrb[24].mxu0  ;;  %v4825_v57 = vpop.f32.mrb[24].mxu1 }
 0x10e   :  { %v4827_v0 = vpop.f32.mrb[25].mxu0  ;;  %v4829_v1 = vpop.f32.mrb[25].mxu1 }
 0x10f   :  { %v4831_v4 = vpop.f32.mrb[26].mxu0  ;;  %v4833_v5 = vpop.f32.mrb[26].mxu1 }
 0x110   :  { %6082 = vst [vmem:[#allocation2_spill] sm:$0xff] %v4833_v5  ;;  %v4835_v12 = vpop.f32.mrb[27].mxu0  ;;  %v4837_v13 = vpop.f32.mrb[27].mxu1 }
 0x111   :  { %6083 = vst [vmem:[#allocation3_spill] sm:$0xff] %v4835_v12  ;;  %6084 = vst [vmem:[#allocation4_spill] sm:$0xff] %v4837_v13 }
 0x115   :  { %v4839_v16 = vpop.f32.mrb[28].mxu0  ;;  %v4841_v17 = vpop.f32.mrb[28].mxu1 }
 0x116   :  { %6085 = vst [vmem:[#allocation5_spill] sm:$0xff] %v4839_v16  ;;  %6086 = vst [vmem:[#allocation6_spill] sm:$0xff] %v4841_v17  ;;  %v4843_v24 = vpop.f32.mrb[29].mxu0  ;;  %v4845_v25 = vpop.f32.mrb[29].mxu1 }
 0x117   :  { %6087 = vst [vmem:[#allocation7_spill] sm:$0xff] %v4843_v24  ;;  %6088 = vst [vmem:[#allocation8_spill] sm:$0xff] %v4845_v25  ;;  %v4847_v28 = vpop.f32.mrb[30].mxu0  ;;  %v4849_v29 = vpop.f32.mrb[30].mxu1 }
 0x118   :  { %6089 = vst [vmem:[#allocation9_spill] sm:$0xff] %v4847_v28  ;;  %6090 = vst [vmem:[#allocation10_spill] sm:$0xff] %v4849_v29  ;;  %v4851_v36 = vpop.f32.mrb[31].mxu0  ;;  %v4853_v37 = vpop.f32.mrb[31].mxu1 }
 0x119   :  { %6091 = vst [vmem:[#allocation11_spill] sm:$0xff] %v4851_v36  ;;  %6092 = vst [vmem:[#allocation12_spill] sm:$0xff] %v4853_v37 }
 0x11d   :  { %v4855_v5 = vpop.f32.mrb[32].mxu0  ;;  %v4857_v12 = vpop.f32.mrb[32].mxu1 }
 0x11e   :  { %6093 = vst [vmem:[#allocation13_spill] sm:$0xff] %v4855_v5  ;;  %6094 = vst [vmem:[#allocation14_spill] sm:$0xff] %v4857_v12  ;;  %v4859_v13 = vpop.f32.mrb[33].mxu0  ;;  %v4861_v16 = vpop.f32.mrb[33].mxu1 }
 0x11f   :  { %6095 = vst [vmem:[#allocation15_spill] sm:$0xff] %v4859_v13  ;;  %6096 = vst [vmem:[#allocation16_spill] sm:$0xff] %v4861_v16  ;;  %v4863_v17 = vpop.f32.mrb[34].mxu0  ;;  %v4865_v24 = vpop.f32.mrb[34].mxu1 }
 0x120   :  { %6097 = vst [vmem:[#allocation17_spill] sm:$0xff] %v4863_v17  ;;  %6098 = vst [vmem:[#allocation18_spill] sm:$0xff] %v4865_v24  ;;  %v4867_v25 = vpop.f32.mrb[35].mxu0  ;;  %v4869_v28 = vpop.f32.mrb[35].mxu1 }
 0x121   :  { %6099 = vst [vmem:[#allocation19_spill] sm:$0xff] %v4867_v25  ;;  %6100 = vst [vmem:[#allocation20_spill] sm:$0xff] %v4869_v28 }
 0x125   :  { %v4871_v29 = vpop.f32.mrb[36].mxu0  ;;  %v4873_v36 = vpop.f32.mrb[36].mxu1 }
 0x126   :  { %6101 = vst [vmem:[#allocation21_spill] sm:$0xff] %v4871_v29  ;;  %6102 = vst [vmem:[#allocation22_spill] sm:$0xff] %v4873_v36  ;;  %v4875_v37 = vpop.f32.mrb[37].mxu0  ;;  %v4877_v5 = vpop.f32.mrb[37].mxu1 }
 0x127   :  { %6103 = vst [vmem:[#allocation23_spill] sm:$0xff] %v4875_v37  ;;  %6104 = vst [vmem:[#allocation24_spill] sm:$0xff] %v4877_v5  ;;  %v4879_v12 = vpop.f32.mrb[38].mxu0  ;;  %v4881_v13 = vpop.f32.mrb[38].mxu1 }
 0x128   :  { %6105 = vst [vmem:[#allocation25_spill] sm:$0xff] %v4879_v12  ;;  %6106 = vst [vmem:[#allocation26_spill] sm:$0xff] %v4881_v13  ;;  %v4883_v16 = vpop.f32.mrb[39].mxu0  ;;  %v4885_v17 = vpop.f32.mrb[39].mxu1 }
 0x129   :  { %6107 = vst [vmem:[#allocation27_spill] sm:$0xff] %v4883_v16  ;;  %6108 = vst [vmem:[#allocation28_spill] sm:$0xff] %v4885_v17 }
 0x12d   :  { %v4887_v24 = vpop.f32.mrb[40].mxu0  ;;  %v4889_v25 = vpop.f32.mrb[40].mxu1 }
 0x12e   :  { %6109 = vst [vmem:[#allocation29_spill] sm:$0xff] %v4887_v24  ;;  %6110 = vst [vmem:[#allocation30_spill] sm:$0xff] %v4889_v25  ;;  %v4891_v28 = vpop.f32.mrb[41].mxu0  ;;  %v4893_v29 = vpop.f32.mrb[41].mxu1 }
 0x12f   :  { %6111 = vst [vmem:[#allocation31_spill] sm:$0xff] %v4891_v28  ;;  %6112 = vst [vmem:[#allocation32_spill] sm:$0xff] %v4893_v29  ;;  %v4895_v36 = vpop.f32.mrb[42].mxu0  ;;  %v4897_v37 = vpop.f32.mrb[42].mxu1 }
 0x130   :  { %6113 = vst [vmem:[#allocation33_spill] sm:$0xff] %v4895_v36  ;;  %6114 = vst [vmem:[#allocation34_spill] sm:$0xff] %v4897_v37  ;;  %v4899_v5 = vpop.f32.mrb[43].mxu0  ;;  %v4901_v12 = vpop.f32.mrb[43].mxu1 }
 0x131   :  { %6115 = vst [vmem:[#allocation35_spill] sm:$0xff] %v4899_v5  ;;  %6116 = vst [vmem:[#allocation36_spill] sm:$0xff] %v4901_v12 }
 0x135   :  { %v4903_v13 = vpop.f32.mrb[44].mxu0  ;;  %v4905_v16 = vpop.f32.mrb[44].mxu1 }
 0x136   :  { %6117 = vst [vmem:[#allocation37_spill] sm:$0xff] %v4903_v13  ;;  %6118 = vst [vmem:[#allocation38_spill] sm:$0xff] %v4905_v16  ;;  %v4907_v17 = vpop.f32.mrb[45].mxu0  ;;  %v4909_v24 = vpop.f32.mrb[45].mxu1 }
 0x137   :  { %6119 = vst [vmem:[#allocation39_spill] sm:$0xff] %v4907_v17  ;;  %6120 = vst [vmem:[#allocation40_spill] sm:$0xff] %v4909_v24  ;;  %v4911_v25 = vpop.f32.mrb[46].mxu0  ;;  %v4913_v28 = vpop.f32.mrb[46].mxu1 }
 0x138   :  { %6121 = vst [vmem:[#allocation41_spill] sm:$0xff] %v4911_v25  ;;  %6122 = vst [vmem:[#allocation42_spill] sm:$0xff] %v4913_v28  ;;  %v4915_v29 = vpop.f32.mrb[47].mxu0  ;;  %v4917_v36 = vpop.f32.mrb[47].mxu1  ;;  %v4937_v28 = vsel %vm927_vm0, %v4655_v48, -inf  ;;  %v4957_v48 = vsel %vm927_vm0, %v4679_v58, -inf }
 0x139   :  { %v4977_v58 = vsel %vm927_vm0, %v4689_v61, -inf }
 0x13d   :  { %v4919_v37 = vpop.f32.mrb[48].mxu0  ;;  %v4921_v5 = vpop.f32.mrb[48].mxu1 }
 0x13e   :  { %6123 = vst [vmem:[#allocation43_spill] sm:$0xff] %v4919_v37  ;;  %6124 = vst [vmem:[#allocation44_spill] sm:$0xff] %v4921_v5  ;;  %v4923_v12 = vpop.f32.mrb[49].mxu0  ;;  %v4925_v13 = vpop.f32.mrb[49].mxu1  ;;  %v4941_v37 = vsel %vm927_vm0, %v4659_v50, -inf  ;;  %v4945_v5 = vsel %vm927_vm0, %v4657_v49, -inf }
 0x13f   :  { %6125 = vst [vmem:[#allocation45_spill] sm:$0xff] %v4925_v13  ;;  %v4927_v16 = vpop.f32.mrb[50].mxu0  ;;  %v4929_v17 = vpop.f32.mrb[50].mxu1  ;;  %v4949_v13 = vsel %vm927_vm0, %v4669_v54, -inf  ;;  %v4961_v50 = vsel %vm927_vm0, %v4671_v55, -inf  ;;  %v4965_v49 = vsel %vm927_vm0, %v4681_v59, -inf }
 0x140   :  { %6126 = vst [vmem:[#allocation46_spill] sm:$0xff] %v4929_v17  ;;  %v4931_v24 = vpop.f32.mrb[51].mxu0  ;;  %v4933_v25 = vpop.f32.mrb[51].mxu1  ;;  %v4953_v17 = vsel %vm927_vm0, %v4661_v51, -inf  ;;  %v4969_v54 = vsel %vm927_vm0, %v4687_v60, -inf  ;;  %v4973_v51 = vsel %vm927_vm0, %v4691_v62, -inf }
 0x141   :  { %6127 = vst [vmem:[#allocation47_spill] sm:$0xff] %v4973_v51  ;;  %v4981_v55 = vsel %vm927_vm0, %v4701_v2, -inf  ;;  %v4985_v59 = vsel %vm927_vm0, %v4693_v63, -inf  ;;  %v4989_v60 = vsel %vm927_vm0, %v4711_v6, -inf  ;;  %v4993_v62 = vsel %vm927_vm0, %v4703_v3, -inf }
 0x142   :  { %6128 = vst [vmem:[#allocation48_spill] sm:$0xff] %v4989_v60  ;;  %6129 = vst [vmem:[#allocation49_spill] sm:$0xff] %v4993_v62  ;;  %v5001_v2 = vsel %vm927_vm0, %v4713_v7, -inf  ;;  %v5005_v63 = vsel %vm927_vm0, %v4719_v8, -inf  ;;  %v5009_v6 = vsel %vm927_vm0, %v4723_v10, -inf  ;;  %v5013_v3 = vsel %vm927_vm0, %v4721_v9, -inf }
 0x143   :  { %6130 = vst [vmem:[#allocation50_spill] sm:$0xff] %v5009_v6  ;;  %6131 = vst [vmem:[#allocation51_spill] sm:$0xff] %v5013_v3  ;;  %v5021_v7 = vsel %vm927_vm0, %v4733_v14, -inf  ;;  %v5025_v8 = vsel %vm927_vm0, %v4725_v11, -inf  ;;  %v5029_v10 = vsel %vm927_vm0, %v4743_v18, -inf  ;;  %v5033_v9 = vsel %vm927_vm0, %v4735_v15, -inf }
 0x144   :  { %6132 = vst [vmem:[#allocation52_spill] sm:$0xff] %v5029_v10  ;;  %6133 = vst [vmem:[#allocation53_spill] sm:$0xff] %v5033_v9  ;;  %v5041_v14 = vsel %vm927_vm0, %v4745_v19, -inf  ;;  %v5045_v11 = vsel %vm927_vm0, %v4751_v20, -inf  ;;  %v5049_v18 = vsel %vm927_vm0, %v4755_v22, -inf  ;;  %v5053_v15 = vsel %vm927_vm0, %v4753_v21, -inf }
 0x145   :  { %v4995_v51 = vpop.f32.mrb[52].mxu0  ;;  %v4997_v61 = vpop.f32.mrb[52].mxu1  ;;  %6134 = vst [vmem:[#allocation54_spill] sm:$0xff] %v5053_v15  ;;  %v5061_v19 = vsel %vm927_vm0, %v4765_v26, -inf  ;;  %v5065_v20 = vsel %vm927_vm0, %v4757_v23, -inf  ;;  %v5069_v22 = vsel %vm927_vm0, %v4775_v30, -inf }
 0x146   :  { %v5015_v60 = vpop.f32.mrb[53].mxu0  ;;  %v5017_v62 = vpop.f32.mrb[53].mxu1  ;;  %v5073_v21 = vsel %vm927_vm0, %v4767_v27, -inf  ;;  %v5077_v15 = vsel %vm927_vm0, %v4777_v31, -inf  ;;  %v5081_v26 = vsel %vm927_vm0, %v4783_v32, -inf  ;;  %v5085_v23 = vsel %vm927_vm0, %v4787_v34, -inf }
 0x147   :  { %v5035_v3 = vpop.f32.mrb[54].mxu0  ;;  %v5037_v6 = vpop.f32.mrb[54].mxu1  ;;  %6135 = vst [vmem:[#allocation55_spill] sm:$0xff] %v5085_v23  ;;  %v5089_v30 = vsel %vm927_vm0, %v4785_v33, -inf  ;;  %v5093_v27 = vsel %vm927_vm0, %v4797_v38, -inf  ;;  %v5097_v31 = vsel %vm927_vm0, %v4789_v35, -inf }
 0x148   :  { %v5055_v10 = vpop.f32.mrb[55].mxu0  ;;  %v5057_v9 = vpop.f32.mrb[55].mxu1  ;;  %6136 = vst [vmem:[#allocation56_spill] sm:$0xff] %v5089_v30  ;;  %6137 = vst [vmem:[#allocation57_spill] sm:$0xff] %v5093_v27  ;;  %v5101_v32 = vsel %vm927_vm0, %v4801_v40, -inf  ;;  %v5105_v34 = vsel %vm927_vm0, %v4799_v39, -inf }
 0x149   :  { %6138 = vst [vmem:[#allocation58_spill] sm:$0xff] %v5097_v31  ;;  %6139 = vst [vmem:[#allocation59_spill] sm:$0xff] %v5101_v32  ;;  %v5109_v33 = vsel %vm927_vm0, %v4803_v41, -inf  ;;  %v5113_v38 = vsel %vm927_vm0, %v4807_v42, -inf  ;;  %v5117_v35 = vsel %vm927_vm0, %v4811_v44, -inf  ;;  %v5121_v40 = vsel %vm927_vm0, %v4809_v43, -inf }
 0x14a   :  { %6140 = vst [vmem:[#allocation60_spill] sm:$0xff] %v5105_v34  ;;  %6141 = vst [vmem:[#allocation61_spill] sm:$0xff] %v5109_v33  ;;  %v5125_v39 = vsel %vm927_vm0, %v4815_v46, -inf  ;;  %v5129_v41 = vsel %vm927_vm0, %v4813_v45, -inf  ;;  %v5133_v42 = vsel %vm927_vm0, %v4819_v52, -inf  ;;  %v5137_v44 = vsel %vm927_vm0, %v4817_v47, -inf }
 0x14b   :  { %6142 = vst [vmem:[#allocation62_spill] sm:$0xff] %v5113_v38  ;;  %6143 = vst [vmem:[#allocation63_spill] sm:$0xff] %v5117_v35  ;;  %v5145_v46 = vsel %vm927_vm0, %v4821_v53, -inf  ;;  %v5149_v45 = vsel %vm927_vm0, %v4823_v56, -inf  ;;  %v5153_v52 = vsel %vm927_vm0, %v4827_v0, -inf  ;;  %v5157_v47 = vsel %vm927_vm0, %v4825_v57, -inf }
 0x14c   :  { %6144 = vst [vmem:[#allocation64_spill] sm:$0xff] %v5121_v40  ;;  %6145 = vst [vmem:[#allocation65_spill] sm:$0xff] %v5125_v39  ;;  %v5165_v53 = vsel %vm927_vm0, %v4831_v4, -inf  ;;  %v5169_v56 = vsel %vm927_vm0, %v4829_v1, -inf  ;;  %v6167_v40 = vld [vmem:[#allocation9_spill] sm:$0xff]  ;;  %v6223_v27 = vld [vmem:[#allocation36_spill] sm:$0xff] }
 0x14d   :  { %6146 = vst [vmem:[#allocation66_spill] sm:$0xff] %v5129_v41  ;;  %6147 = vst [vmem:[#allocation67_spill] sm:$0xff] %v5133_v42  ;;  %v5139_v35 = vpop.f32.mrb[56].mxu0  ;;  %v5141_v43 = vpop.f32.mrb[56].mxu1  ;;  %v6159_v41 = vld [vmem:[#allocation4_spill] sm:$0xff]  ;;  %v6177_v33 = vld [vmem:[#allocation13_spill] sm:$0xff] }
 0x14e   :  { %6148 = vst [vmem:[#allocation68_spill] sm:$0xff] %v5137_v44  ;;  %6149 = vst [vmem:[#allocation69_spill] sm:$0xff] %v5145_v46  ;;  %v5159_v42 = vpop.f32.mrb[57].mxu0  ;;  %v5161_v44 = vpop.f32.mrb[57].mxu1  ;;  %v5185_v4 = vsel %vm927_vm0, %v6159_v41, -inf  ;;  %v5205_v41 = vsel %vm927_vm0, %v6167_v40, -inf }
 0x14f   :  { %6150 = vst [vmem:[#allocation70_spill] sm:$0xff] %v5149_v45  ;;  %6151 = vst [vmem:[#allocation71_spill] sm:$0xff] %v5153_v52  ;;  %v6155_v45 = vld [vmem:[#allocation3_spill] sm:$0xff]  ;;  %v6157_v52 = vld [vmem:[#allocation2_spill] sm:$0xff]  ;;  %v5181_v46 = vpop.f32.mrb[58].mxu1  ;;  %v5225_v40 = vsel %vm927_vm0, %v6177_v33, -inf }
 0x150   :  { %6152 = vst [vmem:[#allocation72_spill] sm:$0xff] %v5157_v47  ;;  %6153 = vst [vmem:[#allocation73_spill] sm:$0xff] %v5165_v53  ;;  %v5173_v0 = vsel %vm927_vm0, %v6155_v45, -inf  ;;  %v5177_v57 = vsel %vm927_vm0, %v6157_v52, -inf  ;;  %v5179_v47 = vpop.f32.mrb[58].mxu0  ;;  %v6161_v53 = vld [vmem:[#allocation5_spill] sm:$0xff] }
 0x151   :  { %6154 = vst [vmem:[#allocation74_spill] sm:$0xff] %v5169_v56  ;;  %6156 = vst [vmem:[#allocation3_spill] sm:$0xff] %v5173_v0  ;;  %v5189_v1 = vsel %vm927_vm0, %v6161_v53, -inf  ;;  %v6163_v56 = vld [vmem:[#allocation7_spill] sm:$0xff]  ;;  %v6165_v0 = vld [vmem:[#allocation6_spill] sm:$0xff]  ;;  %v5201_v39 = vpop.f32.mrb[59].mxu1 }
 0x152   :  { %6158 = vst [vmem:[#allocation2_spill] sm:$0xff] %v5177_v57  ;;  %6160 = vst [vmem:[#allocation4_spill] sm:$0xff] %v5185_v4  ;;  %v5193_v45 = vsel %vm927_vm0, %v6163_v56, -inf  ;;  %v5197_v52 = vsel %vm927_vm0, %v6165_v0, -inf  ;;  %v5199_v57 = vpop.f32.mrb[59].mxu0  ;;  %v6169_v4 = vld [vmem:[#allocation8_spill] sm:$0xff] }
 0x153   :  { %6162 = vst [vmem:[#allocation5_spill] sm:$0xff] %v5189_v1  ;;  %6164 = vst [vmem:[#allocation7_spill] sm:$0xff] %v5193_v45  ;;  %v5209_v53 = vsel %vm927_vm0, %v6169_v4, -inf  ;;  %v6171_v1 = vld [vmem:[#allocation11_spill] sm:$0xff]  ;;  %v6173_v45 = vld [vmem:[#allocation10_spill] sm:$0xff] }
 0x154   :  { %6166 = vst [vmem:[#allocation6_spill] sm:$0xff] %v5197_v52  ;;  %6168 = vst [vmem:[#allocation9_spill] sm:$0xff] %v5205_v41  ;;  %v5213_v56 = vsel %vm927_vm0, %v6171_v1, -inf  ;;  %v5217_v0 = vsel %vm927_vm0, %v6173_v45, -inf  ;;  %v6175_v52 = vld [vmem:[#allocation12_spill] sm:$0xff]  ;;  %v6179_v41 = vld [vmem:[#allocation15_spill] sm:$0xff] }
 0x155   :  { %6170 = vst [vmem:[#allocation8_spill] sm:$0xff] %v5209_v53  ;;  %6172 = vst [vmem:[#allocation11_spill] sm:$0xff] %v5213_v56  ;;  %v5221_v38 = vsel %vm927_vm0, %v6175_v52, -inf  ;;  %v5229_v4 = vsel %vm927_vm0, %v6179_v41, -inf  ;;  %v6181_v53 = vld [vmem:[#allocation14_spill] sm:$0xff]  ;;  %v6183_v56 = vld [vmem:[#allocation17_spill] sm:$0xff] }
 0x156   :  { %6174 = vst [vmem:[#allocation10_spill] sm:$0xff] %v5217_v0  ;;  %6176 = vst [vmem:[#allocation12_spill] sm:$0xff] %v5221_v38  ;;  %v5233_v1 = vsel %vm927_vm0, %v6181_v53, -inf  ;;  %v5237_v45 = vsel %vm927_vm0, %v6183_v56, -inf  ;;  %v6185_v0 = vld [vmem:[#allocation16_spill] sm:$0xff]  ;;  %v6187_v38 = vld [vmem:[#allocation19_spill] sm:$0xff] }
 0x157   :  { %6178 = vst [vmem:[#allocation13_spill] sm:$0xff] %v5225_v40  ;;  %6180 = vst [vmem:[#allocation15_spill] sm:$0xff] %v5229_v4  ;;  %v5241_v52 = vsel %vm927_vm0, %v6185_v0, -inf  ;;  %v5245_v33 = vsel %vm927_vm0, %v6187_v38, -inf  ;;  %v6189_v40 = vld [vmem:[#allocation18_spill] sm:$0xff]  ;;  %v6191_v4 = vld [vmem:[#allocation20_spill] sm:$0xff] }
 0x158   :  { %6182 = vst [vmem:[#allocation14_spill] sm:$0xff] %v5233_v1  ;;  %6184 = vst [vmem:[#allocation17_spill] sm:$0xff] %v5237_v45  ;;  %v5249_v41 = vsel %vm927_vm0, %v6189_v40, -inf  ;;  %v5253_v53 = vsel %vm927_vm0, %v6191_v4, -inf  ;;  %v6193_v1 = vld [vmem:[#allocation21_spill] sm:$0xff]  ;;  %v6195_v45 = vld [vmem:[#allocation23_spill] sm:$0xff] }
 0x159   :  { %6186 = vst [vmem:[#allocation16_spill] sm:$0xff] %v5241_v52  ;;  %6188 = vst [vmem:[#allocation19_spill] sm:$0xff] %v5245_v33  ;;  %v5257_v56 = vsel %vm927_vm0, %v6193_v1, -inf  ;;  %v5261_v0 = vsel %vm927_vm0, %v6195_v45, -inf  ;;  %v6197_v52 = vld [vmem:[#allocation22_spill] sm:$0xff]  ;;  %v6199_v33 = vld [vmem:[#allocation25_spill] sm:$0xff] }
 0x15a   :  { %6190 = vst [vmem:[#allocation18_spill] sm:$0xff] %v5249_v41  ;;  %6192 = vst [vmem:[#allocation20_spill] sm:$0xff] %v5253_v53  ;;  %v5265_v38 = vsel %vm927_vm0, %v6197_v52, -inf  ;;  %v5269_v40 = vsel %vm927_vm0, %v6199_v33, -inf  ;;  %v6201_v41 = vld [vmem:[#allocation24_spill] sm:$0xff]  ;;  %v6203_v53 = vld [vmem:[#allocation27_spill] sm:$0xff] }
 0x15b   :  { %6194 = vst [vmem:[#allocation21_spill] sm:$0xff] %v5257_v56  ;;  %6196 = vst [vmem:[#allocation23_spill] sm:$0xff] %v5261_v0  ;;  %v5273_v4 = vsel %vm927_vm0, %v6201_v41, -inf  ;;  %v5277_v1 = vsel %vm927_vm0, %v6203_v53, -inf  ;;  %v6205_v56 = vld [vmem:[#allocation26_spill] sm:$0xff]  ;;  %v5283_v0 = vpop.f32.mrb[60].mxu0 }
 0x15c   :  { %6198 = vst [vmem:[#allocation22_spill] sm:$0xff] %v5265_v38  ;;  %6200 = vst [vmem:[#allocation25_spill] sm:$0xff] %v5269_v40  ;;  %v5281_v45 = vsel %vm927_vm0, %v6205_v56, -inf  ;;  %v5285_v52 = vpop.f32.mrb[60].mxu1  ;;  %v6207_v38 = vld [vmem:[#allocation28_spill] sm:$0xff]  ;;  %v6209_v40 = vld [vmem:[#allocation29_spill] sm:$0xff] }
 0x15d   :  { %6202 = vst [vmem:[#allocation24_spill] sm:$0xff] %v5273_v4  ;;  %6204 = vst [vmem:[#allocation27_spill] sm:$0xff] %v5277_v1  ;;  %v5289_v33 = vsel %vm927_vm0, %v6207_v38, -inf  ;;  %v5293_v41 = vsel %vm927_vm0, %v6209_v40, -inf  ;;  %v6211_v4 = vld [vmem:[#allocation31_spill] sm:$0xff]  ;;  %v6213_v1 = vld [vmem:[#allocation30_spill] sm:$0xff] }
 0x15e   :  { %6206 = vst [vmem:[#allocation26_spill] sm:$0xff] %v5281_v45  ;;  %6208 = vst [vmem:[#allocation28_spill] sm:$0xff] %v5289_v33  ;;  %v5297_v53 = vsel %vm927_vm0, %v6211_v4, -inf  ;;  %v5301_v56 = vsel %vm927_vm0, %v6213_v1, -inf  ;;  %v5303_v45 = vpop.f32.mrb[61].mxu0  ;;  %v5305_v34 = vpop.f32.mrb[61].mxu1 }
 0x15f   :  { %6210 = vst [vmem:[#allocation29_spill] sm:$0xff] %v5293_v41  ;;  %6212 = vst [vmem:[#allocation31_spill] sm:$0xff] %v5297_v53  ;;  %v6215_v32 = vld [vmem:[#allocation33_spill] sm:$0xff]  ;;  %v6217_v33 = vld [vmem:[#allocation32_spill] sm:$0xff]  ;;  %v5325_v31 = vpop.f32.mrb[62].mxu1 }
 0x160   :  { %6214 = vst [vmem:[#allocation30_spill] sm:$0xff] %v5301_v56  ;;  %v5309_v38 = vsel %vm927_vm0, %v6215_v32, -inf  ;;  %v5313_v40 = vsel %vm927_vm0, %v6217_v33, -inf  ;;  %v6219_v41 = vld [vmem:[#allocation35_spill] sm:$0xff]  ;;  %v6221_v53 = vld [vmem:[#allocation34_spill] sm:$0xff]  ;;  %v5323_v56 = vpop.f32.mrb[62].mxu0 }
 0x161   :  { %6216 = vst [vmem:[#allocation33_spill] sm:$0xff] %v5309_v38  ;;  %6218 = vst [vmem:[#allocation32_spill] sm:$0xff] %v5313_v40  ;;  %v5317_v4 = vsel %vm927_vm0, %v6219_v41, -inf  ;;  %v5321_v1 = vsel %vm927_vm0, %v6221_v53, -inf  ;;  %v5329_v32 = vsel %vm927_vm0, %v6223_v27, -inf  ;;  %v6225_v38 = vld [vmem:[#allocation37_spill] sm:$0xff] }
 0x162   :  { %6220 = vst [vmem:[#allocation35_spill] sm:$0xff] %v5317_v4  ;;  %6222 = vst [vmem:[#allocation34_spill] sm:$0xff] %v5321_v1  ;;  %v5333_v33 = vsel %vm927_vm0, %v6225_v38, -inf  ;;  %v6226_v40 = vld [vmem:[#allocation39_spill] sm:$0xff]  ;;  %v6228_v4 = vld [vmem:[#allocation38_spill] sm:$0xff]  ;;  %v5343_v1 = vpop.f32.mrb[63].mxu0 }
 0x163   :  { %6224 = vst [vmem:[#allocation36_spill] sm:$0xff] %v5329_v32  ;;  %v5337_v41 = vsel %vm927_vm0, %v6226_v40, -inf  ;;  %v5341_v53 = vsel %vm927_vm0, %v6228_v4, -inf  ;;  %v5345_v30 = vpop.f32.mrb[63].mxu1  ;;  %v6231_v23 = vld [vmem:[#allocation41_spill] sm:$0xff]  ;;  %v6232_v32 = vld [vmem:[#allocation40_spill] sm:$0xff] }
 0x164   :  { %6227 = vst [vmem:[#allocation37_spill] sm:$0xff] %v5337_v41  ;;  %6229 = vst [vmem:[#allocation39_spill] sm:$0xff] %v5341_v53  ;;  %v5349_v27 = vsel %vm927_vm0, %v6231_v23, -inf  ;;  %v5353_v38 = vsel %vm927_vm0, %v6232_v32, -inf  ;;  %v5357_v40 = vsel %vm927_vm0, %v4915_v29, -inf  ;;  %v6235_v41 = vld [vmem:[#allocation42_spill] sm:$0xff] }
 0x165   :  { %6230 = vst [vmem:[#allocation38_spill] sm:$0xff] %v5345_v30  ;;  %6233 = vst [vmem:[#allocation41_spill] sm:$0xff] %v5353_v38  ;;  %v5361_v4 = vsel %vm927_vm0, %v6235_v41, -inf  ;;  %v5365_v53 = vsel %vm927_vm0, %v4917_v36, -inf  ;;  %v6236_v30 = vld [vmem:[#allocation43_spill] sm:$0xff]  ;;  %v5373_v32 = vsel %vm927_vm0, %v4923_v12, -inf }
 0x166   :  { %6234 = vst [vmem:[#allocation40_spill] sm:$0xff] %v5357_v40  ;;  %v5369_v23 = vsel %vm927_vm0, %v6236_v30, -inf  ;;  %v6238_v38 = vld [vmem:[#allocation44_spill] sm:$0xff]  ;;  %v5381_v41 = vsel %vm927_vm0, %v4927_v16, -inf  ;;  %v6239_v40 = vld [vmem:[#allocation45_spill] sm:$0xff]  ;;  %v5389_v30 = vsel %vm927_vm0, %v4931_v24, -inf }
 0x167   :  { %6237 = vst [vmem:[#allocation42_spill] sm:$0xff] %v5369_v23  ;;  %v5377_v29 = vsel %vm927_vm0, %v6238_v38, -inf  ;;  %v5385_v36 = vsel %vm927_vm0, %v6239_v40, -inf  ;;  %v6240_v23 = vld [vmem:[#allocation46_spill] sm:$0xff]  ;;  %v5397_v38 = vsel %vm927_vm0, %v4933_v25, -inf  ;;  %v5401_v16 = vsel %vm927_vm0, %v4995_v51, -inf }
 0x168   :  { %v5393_v12 = vsel %vm927_vm0, %v6240_v23, -inf  ;;  %6241 = vst [vmem:[#allocation43_spill] sm:$0xff] %v5401_v16  ;;  %v5405_v40 = vsel %vm927_vm0, %v5015_v60, -inf  ;;  %v5409_v24 = vsel %vm927_vm0, %v4997_v61, -inf  ;;  %v5413_v23 = vsel %vm927_vm0, %v5035_v3, -inf  ;;  %v3992_v16 = vpop.f32.mrb[64].mxu1 }
 0x169   :  { %6242 = vst [vmem:[#allocation44_spill] sm:$0xff] %v5405_v40  ;;  %v5417_v25 = vsel %vm927_vm0, %v5017_v62, -inf  ;;  %v5421_v51 = vsel %vm927_vm0, %v5055_v10, -inf  ;;  %v5425_v60 = vsel %vm927_vm0, %v5037_v6, -inf  ;;  %v3864_v40 = vpop.f32.mrb[64].mxu0  ;;  %v5429_v61 = vsel %vm927_vm0, %v5057_v9, -inf }
 0x16a   :  { %6243 = vst [vmem:[#allocation45_spill] sm:$0xff] %v5417_v25  ;;  %6244 = vst [vmem:[#allocation46_spill] sm:$0xff] %v5421_v51  ;;  %v5433_v3 = vsel %vm927_vm0, %v5139_v35, -inf  ;;  %v5437_v62 = vsel %vm927_vm0, %v5141_v43, -inf  ;;  %v2384_v10 = vsel %vm927_vm0, %v3864_v40, -inf  ;;  %v1602_v51 = vpop.f32.mrb[65].mxu0 }
 0x16b   :  { %6245 = vst [vmem:[#allocation75_spill] sm:$0xff] %v5425_v60  ;;  %6246 = vst [vmem:[#allocation76_spill] sm:$0xff] %v5429_v61  ;;  %v2114_v25 = vpop.f32.mrb[65].mxu1  ;;  %v5442_v6 = vsel %vm927_vm0, %v5159_v42, -inf  ;;  %v5446_v9 = vsel %vm927_vm0, %v5161_v44, -inf  ;;  %v2385_v61 = vmax.f32 %v4937_v28, %v2384_v10  ;;  %v2370_v35 = vsel %vm927_vm0, %v1602_v51, -inf }
 0x16c   :  { %6247 = vst [vmem:[#allocation77_spill] sm:$0xff] %v5433_v3  ;;  %6248 = vst [vmem:[#allocation78_spill] sm:$0xff] %v5437_v62  ;;  %v3865_v3 = vpop.f32.mrb[66].mxu0  ;;  %v3993_v60 = vpop.f32.mrb[66].mxu1  ;;  %v5452_v43 = vsel %vm927_vm0, %v5179_v47, -inf  ;;  %v2371_v40 = vmax.f32 %v4941_v37, %v2370_v35  ;;  %v2388_v62 = vsel %vm927_vm0, %v3992_v16, -inf }
 0x16d   :  { %6249 = vst [vmem:[#allocation79_spill] sm:$0xff] %v5442_v6  ;;  %6250 = vst [vmem:[#allocation80_spill] sm:$0xff] %v5446_v9  ;;  %v2391_v42 = vsel %vm927_vm0, %v3865_v3, -inf  ;;  %v1605_v6 = vpop.f32.mrb[67].mxu0  ;;  %v2117_v44 = vpop.f32.mrb[67].mxu1  ;;  %v2387_v9 = vmax.f32 %v2385_v61, %v4945_v5  ;;  %v2374_v51 = vsel %vm927_vm0, %v2114_v25, -inf }
 0x16e   :  { %v2392_v28 = vmax.f32 %v4949_v13, %v2391_v42  ;;  %v2377_v10 = vsel %vm927_vm0, %v1605_v6, -inf  ;;  %v5463_v47 = vsel %vm927_vm0, %v5199_v57, -inf  ;;  %v5467_v37 = vsel %vm927_vm0, %v5181_v46, -inf  ;;  %v5472_v16 = vld [vmem:[%s6080_s2] ss:$0 sm:$0xff] }
 0x16f   :  { %v2373_v5 = vmax.f32 %v2371_v40, %v4953_v17  ;;  %v2378_v13 = vmax.f32 %v4957_v48, %v2377_v10  ;;  %v5478_v25 = vsel %vm927_vm0, %v5201_v39, -inf  ;;  %v5482_v57 = vsel %vm927_vm0, %v5283_v0, -inf }
 0x170   :  { %v2389_v61 = vmax.f32 %v2387_v9, %v2388_v62  ;;  %v2394_v46 = vmax.f32 %v2392_v28, %v4961_v50  ;;  %v5487_v3 = vsel %vm927_vm0, %v5285_v52, -inf  ;;  %v2395_v17 = vsel %vm927_vm0, %v3993_v60, -inf  ;;  %v3868_v9 = vpop.f32.mrb[68].mxu0  ;;  %v3996_v50 = vpop.f32.mrb[68].mxu1 }
 0x171   :  { %6251 = vst [vmem:[#allocation81_spill] sm:$0xff] %v5487_v3  ;;  %v2375_v6 = vmax.f32 %v2373_v5, %v2374_v51  ;;  %v2380_v48 = vmax.f32 %v2378_v13, %v4965_v49  ;;  %v5493_v39 = vsel %vm927_vm0, %v5303_v45, -inf  ;;  %v2381_v62 = vsel %vm927_vm0, %v2117_v44, -inf  ;;  %v1618_v28 = vpop.f32.mrb[69].mxu0  ;;  %v2130_v49 = vpop.f32.mrb[69].mxu1 }
 0x172   :  { %v2826_v35 = vadd.f32 %v5472_v16, %v2389_v61  ;;  %v2396_v0 = vmax.f32 %v2394_v46, %v2395_v17  ;;  %v2412_v42 = vsel %vm927_vm0, %v3868_v9, -inf  ;;  %v2416_v60 = vsel %vm927_vm0, %v3996_v50, -inf  ;;  %v3869_v13 = vpop.f32.mrb[70].mxu0  ;;  %v3997_v44 = vpop.f32.mrb[70].mxu1 }
 0x173   :  { %v2824_v40 = vadd.f32 %v5472_v16, %v2375_v6  ;;  %v2382_v52 = vmax.f32 %v2380_v48, %v2381_v62  ;;  %v2413_v10 = vmax.f32 %v4969_v54, %v2412_v42  ;;  %v2398_v5 = vsel %vm927_vm0, %v1618_v28, -inf  ;;  %v6252_v6 = vld [vmem:[#allocation47_spill] sm:$0xff]  ;;  %v1621_v62 = vpop.f32.mrb[71].mxu0  ;;  %v2133_v9 = vpop.f32.mrb[71].mxu1 }
 0x174   :  { %v2890_v51 = vmax.f32 %v2826_v35, 0.0  ;;  %v2827_v45 = vadd.f32 %v5472_v16, %v2396_v0  ;;  %v2399_v17 = vmax.f32 %v6252_v6, %v2398_v5  ;;  %v2419_v48 = vsel %vm927_vm0, %v3869_v13, -inf  ;;  %v3872_v6 = vpop.f32.mrb[72].mxu0 }
 0x175   :  { %v2888_v61 = vmax.f32 %v2824_v40, 0.0  ;;  %v2825_v46 = vadd.f32 %v5472_v16, %v2382_v52  ;;  %v2415_v35 = vmax.f32 %v2413_v10, %v4977_v58  ;;  %v2420_v0 = vmax.f32 %v4981_v55, %v2419_v48 }
 0x176   :  { %v3602_v50 = vpack.c.bf16 %v2890_v51, %v2890_v51  ;;  %v2891_v3 = vmax.f32 %v2827_v45, 0.0  ;;  %v2401_v28 = vmax.f32 %v2399_v17, %v4985_v59  ;;  %v2402_v40 = vsel %vm927_vm0, %v2130_v49, -inf  ;;  %v6253_v45 = vld [vmem:[#allocation49_spill] sm:$0xff]  ;;  %v6254_v59 = vld [vmem:[#allocation48_spill] sm:$0xff]  ;;  %v4000_v17 = vpop.f32.mrb[72].mxu1 }
 0x177   :  { %v3600_v54 = vpack.c.bf16 %v2888_v61, %v2888_v61  ;;  %v2889_v42 = vmax.f32 %v2825_v46, 0.0  ;;  %v2417_v5 = vmax.f32 %v2415_v35, %v2416_v60  ;;  %v2405_v51 = vsel %vm927_vm0, %v1621_v62, -inf  ;;  %v1634_v62 = vpop.f32.mrb[73].mxu0  ;;  %v2146_v35 = vpop.f32.mrb[73].mxu1 }
 0x178   :  { %3211 = vst.msk [vmem:[%s6081_s3 + $0x8] sm:$0xf] %vm3208_vm1, %v3602_v50  ;;  %v3603_v52 = vpack.c.bf16 %v2891_v3, %v2891_v3  ;;  %v2422_v13 = vmax.f32 %v2420_v0, %v6253_v45  ;;  %v2403_v55 = vmax.f32 %v2401_v28, %v2402_v40  ;;  %v2406_v49 = vmax.f32 %v6254_v59, %v2405_v51  ;;  %v3873_v28 = vpop.f32.mrb[74].mxu0  ;;  %v4001_v40 = vpop.f32.mrb[74].mxu1  ;;  %v6255_v51 = vld [vmem:[#allocation50_spill] sm:$0xff] }
 0x179   :  { %3209 = vst.msk [vmem:[%s6081_s3] sm:$0xf] %vm3208_vm1, %v3600_v54  ;;  %v3601_v58 = vpack.c.bf16 %v2889_v42, %v2889_v42  ;;  %v2423_v10 = vsel %vm927_vm0, %v3997_v44, -inf  ;;  %v5524_v61 = vsel %vm927_vm0, %v5305_v34, -inf  ;;  %v2830_v3 = vadd.f32 %v5472_v16, %v2417_v5 }
 0x17a   :  { %3212 = vst.msk [vmem:[%s6081_s3 + $0xc] sm:$0xf] %vm3208_vm1, %v3603_v52  ;;  %v2424_v60 = vmax.f32 %v2422_v13, %v2423_v10  ;;  %v2409_v46 = vsel %vm927_vm0, %v2133_v9, -inf  ;;  %v2828_v34 = vadd.f32 %v5472_v16, %v2403_v55  ;;  %v2408_v44 = vmax.f32 %v2406_v49, %v5001_v2  ;;  %v1637_v13 = vpop.f32.mrb[75].mxu0  ;;  %v6256_v49 = vld [vmem:[#allocation51_spill] sm:$0xff] }
 0x17b   :  { %3210 = vst.msk [vmem:[%s6081_s3 + $0x4] sm:$0xf] %vm3208_vm1, %v3601_v58  ;;  %v2440_v48 = vsel %vm927_vm0, %v3872_v6, -inf  ;;  %v2444_v50 = vsel %vm927_vm0, %v4000_v17, -inf  ;;  %v2894_v0 = vmax.f32 %v2830_v3, 0.0  ;;  %v2426_v42 = vsel %vm927_vm0, %v1634_v62, -inf }
 0x17c   :  { %v2831_v9 = vadd.f32 %v5472_v16, %v2424_v60  ;;  %v2441_v54 = vmax.f32 %v5005_v63, %v2440_v48  ;;  %v2892_v52 = vmax.f32 %v2828_v34, 0.0  ;;  %v2410_v5 = vmax.f32 %v2408_v44, %v2409_v46  ;;  %v2149_v58 = vpop.f32.mrb[75].mxu1  ;;  %v6257_v48 = vld [vmem:[#allocation53_spill] sm:$0xff] }
 0x17d   :  { %v2427_v45 = vmax.f32 %v6255_v51, %v2426_v42  ;;  %v2447_v2 = vsel %vm927_vm0, %v3873_v28, -inf  ;;  %v3606_v55 = vpack.c.bf16 %v2894_v0, %v2894_v0  ;;  %v2430_v17 = vsel %vm927_vm0, %v2146_v35, -inf  ;;  %v6258_v0 = vld [vmem:[#allocation52_spill] sm:$0xff] }
 0x17e   :  { %v2895_v59 = vmax.f32 %v2831_v9, 0.0  ;;  %v2443_v10 = vmax.f32 %v2441_v54, %v6256_v49  ;;  %v2448_v3 = vmax.f32 %v5021_v7, %v2447_v2  ;;  %v3604_v60 = vpack.c.bf16 %v2892_v52, %v2892_v52  ;;  %v3876_v52 = vpop.f32.mrb[76].mxu0 }
 0x17f   :  { %v2829_v63 = vadd.f32 %v5472_v16, %v2410_v5  ;;  %v2429_v6 = vmax.f32 %v2427_v45, %v5025_v8  ;;  %3215 = vst.msk [vmem:[%s6081_s3 + $0x18] sm:$0xf] %vm3208_vm1, %v3606_v55  ;;  %v2433_v44 = vsel %vm927_vm0, %v1637_v13, -inf  ;;  %v2451_v9 = vsel %vm927_vm0, %v4001_v40, -inf  ;;  %v4004_v5 = vpop.f32.mrb[76].mxu1  ;;  %v1650_v2 = vpop.f32.mrb[77].mxu0 }
 0x180   :  { %v3607_v46 = vpack.c.bf16 %v2895_v59, %v2895_v59  ;;  %v2445_v34 = vmax.f32 %v2443_v10, %v2444_v50  ;;  %v2450_v62 = vmax.f32 %v2448_v3, %v6257_v48  ;;  %3213 = vst.msk [vmem:[%s6081_s3 + $0x10] sm:$0xf] %vm3208_vm1, %v3604_v60  ;;  %v2434_v35 = vmax.f32 %v6258_v0, %v2433_v44  ;;  %v2162_v13 = vpop.f32.mrb[77].mxu1  ;;  %v3877_v3 = vpop.f32.mrb[78].mxu0 }
 0x181   :  { %v2893_v7 = vmax.f32 %v2829_v63, 0.0  ;;  %v2431_v8 = vmax.f32 %v2429_v6, %v2430_v17  ;;  %v5564_v54 = vsel %vm927_vm0, %v5323_v56, -inf  ;;  %v2437_v28 = vsel %vm927_vm0, %v2149_v58, -inf  ;;  %v4005_v58 = vpop.f32.mrb[78].mxu1  ;;  %v1653_v17 = vpop.f32.mrb[79].mxu0 }
 0x182   :  { %3216 = vst.msk [vmem:[%s6081_s3 + $0x1c] sm:$0xf] %vm3208_vm1, %v3607_v46  ;;  %v2834_v50 = vadd.f32 %v5472_v16, %v2445_v34  ;;  %v2452_v42 = vmax.f32 %v2450_v62, %v2451_v9  ;;  %v2436_v40 = vmax.f32 %v2434_v35, %v5041_v14  ;;  %v2468_v56 = vsel %vm927_vm0, %v3876_v52, -inf  ;;  %v2165_v46 = vpop.f32.mrb[79].mxu1 }
 0x183   :  { %v3605_v51 = vpack.c.bf16 %v2893_v7, %v2893_v7  ;;  %v2832_v45 = vadd.f32 %v5472_v16, %v2431_v8  ;;  %v2469_v49 = vmax.f32 %v5045_v11, %v2468_v56  ;;  %v2454_v10 = vsel %vm927_vm0, %v1650_v2, -inf  ;;  %v6259_v11 = vld [vmem:[#allocation54_spill] sm:$0xff]  ;;  %v3880_v56 = vpop.f32.mrb[80].mxu0  ;;  %v4008_v2 = vpop.f32.mrb[80].mxu1 }
 0x184   :  { %v2898_v55 = vmax.f32 %v2834_v50, 0.0  ;;  %v2835_v59 = vadd.f32 %v5472_v16, %v2452_v42  ;;  %v2438_v14 = vmax.f32 %v2436_v40, %v2437_v28  ;;  %v2455_v63 = vmax.f32 %v5049_v18, %v2454_v10 }
 0x185   :  { %3214 = vst.msk [vmem:[%s6081_s3 + $0x14] sm:$0xf] %vm3208_vm1, %v3605_v51  ;;  %v2896_v60 = vmax.f32 %v2832_v45, 0.0  ;;  %v2472_v6 = vsel %vm927_vm0, %v4004_v5, -inf  ;;  %v2471_v48 = vmax.f32 %v2469_v49, %v6259_v11  ;;  %v2475_v62 = vsel %vm927_vm0, %v3877_v3, -inf  ;;  %v6260_v11 = vld [vmem:[#allocation55_spill] sm:$0xff] }
 0x186   :  { %v3610_v34 = vpack.c.bf16 %v2898_v55, %v2898_v55  ;;  %v2899_v44 = vmax.f32 %v2835_v59, 0.0  ;;  %v2833_v8 = vadd.f32 %v5472_v16, %v2438_v14  ;;  %v2476_v0 = vmax.f32 %v5061_v19, %v2475_v62  ;;  %v1666_v55 = vpop.f32.mrb[81].mxu0  ;;  %v2178_v59 = vpop.f32.mrb[81].mxu1 }
 0x187   :  { %v3608_v7 = vpack.c.bf16 %v2896_v60, %v2896_v60  ;;  %v2457_v35 = vmax.f32 %v2455_v63, %v5065_v20  ;;  %v2473_v9 = vmax.f32 %v2471_v48, %v2472_v6  ;;  %v2458_v50 = vsel %vm927_vm0, %v2162_v13, -inf  ;;  %v4009_v14 = vpop.f32.mrb[82].mxu1 }
 0x188   :  { %3219 = vst.msk [vmem:[%s6081_s3 + $0x28] sm:$0xf] %vm3208_vm1, %v3610_v34  ;;  %v3611_v18 = vpack.c.bf16 %v2899_v44, %v2899_v44  ;;  %v2461_v42 = vsel %vm927_vm0, %v1653_v17, -inf  ;;  %v2897_v28 = vmax.f32 %v2833_v8, 0.0  ;;  %v2478_v52 = vmax.f32 %v2476_v0, %v5073_v21  ;;  %v2181_v34 = vpop.f32.mrb[83].mxu1 }
 0x189   :  { %3217 = vst.msk [vmem:[%s6081_s3 + $0x20] sm:$0xf] %vm3208_vm1, %v3608_v7  ;;  %v2459_v19 = vmax.f32 %v2457_v35, %v2458_v50  ;;  %v2462_v20 = vmax.f32 %v5069_v22, %v2461_v42  ;;  %v5603_v5 = vsel %vm927_vm0, %v5325_v31, -inf  ;;  %v2838_v51 = vadd.f32 %v5472_v16, %v2473_v9 }
 0x18a   :  { %3220 = vst.msk [vmem:[%s6081_s3 + $0x2c] sm:$0xf] %vm3208_vm1, %v3611_v18  ;;  %v2479_v45 = vsel %vm927_vm0, %v4005_v58, -inf  ;;  %v2465_v40 = vsel %vm927_vm0, %v2165_v46, -inf  ;;  %v3609_v22 = vpack.c.bf16 %v2897_v28, %v2897_v28  ;;  %v2496_v10 = vsel %vm927_vm0, %v3880_v56, -inf  ;;  %v3881_v58 = vpop.f32.mrb[82].mxu0 }
 0x18b   :  { %v2836_v21 = vadd.f32 %v5472_v16, %v2459_v19  ;;  %v2480_v13 = vmax.f32 %v2478_v52, %v2479_v45  ;;  %v2464_v31 = vmax.f32 %v2462_v20, %v5077_v15  ;;  %v2902_v49 = vmax.f32 %v2838_v51, 0.0  ;;  %v1669_v46 = vpop.f32.mrb[83].mxu0  ;;  %v6261_v18 = vld [vmem:[#allocation56_spill] sm:$0xff]  ;;  %v6263_v28 = vld [vmem:[#allocation58_spill] sm:$0xff]  ;;  %v6264_v45 = vld [vmem:[#allocation59_spill] sm:$0xff] }
 0x18c   :  { %v2482_v3 = vsel %vm927_vm0, %v1666_v55, -inf  ;;  %v2500_v60 = vsel %vm927_vm0, %v4008_v2, -inf  ;;  %3218 = vst.msk [vmem:[%s6081_s3 + $0x24] sm:$0xf] %vm3208_vm1, %v3609_v22  ;;  %v2497_v17 = vmax.f32 %v5081_v26, %v2496_v10  ;;  %v2503_v62 = vsel %vm927_vm0, %v3881_v58, -inf  ;;  %v6262_v26 = vld [vmem:[#allocation57_spill] sm:$0xff] }
 0x18d   :  { %v2900_v63 = vmax.f32 %v2836_v21, 0.0  ;;  %v2839_v6 = vadd.f32 %v5472_v16, %v2480_v13  ;;  %v2466_v15 = vmax.f32 %v2464_v31, %v2465_v40  ;;  %v3614_v44 = vpack.c.bf16 %v2902_v49, %v2902_v49  ;;  %v6265_v2 = vld [vmem:[#allocation60_spill] sm:$0xff]  ;;  %v3884_v31 = vpop.f32.mrb[84].mxu0  ;;  %v4012_v55 = vpop.f32.mrb[84].mxu1  ;;  %v6266_v10 = vld [vmem:[#allocation61_spill] sm:$0xff] }
 0x18e   :  { %v2483_v48 = vmax.f32 %v6260_v11, %v2482_v3  ;;  %v2486_v7 = vsel %vm927_vm0, %v2178_v59, -inf  ;;  %v2499_v9 = vmax.f32 %v2497_v17, %v6261_v18  ;;  %v5630_v50 = vsel %vm927_vm0, %v5343_v1, -inf  ;;  %v1682_v58 = vpop.f32.mrb[85].mxu0 }
 0x18f   :  { %v3612_v8 = vpack.c.bf16 %v2900_v63, %v2900_v63  ;;  %v2903_v0 = vmax.f32 %v2839_v6, 0.0  ;;  %v2837_v35 = vadd.f32 %v5472_v16, %v2466_v15  ;;  %3223 = vst.msk [vmem:[%s6081_s3 + $0x38] sm:$0xf] %vm3208_vm1, %v3614_v44  ;;  %v2504_v42 = vmax.f32 %v6262_v26, %v2503_v62  ;;  %v2194_v63 = vpop.f32.mrb[85].mxu1  ;;  %v6267_v15 = vld [vmem:[#allocation62_spill] sm:$0xff]  ;;  %v6268_v62 = vld [vmem:[#allocation63_spill] sm:$0xff] }
 0x190   :  { %v2485_v19 = vmax.f32 %v2483_v48, %v6263_v28  ;;  %v2489_v20 = vsel %vm927_vm0, %v1669_v46, -inf  ;;  %v2501_v1 = vmax.f32 %v2499_v9, %v2500_v60  ;;  %v2507_v21 = vsel %vm927_vm0, %v4009_v14, -inf  ;;  %v4013_v44 = vpop.f32.mrb[86].mxu1  ;;  %v6269_v26 = vld [vmem:[#allocation64_spill] sm:$0xff] }
 0x191   :  { %3221 = vst.msk [vmem:[%s6081_s3 + $0x30] sm:$0xf] %vm3208_vm1, %v3612_v8  ;;  %v3615_v52 = vpack.c.bf16 %v2903_v0, %v2903_v0  ;;  %v2901_v51 = vmax.f32 %v2837_v35, 0.0  ;;  %v2490_v40 = vmax.f32 %v6264_v45, %v2489_v20  ;;  %v2506_v22 = vmax.f32 %v2504_v42, %v6265_v2  ;;  %v2197_v35 = vpop.f32.mrb[87].mxu1 }
 0x192   :  { %v2487_v56 = vmax.f32 %v2485_v19, %v2486_v7  ;;  %v2493_v13 = vsel %vm927_vm0, %v2181_v34, -inf  ;;  %v2842_v49 = vadd.f32 %v5472_v16, %v2501_v1  ;;  %v2524_v60 = vsel %vm927_vm0, %v3884_v31, -inf  ;;  %v3885_v34 = vpop.f32.mrb[86].mxu0  ;;  %v6271_v1 = vld [vmem:[#allocation66_spill] sm:$0xff] }
 0x193   :  { %3224 = vst.msk [vmem:[%s6081_s3 + $0x3c] sm:$0xf] %vm3208_vm1, %v3615_v52  ;;  %v3613_v59 = vpack.c.bf16 %v2901_v51, %v2901_v51  ;;  %v2492_v3 = vmax.f32 %v2490_v40, %v6266_v10  ;;  %v2508_v6 = vmax.f32 %v2506_v22, %v2507_v21  ;;  %v2525_v17 = vmax.f32 %v6267_v15, %v2524_v60  ;;  %v1685_v0 = vpop.f32.mrb[87].mxu0  ;;  %v6270_v52 = vld [vmem:[#allocation65_spill] sm:$0xff] }
 0x194   :  { %v2840_v14 = vadd.f32 %v5472_v16, %v2487_v56  ;;  %v2510_v46 = vsel %vm927_vm0, %v1682_v58, -inf  ;;  %v2906_v11 = vmax.f32 %v2842_v49, 0.0  ;;  %v2528_v8 = vsel %vm927_vm0, %v4012_v55, -inf  ;;  %v6272_v55 = vld [vmem:[#allocation68_spill] sm:$0xff] }
 0x195   :  { %3222 = vst.msk [vmem:[%s6081_s3 + $0x34] sm:$0xf] %vm3208_vm1, %v3613_v59  ;;  %v2494_v48 = vmax.f32 %v2492_v3, %v2493_v13  ;;  %v2511_v7 = vmax.f32 %v6268_v62, %v2510_v46  ;;  %v2843_v9 = vadd.f32 %v5472_v16, %v2508_v6  ;;  %v2527_v42 = vmax.f32 %v2525_v17, %v6269_v26  ;;  %v6273_v3 = vld [vmem:[#allocation67_spill] sm:$0xff]  ;;  %v6274_v62 = vld [vmem:[#allocation69_spill] sm:$0xff]  ;;  %v6275_v26 = vld [vmem:[#allocation70_spill] sm:$0xff] }
 0x196   :  { %v2904_v18 = vmax.f32 %v2840_v14, 0.0  ;;  %v2531_v28 = vsel %vm927_vm0, %v3885_v34, -inf  ;;  %v3618_v19 = vpack.c.bf16 %v2906_v11, %v2906_v11  ;;  %v2514_v22 = vsel %vm927_vm0, %v2194_v63, -inf  ;;  %v3888_v63 = vpop.f32.mrb[88].mxu0  ;;  %v4016_v14 = vpop.f32.mrb[88].mxu1 }
 0x197   :  { %v2841_v20 = vadd.f32 %v5472_v16, %v2494_v48  ;;  %v2532_v51 = vmax.f32 %v6270_v52, %v2531_v28  ;;  %v2513_v45 = vmax.f32 %v2511_v7, %v6271_v1  ;;  %v2907_v56 = vmax.f32 %v2843_v9, 0.0  ;;  %v1698_v34 = vpop.f32.mrb[89].mxu0  ;;  %v2210_v11 = vpop.f32.mrb[89].mxu1  ;;  %v6276_v28 = vld [vmem:[#allocation71_spill] sm:$0xff] }
 0x198   :  { %v3616_v40 = vpack.c.bf16 %v2904_v18, %v2904_v18  ;;  %v2529_v2 = vmax.f32 %v2527_v42, %v2528_v8  ;;  %3227 = vst.msk [vmem:[%s6081_s3 + $0x48] sm:$0xf] %vm3208_vm1, %v3618_v19  ;;  %v2517_v31 = vsel %vm927_vm0, %v1685_v0, -inf  ;;  %v2535_v58 = vsel %vm927_vm0, %v4013_v44, -inf  ;;  %v3889_v0 = vpop.f32.mrb[90].mxu0  ;;  %v4017_v18 = vpop.f32.mrb[90].mxu1 }
 0x199   :  { %v2905_v21 = vmax.f32 %v2841_v20, 0.0  ;;  %v2515_v13 = vmax.f32 %v2513_v45, %v2514_v22  ;;  %v2534_v59 = vmax.f32 %v2532_v51, %v6272_v55  ;;  %v3619_v49 = vpack.c.bf16 %v2907_v56, %v2907_v56  ;;  %v1701_v20 = vpop.f32.mrb[91].mxu0  ;;  %v2213_v52 = vpop.f32.mrb[91].mxu1  ;;  %v6277_v22 = vld [vmem:[#allocation72_spill] sm:$0xff] }
 0x19a   :  { %3225 = vst.msk [vmem:[%s6081_s3 + $0x40] sm:$0xf] %vm3208_vm1, %v3616_v40  ;;  %v2846_v10 = vadd.f32 %v5472_v16, %v2529_v2  ;;  %v2518_v60 = vmax.f32 %v6273_v3, %v2517_v31  ;;  %v2521_v46 = vsel %vm927_vm0, %v2197_v35, -inf  ;;  %v2552_v44 = vsel %vm927_vm0, %v3888_v63, -inf  ;;  %v6280_v63 = vld [vmem:[#allocation3_spill] sm:$0xff] }
 0x19b   :  { %v3617_v6 = vpack.c.bf16 %v2905_v21, %v2905_v21  ;;  %v2844_v15 = vadd.f32 %v5472_v16, %v2515_v13  ;;  %v2536_v17 = vmax.f32 %v2534_v59, %v2535_v58  ;;  %3228 = vst.msk [vmem:[%s6081_s3 + $0x4c] sm:$0xf] %vm3208_vm1, %v3619_v49  ;;  %v2538_v8 = vsel %vm927_vm0, %v1698_v34, -inf  ;;  %v6278_v13 = vld [vmem:[#allocation73_spill] sm:$0xff]  ;;  %v6279_v59 = vld [vmem:[#allocation74_spill] sm:$0xff] }
 0x19c   :  { %v2910_v48 = vmax.f32 %v2846_v10, 0.0  ;;  %v2520_v7 = vmax.f32 %v2518_v60, %v6274_v62  ;;  %v2553_v42 = vmax.f32 %v6275_v26, %v2552_v44  ;;  %v2539_v19 = vmax.f32 %v6276_v28, %v2538_v8  ;;  %v4020_v62 = vpop.f32.mrb[92].mxu1  ;;  %v6282_v8 = vld [vmem:[#allocation4_spill] sm:$0xff]  ;;  %v6283_v28 = vld [vmem:[#allocation5_spill] sm:$0xff] }
 0x19d   :  { %3226 = vst.msk [vmem:[%s6081_s3 + $0x44] sm:$0xf] %vm3208_vm1, %v3617_v6  ;;  %v2908_v35 = vmax.f32 %v2844_v15, 0.0  ;;  %v2847_v9 = vadd.f32 %v5472_v16, %v2536_v17  ;;  %v2556_v45 = vsel %vm927_vm0, %v4016_v14, -inf  ;;  %v2559_v40 = vsel %vm927_vm0, %v3889_v0, -inf  ;;  %v6281_v6 = vld [vmem:[#allocation2_spill] sm:$0xff] }
 0x19e   :  { %v3622_v51 = vpack.c.bf16 %v2910_v48, %v2910_v48  ;;  %v2522_v1 = vmax.f32 %v2520_v7, %v2521_v46  ;;  %v2555_v21 = vmax.f32 %v2553_v42, %v6277_v22  ;;  %v2560_v31 = vmax.f32 %v6278_v13, %v2559_v40  ;;  %v2226_v26 = vpop.f32.mrb[93].mxu1 }
 0x19f   :  { %v3620_v56 = vpack.c.bf16 %v2908_v35, %v2908_v35  ;;  %v2911_v2 = vmax.f32 %v2847_v9, 0.0  ;;  %v2541_v49 = vmax.f32 %v2539_v19, %v6279_v59  ;;  %v2542_v10 = vsel %vm927_vm0, %v2210_v11, -inf  ;;  %v3892_v11 = vpop.f32.mrb[92].mxu0 }
 0x1a0   :  { %3231 = vst.msk [vmem:[%s6081_s3 + $0x58] sm:$0xf] %vm3208_vm1, %v3622_v51  ;;  %v2845_v55 = vadd.f32 %v5472_v16, %v2522_v1  ;;  %v2545_v3 = vsel %vm927_vm0, %v1701_v20, -inf  ;;  %v2557_v58 = vmax.f32 %v2555_v21, %v2556_v45  ;;  %v2562_v15 = vmax.f32 %v2560_v31, %v6281_v6  ;;  %v1714_v9 = vpop.f32.mrb[93].mxu0  ;;  %v4021_v51 = vpop.f32.mrb[94].mxu1  ;;  %v6285_v31 = vld [vmem:[#allocation6_spill] sm:$0xff] }
 0x1a1   :  { %3229 = vst.msk [vmem:[%s6081_s3 + $0x50] sm:$0xf] %vm3208_vm1, %v3620_v56  ;;  %v3623_v60 = vpack.c.bf16 %v2911_v2, %v2911_v2  ;;  %v2546_v14 = vmax.f32 %v6280_v63, %v2545_v3  ;;  %v2543_v46 = vmax.f32 %v2541_v49, %v2542_v10  ;;  %v2563_v34 = vsel %vm927_vm0, %v4017_v18, -inf  ;;  %v6284_v56 = vld [vmem:[#allocation7_spill] sm:$0xff]  ;;  %v2229_v21 = vpop.f32.mrb[95].mxu1 }
 0x1a2   :  { %v2909_v17 = vmax.f32 %v2845_v55, 0.0  ;;  %v2549_v48 = vsel %vm927_vm0, %v2213_v52, -inf  ;;  %v2850_v7 = vadd.f32 %v5472_v16, %v2557_v58  ;;  %v2564_v44 = vmax.f32 %v2562_v15, %v2563_v34  ;;  %v3893_v52 = vpop.f32.mrb[94].mxu0  ;;  %v6286_v58 = vld [vmem:[#allocation9_spill] sm:$0xff]  ;;  %v6287_v15 = vld [vmem:[#allocation8_spill] sm:$0xff] }
 0x1a3   :  { %3232 = vst.msk [vmem:[%s6081_s3 + $0x5c] sm:$0xf] %vm3208_vm1, %v3623_v60  ;;  %v2548_v0 = vmax.f32 %v2546_v14, %v6282_v8  ;;  %v2580_v35 = vsel %vm927_vm0, %v3892_v11, -inf  ;;  %v2848_v18 = vadd.f32 %v5472_v16, %v2543_v46  ;;  %v2566_v20 = vsel %vm927_vm0, %v1714_v9, -inf  ;;  %v1717_v22 = vpop.f32.mrb[95].mxu0 }
 0x1a4   :  { %v3621_v42 = vpack.c.bf16 %v2909_v17, %v2909_v17  ;;  %v2581_v19 = vmax.f32 %v6283_v28, %v2580_v35  ;;  %v2914_v1 = vmax.f32 %v2850_v7, 0.0  ;;  %v2851_v45 = vadd.f32 %v5472_v16, %v2564_v44 }
 0x1a5   :  { %v2550_v40 = vmax.f32 %v2548_v0, %v2549_v48  ;;  %v2567_v2 = vmax.f32 %v6284_v56, %v2566_v20  ;;  %v2912_v13 = vmax.f32 %v2848_v18, 0.0  ;;  %v2584_v59 = vsel %vm927_vm0, %v4020_v62, -inf  ;;  %v6288_v62 = vld [vmem:[#allocation10_spill] sm:$0xff]  ;;  %v6289_v0 = vld [vmem:[#allocation11_spill] sm:$0xff]  ;;  %v6290_v56 = vld [vmem:[#allocation12_spill] sm:$0xff] }
 0x1a6   :  { %3230 = vst.msk [vmem:[%s6081_s3 + $0x54] sm:$0xf] %vm3208_vm1, %v3621_v42  ;;  %v2583_v55 = vmax.f32 %v2581_v19, %v6285_v31  ;;  %v2587_v49 = vsel %vm927_vm0, %v3893_v52, -inf  ;;  %v3626_v10 = vpack.c.bf16 %v2914_v1, %v2914_v1  ;;  %v2915_v3 = vmax.f32 %v2851_v45, 0.0  ;;  %v4024_v42 = vpop.f32.mrb[96].mxu1 }
 0x1a7   :  { %v2849_v60 = vadd.f32 %v5472_v16, %v2550_v40  ;;  %v2588_v63 = vmax.f32 %v6286_v58, %v2587_v49  ;;  %v3624_v14 = vpack.c.bf16 %v2912_v13, %v2912_v13  ;;  %v2569_v17 = vmax.f32 %v2567_v2, %v6287_v15  ;;  %v2242_v1 = vpop.f32.mrb[97].mxu1  ;;  %v6291_v2 = vld [vmem:[#allocation13_spill] sm:$0xff] }
 0x1a8   :  { %v2585_v6 = vmax.f32 %v2583_v55, %v2584_v59  ;;  %v2570_v46 = vsel %vm927_vm0, %v2226_v26, -inf  ;;  %3235 = vst.msk [vmem:[%s6081_s3 + $0x68] sm:$0xf] %vm3208_vm1, %v3626_v10  ;;  %v3627_v34 = vpack.c.bf16 %v2915_v3, %v2915_v3  ;;  %v2573_v11 = vsel %vm927_vm0, %v1717_v22, -inf  ;;  %v3896_v26 = vpop.f32.mrb[96].mxu0  ;;  %v4025_v31 = vpop.f32.mrb[98].mxu1 }
 0x1a9   :  { %v2913_v48 = vmax.f32 %v2849_v60, 0.0  ;;  %v2590_v7 = vmax.f32 %v2588_v63, %v6288_v62  ;;  %3233 = vst.msk [vmem:[%s6081_s3 + $0x60] sm:$0xf] %vm3208_vm1, %v3624_v14  ;;  %v2571_v8 = vmax.f32 %v2569_v17, %v2570_v46  ;;  %v2574_v35 = vmax.f32 %v6289_v0, %v2573_v11  ;;  %v1730_v52 = vpop.f32.mrb[97].mxu0  ;;  %v2245_v3 = vpop.f32.mrb[99].mxu1  ;;  %v6292_v14 = vld [vmem:[#allocation15_spill] sm:$0xff] }
 0x1aa   :  { %v2854_v44 = vadd.f32 %v5472_v16, %v2585_v6  ;;  %v2591_v9 = vsel %vm927_vm0, %v4021_v51, -inf  ;;  %3236 = vst.msk [vmem:[%s6081_s3 + $0x6c] sm:$0xf] %vm3208_vm1, %v3627_v34  ;;  %v2577_v19 = vsel %vm927_vm0, %v2229_v21, -inf  ;;  %v2608_v20 = vsel %vm927_vm0, %v3896_v26, -inf  ;;  %v3897_v13 = vpop.f32.mrb[98].mxu0 }
 0x1ab   :  { %v3625_v18 = vpack.c.bf16 %v2913_v48, %v2913_v48  ;;  %v2592_v28 = vmax.f32 %v2590_v7, %v2591_v9  ;;  %v2852_v40 = vadd.f32 %v5472_v16, %v2571_v8  ;;  %v2576_v51 = vmax.f32 %v2574_v35, %v6290_v56  ;;  %v1733_v10 = vpop.f32.mrb[99].mxu0  ;;  %v6293_v17 = vld [vmem:[#allocation14_spill] sm:$0xff]  ;;  %v6294_v34 = vld [vmem:[#allocation17_spill] sm:$0xff]  ;;  %v6296_v26 = vld [vmem:[#allocation19_spill] sm:$0xff] }
 0x1ac   :  { %v2918_v45 = vmax.f32 %v2854_v44, 0.0  ;;  %v2609_v22 = vmax.f32 %v6291_v2, %v2608_v20  ;;  %v2594_v55 = vsel %vm927_vm0, %v1730_v52, -inf  ;;  %v2612_v59 = vsel %vm927_vm0, %v4024_v42, -inf  ;;  %v6295_v44 = vld [vmem:[#allocation16_spill] sm:$0xff] }
 0x1ad   :  { %3234 = vst.msk [vmem:[%s6081_s3 + $0x64] sm:$0xf] %vm3208_vm1, %v3625_v18  ;;  %v2855_v21 = vadd.f32 %v5472_v16, %v2592_v28  ;;  %v2615_v49 = vsel %vm927_vm0, %v3897_v13, -inf  ;;  %v2916_v58 = vmax.f32 %v2852_v40, 0.0  ;;  %v2578_v63 = vmax.f32 %v2576_v51, %v2577_v19  ;;  %v6297_v18 = vld [vmem:[#allocation18_spill] sm:$0xff]  ;;  %v4028_v40 = vpop.f32.mrb[100].mxu1 }
 0x1ae   :  { %v3630_v60 = vpack.c.bf16 %v2918_v45, %v2918_v45  ;;  %v2595_v6 = vmax.f32 %v6292_v14, %v2594_v55  ;;  %v2611_v46 = vmax.f32 %v2609_v22, %v6293_v17  ;;  %v2616_v48 = vmax.f32 %v6294_v34, %v2615_v49  ;;  %v3900_v45 = vpop.f32.mrb[100].mxu0  ;;  %v6298_v2 = vld [vmem:[#allocation20_spill] sm:$0xff]  ;;  %v2258_v55 = vpop.f32.mrb[101].mxu1  ;;  %v6299_v49 = vld [vmem:[#allocation21_spill] sm:$0xff] }
 0x1af   :  { %v2919_v15 = vmax.f32 %v2855_v21, 0.0  ;;  %v2598_v11 = vsel %vm927_vm0, %v2242_v1, -inf  ;;  %v3628_v62 = vpack.c.bf16 %v2916_v58, %v2916_v58  ;;  %v2853_v7 = vadd.f32 %v5472_v16, %v2578_v63  ;;  %v1746_v21 = vpop.f32.mrb[101].mxu0  ;;  %v4029_v58 = vpop.f32.mrb[102].mxu1 }
 0x1b0   :  { %3239 = vst.msk [vmem:[%s6081_s3 + $0x78] sm:$0xf] %vm3208_vm1, %v3630_v60  ;;  %v2597_v8 = vmax.f32 %v2595_v6, %v6295_v44  ;;  %v2601_v0 = vsel %vm927_vm0, %v1733_v10, -inf  ;;  %v2613_v9 = vmax.f32 %v2611_v46, %v2612_v59  ;;  %v2618_v28 = vmax.f32 %v2616_v48, %v6297_v18  ;;  %v3901_v60 = vpop.f32.mrb[102].mxu0  ;;  %v2261_v34 = vpop.f32.mrb[103].mxu1 }
 0x1b1   :  { %v3631_v35 = vpack.c.bf16 %v2919_v15, %v2919_v15  ;;  %v2602_v42 = vmax.f32 %v6296_v26, %v2601_v0  ;;  %3237 = vst.msk [vmem:[%s6081_s3 + $0x70] sm:$0xf] %vm3208_vm1, %v3628_v62  ;;  %v2917_v19 = vmax.f32 %v2853_v7, 0.0  ;;  %v2619_v52 = vsel %vm927_vm0, %v4025_v31, -inf  ;;  %v6300_v15 = vld [vmem:[#allocation23_spill] sm:$0xff]  ;;  %v1749_v46 = vpop.f32.mrb[103].mxu0 }
 0x1b2   :  { %v2599_v20 = vmax.f32 %v2597_v8, %v2598_v11  ;;  %v2605_v1 = vsel %vm927_vm0, %v2245_v3, -inf  ;;  %v2858_v56 = vadd.f32 %v5472_v16, %v2613_v9  ;;  %v2620_v51 = vmax.f32 %v2618_v28, %v2619_v52  ;;  %v6301_v11 = vld [vmem:[#allocation22_spill] sm:$0xff]  ;;  %v6302_v9 = vld [vmem:[#allocation25_spill] sm:$0xff]  ;;  %v6303_v28 = vld [vmem:[#allocation24_spill] sm:$0xff] }
 0x1b3   :  { %3240 = vst.msk [vmem:[%s6081_s3 + $0x7c] sm:$0xf] %vm3208_vm1, %v3631_v35  ;;  %v2604_v22 = vmax.f32 %v2602_v42, %v6298_v2  ;;  %v2636_v13 = vsel %vm927_vm0, %v3900_v45, -inf  ;;  %v3629_v59 = vpack.c.bf16 %v2917_v19, %v2917_v19  ;;  %v2622_v3 = vsel %vm927_vm0, %v1746_v21, -inf }
 0x1b4   :  { %v2856_v31 = vadd.f32 %v5472_v16, %v2599_v20  ;;  %v2637_v10 = vmax.f32 %v6299_v49, %v2636_v13  ;;  %v2922_v63 = vmax.f32 %v2858_v56, 0.0  ;;  %v2859_v14 = vadd.f32 %v5472_v16, %v2620_v51 }
 0x1b5   :  { %v2606_v6 = vmax.f32 %v2604_v22, %v2605_v1  ;;  %v2623_v17 = vmax.f32 %v6300_v15, %v2622_v3  ;;  %3238 = vst.msk [vmem:[%s6081_s3 + $0x74] sm:$0xf] %vm3208_vm1, %v3629_v59  ;;  %v2640_v7 = vsel %vm927_vm0, %v4028_v40, -inf  ;;  %v2643_v44 = vsel %vm927_vm0, %v3901_v60, -inf  ;;  %v6304_v40 = vld [vmem:[#allocation26_spill] sm:$0xff]  ;;  %v6305_v22 = vld [vmem:[#allocation27_spill] sm:$0xff] }
 0x1b6   :  { %v2920_v48 = vmax.f32 %v2856_v31, 0.0  ;;  %v2639_v62 = vmax.f32 %v2637_v10, %v6301_v11  ;;  %v3634_v8 = vpack.c.bf16 %v2922_v63, %v2922_v63  ;;  %v2923_v0 = vmax.f32 %v2859_v14, 0.0  ;;  %v4032_v59 = vpop.f32.mrb[104].mxu1  ;;  %v6306_v15 = vld [vmem:[#allocation28_spill] sm:$0xff] }
 0x1b7   :  { %v2857_v35 = vadd.f32 %v5472_v16, %v2606_v6  ;;  %v2644_v26 = vmax.f32 %v6302_v9, %v2643_v44  ;;  %v2625_v19 = vmax.f32 %v2623_v17, %v6303_v28  ;;  %v2626_v20 = vsel %vm927_vm0, %v2258_v55, -inf  ;;  %v3904_v55 = vpop.f32.mrb[104].mxu0  ;;  %v2274_v63 = vpop.f32.mrb[105].mxu1  ;;  %v6307_v17 = vld [vmem:[#allocation29_spill] sm:$0xff] }
 0x1b8   :  { %v3632_v42 = vpack.c.bf16 %v2920_v48, %v2920_v48  ;;  %v2641_v18 = vmax.f32 %v2639_v62, %v2640_v7  ;;  %3243 = vst.msk [vmem:[%s6081_s3 + $0x88] sm:$0xf] %vm3208_vm1, %v3634_v8  ;;  %v3635_v52 = vpack.c.bf16 %v2923_v0, %v2923_v0  ;;  %v2629_v45 = vsel %vm927_vm0, %v1749_v46, -inf  ;;  %v1762_v60 = vpop.f32.mrb[105].mxu0  ;;  %v4033_v11 = vpop.f32.mrb[106].mxu1 }
 0x1b9   :  { %v2921_v1 = vmax.f32 %v2857_v35, 0.0  ;;  %v2646_v56 = vmax.f32 %v2644_v26, %v6304_v40  ;;  %v2627_v2 = vmax.f32 %v2625_v19, %v2626_v20  ;;  %v2630_v13 = vmax.f32 %v6305_v22, %v2629_v45  ;;  %v3905_v48 = vpop.f32.mrb[106].mxu0  ;;  %v2277_v0 = vpop.f32.mrb[107].mxu1  ;;  %v6309_v19 = vld [vmem:[#allocation30_spill] sm:$0xff] }
 0x1ba   :  { %3241 = vst.msk [vmem:[%s6081_s3 + $0x80] sm:$0xf] %vm3208_vm1, %v3632_v42  ;;  %v2862_v51 = vadd.f32 %v5472_v16, %v2641_v18  ;;  %v2647_v21 = vsel %vm927_vm0, %v4029_v58, -inf  ;;  %3244 = vst.msk [vmem:[%s6081_s3 + $0x8c] sm:$0xf] %vm3208_vm1, %v3635_v52  ;;  %v2633_v10 = vsel %vm927_vm0, %v2261_v34, -inf }
 0x1bb   :  { %v3633_v31 = vpack.c.bf16 %v2921_v1, %v2921_v1  ;;  %v2648_v49 = vmax.f32 %v2646_v56, %v2647_v21  ;;  %v2664_v3 = vsel %vm927_vm0, %v3904_v55, -inf  ;;  %v2860_v6 = vadd.f32 %v5472_v16, %v2627_v2  ;;  %v1765_v8 = vpop.f32.mrb[107].mxu0  ;;  %v6308_v42 = vld [vmem:[#allocation31_spill] sm:$0xff]  ;;  %v6310_v52 = vld [vmem:[#allocation33_spill] sm:$0xff] }
 0x1bc   :  { %v2926_v14 = vmax.f32 %v2862_v51, 0.0  ;;  %v2632_v58 = vmax.f32 %v2630_v13, %v6306_v15  ;;  %v2665_v46 = vmax.f32 %v6307_v17, %v2664_v3  ;;  %v2650_v62 = vsel %vm927_vm0, %v1762_v60, -inf  ;;  %v6311_v51 = vld [vmem:[#allocation32_spill] sm:$0xff]  ;;  %v6312_v55 = vld [vmem:[#allocation35_spill] sm:$0xff] }
 0x1bd   :  { %3242 = vst.msk [vmem:[%s6081_s3 + $0x84] sm:$0xf] %vm3208_vm1, %v3633_v31  ;;  %v2863_v34 = vadd.f32 %v5472_v16, %v2648_v49  ;;  %v2668_v7 = vsel %vm927_vm0, %v4032_v59, -inf  ;;  %v2671_v44 = vsel %vm927_vm0, %v3905_v48, -inf  ;;  %v2924_v9 = vmax.f32 %v2860_v6, 0.0  ;;  %v6313_v31 = vld [vmem:[#allocation34_spill] sm:$0xff] }
 0x1be   :  { %v3638_v35 = vpack.c.bf16 %v2926_v14, %v2926_v14  ;;  %v2634_v26 = vmax.f32 %v2632_v58, %v2633_v10  ;;  %v2651_v18 = vmax.f32 %v6308_v42, %v2650_v62  ;;  %v2667_v20 = vmax.f32 %v2665_v46, %v6309_v19  ;;  %v3908_v14 = vpop.f32.mrb[108].mxu0  ;;  %v4036_v6 = vpop.f32.mrb[108].mxu1  ;;  %v6314_v17 = vld [vmem:[#allocation36_spill] sm:$0xff] }
 0x1bf   :  { %v2927_v28 = vmax.f32 %v2863_v34, 0.0  ;;  %v2672_v1 = vmax.f32 %v6310_v52, %v2671_v44  ;;  %v2654_v45 = vsel %vm927_vm0, %v2274_v63, -inf  ;;  %v3636_v40 = vpack.c.bf16 %v2924_v9, %v2924_v9  ;;  %v1778_v34 = vpop.f32.mrb[109].mxu0  ;;  %v2290_v62 = vpop.f32.mrb[109].mxu1 }
 0x1c0   :  { %3247 = vst.msk [vmem:[%s6081_s3 + $0x98] sm:$0xf] %vm3208_vm1, %v3638_v35  ;;  %v2861_v56 = vadd.f32 %v5472_v16, %v2634_v26  ;;  %v2653_v2 = vmax.f32 %v2651_v18, %v6311_v51  ;;  %v2657_v22 = vsel %vm927_vm0, %v1765_v8, -inf  ;;  %v2669_v21 = vmax.f32 %v2667_v20, %v2668_v7  ;;  %v4037_v35 = vpop.f32.mrb[110].mxu1  ;;  %v6315_v18 = vld [vmem:[#allocation37_spill] sm:$0xff] }
 0x1c1   :  { %v3639_v13 = vpack.c.bf16 %v2927_v28, %v2927_v28  ;;  %v2658_v59 = vmax.f32 %v6312_v55, %v2657_v22  ;;  %v2674_v49 = vmax.f32 %v2672_v1, %v6313_v31  ;;  %3245 = vst.msk [vmem:[%s6081_s3 + $0x90] sm:$0xf] %vm3208_vm1, %v3636_v40  ;;  %v2675_v60 = vsel %vm927_vm0, %v4033_v11, -inf  ;;  %v2293_v20 = vpop.f32.mrb[111].mxu1  ;;  %v6316_v1 = vld [vmem:[#allocation39_spill] sm:$0xff]  ;;  %v6317_v55 = vld [vmem:[#allocation41_spill] sm:$0xff] }
 0x1c2   :  { %v2925_v10 = vmax.f32 %v2861_v56, 0.0  ;;  %v2655_v3 = vmax.f32 %v2653_v2, %v2654_v45  ;;  %v2661_v63 = vsel %vm927_vm0, %v2277_v0, -inf  ;;  %v2866_v15 = vadd.f32 %v5472_v16, %v2669_v21  ;;  %v3909_v0 = vpop.f32.mrb[110].mxu0 }
 0x1c3   :  { %3248 = vst.msk [vmem:[%s6081_s3 + $0x9c] sm:$0xf] %vm3208_vm1, %v3639_v13  ;;  %v2676_v58 = vmax.f32 %v2674_v49, %v2675_v60  ;;  %v2660_v46 = vmax.f32 %v2658_v59, %v6314_v17  ;;  %v2692_v48 = vsel %vm927_vm0, %v3908_v14, -inf  ;;  %v2678_v8 = vsel %vm927_vm0, %v1778_v34, -inf  ;;  %v1781_v19 = vpop.f32.mrb[111].mxu0  ;;  %v6318_v14 = vld [vmem:[#allocation40_spill] sm:$0xff] }
 0x1c4   :  { %v3637_v7 = vpack.c.bf16 %v2925_v10, %v2925_v10  ;;  %v2864_v11 = vadd.f32 %v5472_v16, %v2655_v3  ;;  %v2693_v44 = vmax.f32 %v5333_v33, %v2692_v48  ;;  %v2930_v9 = vmax.f32 %v2866_v15, 0.0  ;;  %v4040_v17 = vpop.f32.mrb[112].mxu1 }
 0x1c5   :  { %v2867_v26 = vadd.f32 %v5472_v16, %v2676_v58  ;;  %v2662_v42 = vmax.f32 %v2660_v46, %v2661_v63  ;;  %v2679_v28 = vmax.f32 %v6315_v18, %v2678_v8  ;;  %v2696_v45 = vsel %vm927_vm0, %v4036_v6, -inf  ;;  %v3912_v58 = vpop.f32.mrb[112].mxu0 }
 0x1c6   :  { %3246 = vst.msk [vmem:[%s6081_s3 + $0x94] sm:$0xf] %vm3208_vm1, %v3637_v7  ;;  %v2928_v52 = vmax.f32 %v2864_v11, 0.0  ;;  %v2695_v33 = vmax.f32 %v2693_v44, %v6316_v1  ;;  %v2699_v40 = vsel %vm927_vm0, %v3909_v0, -inf  ;;  %v3642_v56 = vpack.c.bf16 %v2930_v9, %v2930_v9  ;;  %v2306_v7 = vpop.f32.mrb[113].mxu1  ;;  %v6319_v0 = vld [vmem:[#allocation42_spill] sm:$0xff] }
 0x1c7   :  { %v2931_v51 = vmax.f32 %v2867_v26, 0.0  ;;  %v2865_v2 = vadd.f32 %v5472_v16, %v2662_v42  ;;  %v2700_v22 = vmax.f32 %v5349_v27, %v2699_v40  ;;  %v2681_v59 = vmax.f32 %v2679_v28, %v6317_v55  ;;  %v4041_v26 = vpop.f32.mrb[114].mxu1  ;;  %v5915_v42 = vld [vmem:[%s6080_s2] ss:$0 sm:$0xff] }
 0x1c8   :  { %v3640_v13 = vpack.c.bf16 %v2928_v52, %v2928_v52  ;;  %v2697_v21 = vmax.f32 %v2695_v33, %v2696_v45  ;;  %v2682_v31 = vsel %vm927_vm0, %v2290_v62, -inf  ;;  %3251 = vst.msk [vmem:[%s6081_s3 + $0xa8] sm:$0xf] %vm3208_vm1, %v3642_v56  ;;  %v2685_v3 = vsel %vm927_vm0, %v1781_v19, -inf  ;;  %v1794_v62 = vpop.f32.mrb[113].mxu0 }
 0x1c9   :  { %v3643_v49 = vpack.c.bf16 %v2931_v51, %v2931_v51  ;;  %v2929_v10 = vmax.f32 %v2865_v2, 0.0  ;;  %v2702_v60 = vmax.f32 %v2700_v22, %v5361_v4  ;;  %v2683_v63 = vmax.f32 %v2681_v59, %v2682_v31  ;;  %v3913_v9 = vpop.f32.mrb[114].mxu0 }
 0x1ca   :  { %3249 = vst.msk [vmem:[%s6081_s3 + $0xa0] sm:$0xf] %vm3208_vm1, %v3640_v13  ;;  %v2870_v27 = vadd.f32 %v5472_v16, %v2697_v21  ;;  %v2686_v6 = vmax.f32 %v6318_v14, %v2685_v3  ;;  %v2703_v15 = vsel %vm927_vm0, %v4037_v35, -inf  ;;  %v2689_v48 = vsel %vm927_vm0, %v2293_v20, -inf  ;;  %v1797_v19 = vpop.f32.mrb[115].mxu0  ;;  %v2309_v20 = vpop.f32.mrb[115].mxu1 }
 0x1cb   :  { %3252 = vst.msk [vmem:[%s6081_s3 + $0xac] sm:$0xf] %vm3208_vm1, %v3643_v49  ;;  %v3641_v4 = vpack.c.bf16 %v2929_v10, %v2929_v10  ;;  %v2704_v46 = vmax.f32 %v2702_v60, %v2703_v15  ;;  %v2720_v34 = vsel %vm927_vm0, %v3912_v58, -inf  ;;  %v2868_v44 = vadd.f32 %v5472_v16, %v2683_v63  ;;  %v4044_v60 = vpop.f32.mrb[116].mxu1 }
 0x1cc   :  { %v2934_v11 = vmax.f32 %v2870_v27, 0.0  ;;  %v2688_v8 = vmax.f32 %v2686_v6, %v5365_v53  ;;  %v2721_v35 = vmax.f32 %v6319_v0, %v2720_v34  ;;  %v2706_v16 = vsel %vm927_vm0, %v1794_v62, -inf  ;;  %v2322_v6 = vpop.f32.mrb[117].mxu1 }
 0x1cd   :  { %3250 = vst.msk [vmem:[%s6081_s3 + $0xa4] sm:$0xf] %vm3208_vm1, %v3641_v4  ;;  %v2871_v18 = vadd.f32 %v5915_v42, %v2704_v46  ;;  %v2724_v53 = vsel %vm927_vm0, %v4040_v17, -inf  ;;  %v2727_v28 = vsel %vm927_vm0, %v3913_v9, -inf  ;;  %v2932_v1 = vmax.f32 %v2868_v44, 0.0  ;;  %v6320_v17 = vld [vmem:[#allocation43_spill] sm:$0xff] }
 0x1ce   :  { %v3646_v52 = vpack.c.bf16 %v2934_v11, %v2934_v11  ;;  %v2690_v33 = vmax.f32 %v2688_v8, %v2689_v48  ;;  %v2707_v45 = vmax.f32 %v5373_v32, %v2706_v16  ;;  %v2723_v56 = vmax.f32 %v2721_v35, %v5377_v29  ;;  %v4045_v34 = vpop.f32.mrb[118].mxu1  ;;  %v6321_v44 = vld [vmem:[#allocation44_spill] sm:$0xff] }
 0x1cf   :  { %v2935_v40 = vmax.f32 %v2871_v18, 0.0  ;;  %v2728_v51 = vmax.f32 %v5381_v41, %v2727_v28  ;;  %v2710_v2 = vsel %vm927_vm0, %v2306_v7, -inf  ;;  %v3644_v22 = vpack.c.bf16 %v2932_v1, %v2932_v1  ;;  %v2325_v0 = vpop.f32.mrb[119].mxu1  ;;  %v6322_v1 = vld [vmem:[#allocation45_spill] sm:$0xff] }
 0x1d0   :  { %3255 = vst.msk [vmem:[%s6081_s3 + $0xb8] sm:$0xf] %vm3208_vm1, %v3646_v52  ;;  %v2869_v13 = vadd.f32 %v5915_v42, %v2690_v33  ;;  %v2709_v21 = vmax.f32 %v2707_v45, %v5385_v36  ;;  %v2713_v55 = vsel %vm927_vm0, %v1797_v19, -inf  ;;  %v2725_v59 = vmax.f32 %v2723_v56, %v2724_v53  ;;  %v3916_v36 = vpop.f32.mrb[116].mxu0 }
 0x1d1   :  { %v3647_v32 = vpack.c.bf16 %v2935_v40, %v2935_v40  ;;  %v2714_v29 = vmax.f32 %v5389_v30, %v2713_v55  ;;  %v2730_v41 = vmax.f32 %v2728_v51, %v5393_v12  ;;  %3253 = vst.msk [vmem:[%s6081_s3 + $0xb0] sm:$0xf] %vm3208_vm1, %v3644_v22  ;;  %v2731_v10 = vsel %vm927_vm0, %v4041_v26, -inf  ;;  %v1810_v14 = vpop.f32.mrb[117].mxu0  ;;  %v6323_v51 = vld [vmem:[#allocation75_spill] sm:$0xff] }
 0x1d2   :  { %v2933_v31 = vmax.f32 %v2869_v13, 0.0  ;;  %v2711_v49 = vmax.f32 %v2709_v21, %v2710_v2  ;;  %v2717_v3 = vsel %vm927_vm0, %v2309_v20, -inf  ;;  %v2874_v30 = vadd.f32 %v5915_v42, %v2725_v59  ;;  %v3917_v48 = vpop.f32.mrb[118].mxu0  ;;  %v6324_v13 = vld [vmem:[#allocation46_spill] sm:$0xff]  ;;  %v4048_v59 = vpop.f32.mrb[120].mxu1 }
 0x1d3   :  { %3256 = vst.msk [vmem:[%s6081_s3 + $0xbc] sm:$0xf] %vm3208_vm1, %v3647_v32  ;;  %v2732_v12 = vmax.f32 %v2730_v41, %v2731_v10  ;;  %v2716_v27 = vmax.f32 %v2714_v29, %v5397_v38  ;;  %v2748_v63 = vsel %vm927_vm0, %v3916_v36, -inf  ;;  %v2734_v46 = vsel %vm927_vm0, %v1810_v14, -inf  ;;  %v1813_v38 = vpop.f32.mrb[119].mxu0 }
 0x1d4   :  { %v3645_v15 = vpack.c.bf16 %v2933_v31, %v2933_v31  ;;  %v2872_v58 = vadd.f32 %v5915_v42, %v2711_v49  ;;  %v2749_v4 = vmax.f32 %v6320_v17, %v2748_v63  ;;  %v2938_v62 = vmax.f32 %v2874_v30, 0.0  ;;  %v3920_v32 = vpop.f32.mrb[120].mxu0  ;;  %v6325_v30 = vld [vmem:[#allocation76_spill] sm:$0xff] }
 0x1d5   :  { %v2875_v7 = vadd.f32 %v5915_v42, %v2732_v12  ;;  %v2718_v11 = vmax.f32 %v2716_v27, %v2717_v3  ;;  %v2735_v8 = vmax.f32 %v6321_v44, %v2734_v46  ;;  %v2752_v26 = vsel %vm927_vm0, %v4044_v60, -inf  ;;  %v1826_v10 = vpop.f32.mrb[121].mxu0  ;;  %v2338_v3 = vpop.f32.mrb[121].mxu1  ;;  %v6326_v27 = vld [vmem:[#allocation77_spill] sm:$0xff] }
 0x1d6   :  { %3254 = vst.msk [vmem:[%s6081_s3 + $0xb4] sm:$0xf] %vm3208_vm1, %v3645_v15  ;;  %v2936_v35 = vmax.f32 %v2872_v58, 0.0  ;;  %v2751_v9 = vmax.f32 %v2749_v4, %v5409_v24  ;;  %v2755_v18 = vsel %vm927_vm0, %v3917_v48, -inf  ;;  %v3650_v16 = vpack.c.bf16 %v2938_v62, %v2938_v62  ;;  %v3921_v14 = vpop.f32.mrb[122].mxu0 }
 0x1d7   :  { %v2939_v53 = vmax.f32 %v2875_v7, 0.0  ;;  %v2873_v28 = vadd.f32 %v5915_v42, %v2718_v11  ;;  %v2756_v19 = vmax.f32 %v5413_v23, %v2755_v18  ;;  %v2737_v33 = vmax.f32 %v2735_v8, %v6322_v1  ;;  %v1829_v46 = vpop.f32.mrb[123].mxu0  ;;  %v6327_v11 = vld [vmem:[#allocation79_spill] sm:$0xff] }
 0x1d8   :  { %v3648_v20 = vpack.c.bf16 %v2936_v35, %v2936_v35  ;;  %v2753_v52 = vmax.f32 %v2751_v9, %v2752_v26  ;;  %v2738_v45 = vsel %vm927_vm0, %v2322_v6, -inf  ;;  %3259 = vst.msk [vmem:[%s6081_s3 + $0xc8] sm:$0xf] %vm3208_vm1, %v3650_v16  ;;  %v2741_v56 = vsel %vm927_vm0, %v1813_v38, -inf  ;;  %v4049_v6 = vpop.f32.mrb[122].mxu1  ;;  %v6328_v38 = vld [vmem:[#allocation78_spill] sm:$0xff] }
 0x1d9   :  { %v3651_v24 = vpack.c.bf16 %v2939_v53, %v2939_v53  ;;  %v2937_v40 = vmax.f32 %v2873_v28, 0.0  ;;  %v2758_v2 = vmax.f32 %v2756_v19, %v6323_v51  ;;  %v2739_v22 = vmax.f32 %v2737_v33, %v2738_v45  ;;  %v2341_v48 = vpop.f32.mrb[123].mxu1  ;;  %v6329_v16 = vld [vmem:[#allocation80_spill] sm:$0xff] }
 0x1da   :  { %3257 = vst.msk [vmem:[%s6081_s3 + $0xc0] sm:$0xf] %vm3208_vm1, %v3648_v20  ;;  %v2878_v23 = vadd.f32 %v5915_v42, %v2753_v52  ;;  %v2742_v21 = vmax.f32 %v6324_v13, %v2741_v56  ;;  %v2759_v55 = vsel %vm927_vm0, %v4045_v34, -inf  ;;  %v2745_v31 = vsel %vm927_vm0, %v2325_v0, -inf  ;;  %v4052_v56 = vpop.f32.mrb[124].mxu1 }
 0x1db   :  { %3260 = vst.msk [vmem:[%s6081_s3 + $0xcc] sm:$0xf] %vm3208_vm1, %v3651_v24  ;;  %v3649_v29 = vpack.c.bf16 %v2937_v40, %v2937_v40  ;;  %v2760_v41 = vmax.f32 %v2758_v2, %v2759_v55  ;;  %v2776_v49 = vsel %vm927_vm0, %v3920_v32, -inf  ;;  %v2876_v60 = vadd.f32 %v5915_v42, %v2739_v22  ;;  %v3924_v40 = vpop.f32.mrb[124].mxu0  ;;  %v2354_v22 = vpop.f32.mrb[125].mxu1 }
 0x1dc   :  { %v2942_v36 = vmax.f32 %v2878_v23, 0.0  ;;  %v2744_v12 = vmax.f32 %v2742_v21, %v6325_v30  ;;  %v2777_v63 = vmax.f32 %v6326_v27, %v2776_v49  ;;  %v2762_v58 = vsel %vm927_vm0, %v1826_v10, -inf  ;;  %v1842_v23 = vpop.f32.mrb[125].mxu0 }
 0x1dd   :  { %3258 = vst.msk [vmem:[%s6081_s3 + $0xc4] sm:$0xf] %vm3208_vm1, %v3649_v29  ;;  %v2879_v15 = vadd.f32 %v5915_v42, %v2760_v41  ;;  %v2780_v17 = vsel %vm927_vm0, %v4048_v59, -inf  ;;  %v2783_v4 = vsel %vm927_vm0, %v3921_v14, -inf  ;;  %v2940_v62 = vmax.f32 %v2876_v60, 0.0  ;;  %v3925_v59 = vpop.f32.mrb[126].mxu0 }
 0x1de   :  { %v3654_v34 = vpack.c.bf16 %v2942_v36, %v2942_v36  ;;  %v2746_v7 = vmax.f32 %v2744_v12, %v2745_v31  ;;  %v2763_v44 = vmax.f32 %v6327_v11, %v2762_v58  ;;  %v2779_v0 = vmax.f32 %v2777_v63, %v6328_v38  ;;  %v4053_v29 = vpop.f32.mrb[126].mxu1  ;;  %v6330_v60 = vld [vmem:[#allocation81_spill] sm:$0xff]  ;;  %v6331_v11 = vld [vmem:[#allocation38_spill] sm:$0xff] }
 0x1df   :  { %v2943_v8 = vmax.f32 %v2879_v15, 0.0  ;;  %v2784_v35 = vmax.f32 %v5452_v43, %v2783_v4  ;;  %v2766_v9 = vsel %vm927_vm0, %v2338_v3, -inf  ;;  %v3652_v26 = vpack.c.bf16 %v2940_v62, %v2940_v62  ;;  %v2357_v3 = vpop.f32.mrb[127].mxu1 }
 0x1e0   :  { %3263 = vst.msk [vmem:[%s6081_s3 + $0xd8] sm:$0xf] %vm3208_vm1, %v3654_v34  ;;  %v2877_v18 = vadd.f32 %v5915_v42, %v2746_v7  ;;  %v2765_v53 = vmax.f32 %v2763_v44, %v6329_v16  ;;  %v2769_v28 = vsel %vm927_vm0, %v1829_v46, -inf  ;;  %v2781_v20 = vmax.f32 %v2779_v0, %v2780_v17 }
 0x1e1   :  { %v3655_v19 = vpack.c.bf16 %v2943_v8, %v2943_v8  ;;  %v2770_v52 = vmax.f32 %v5463_v47, %v2769_v28  ;;  %v2786_v43 = vmax.f32 %v2784_v35, %v5467_v37  ;;  %3261 = vst.msk [vmem:[%s6081_s3 + $0xd0] sm:$0xf] %vm3208_vm1, %v3652_v26  ;;  %v2787_v45 = vsel %vm927_vm0, %v4049_v6, -inf }
 0x1e2   :  { %v2941_v1 = vmax.f32 %v2877_v18, 0.0  ;;  %v2767_v33 = vmax.f32 %v2765_v53, %v2766_v9  ;;  %v2773_v24 = vsel %vm927_vm0, %v2341_v48, -inf  ;;  %v2882_v47 = vadd.f32 %v5915_v42, %v2781_v20 }
 0x1e3   :  { %3264 = vst.msk [vmem:[%s6081_s3 + $0xdc] sm:$0xf] %vm3208_vm1, %v3655_v19  ;;  %v2788_v37 = vmax.f32 %v2786_v43, %v2787_v45  ;;  %v2772_v51 = vmax.f32 %v2770_v52, %v5478_v25  ;;  %v2804_v2 = vsel %vm927_vm0, %v3924_v40, -inf  ;;  %v2790_v32 = vsel %vm927_vm0, %v1842_v23, -inf  ;;  %v1845_v25 = vpop.f32.mrb[127].mxu0 }
 0x1e4   :  { %v3653_v13 = vpack.c.bf16 %v2941_v1, %v2941_v1  ;;  %v2880_v21 = vadd.f32 %v5915_v42, %v2767_v33  ;;  %v2805_v55 = vmax.f32 %v5482_v57, %v2804_v2  ;;  %v2946_v41 = vmax.f32 %v2882_v47, 0.0 }
 0x1e5   :  { %v2883_v31 = vadd.f32 %v5915_v42, %v2788_v37  ;;  %v2774_v49 = vmax.f32 %v2772_v51, %v2773_v24  ;;  %v2791_v10 = vmax.f32 %v5493_v39, %v2790_v32  ;;  %v2808_v30 = vsel %vm927_vm0, %v4052_v56, -inf }
 0x1e6   :  { %3262 = vst.msk [vmem:[%s6081_s3 + $0xd4] sm:$0xf] %vm3208_vm1, %v3653_v13  ;;  %v2944_v36 = vmax.f32 %v2880_v21, 0.0  ;;  %v2807_v57 = vmax.f32 %v2805_v55, %v6330_v60  ;;  %v2811_v12 = vsel %vm927_vm0, %v3925_v59, -inf  ;;  %v3658_v27 = vpack.c.bf16 %v2946_v41, %v2946_v41 }
 0x1e7   :  { %v2947_v63 = vmax.f32 %v2883_v31, 0.0  ;;  %v2881_v14 = vadd.f32 %v5915_v42, %v2774_v49  ;;  %v2812_v39 = vmax.f32 %v5564_v54, %v2811_v12  ;;  %v2793_v58 = vmax.f32 %v2791_v10, %v5524_v61 }
 0x1e8   :  { %v3656_v6 = vpack.c.bf16 %v2944_v36, %v2944_v36  ;;  %v2809_v15 = vmax.f32 %v2807_v57, %v2808_v30  ;;  %v2794_v17 = vsel %vm927_vm0, %v2354_v22, -inf  ;;  %3267 = vst.msk [vmem:[%s6081_s3 + $0xe8] sm:$0xf] %vm3208_vm1, %v3658_v27  ;;  %v2797_v48 = vsel %vm927_vm0, %v1845_v25, -inf }
 0x1e9   :  { %v3659_v4 = vpack.c.bf16 %v2947_v63, %v2947_v63  ;;  %v2945_v46 = vmax.f32 %v2881_v14, 0.0  ;;  %v2814_v34 = vmax.f32 %v2812_v39, %v5603_v5  ;;  %v2795_v54 = vmax.f32 %v2793_v58, %v2794_v17 }
 0x1ea   :  { %3265 = vst.msk [vmem:[%s6081_s3 + $0xe0] sm:$0xf] %vm3208_vm1, %v3656_v6  ;;  %v2886_v61 = vadd.f32 %v5915_v42, %v2809_v15  ;;  %v2798_v62 = vmax.f32 %v5630_v50, %v2797_v48  ;;  %v2815_v7 = vsel %vm927_vm0, %v4053_v29, -inf  ;;  %v2799_v44 = vsel %vm927_vm0, %v6331_v11, -inf }
 0x1eb   :  { %3268 = vst.msk [vmem:[%s6081_s3 + $0xec] sm:$0xf] %vm3208_vm1, %v3659_v4  ;;  %v3657_v5 = vpack.c.bf16 %v2945_v46, %v2945_v46  ;;  %v2816_v8 = vmax.f32 %v2814_v34, %v2815_v7  ;;  %v2884_v0 = vadd.f32 %v5915_v42, %v2795_v54  ;;  %v2801_v9 = vsel %vm927_vm0, %v2357_v3, -inf }
 0x1ec   :  { %v2950_v38 = vmax.f32 %v2886_v61, 0.0  ;;  %v2800_v35 = vmax.f32 %v2798_v62, %v2799_v44 }
 0x1ed   :  { %3266 = vst.msk [vmem:[%s6081_s3 + $0xe4] sm:$0xf] %vm3208_vm1, %v3657_v5  ;;  %v2887_v50 = vadd.f32 %v5915_v42, %v2816_v8  ;;  %v2948_v18 = vmax.f32 %v2884_v0, 0.0 }
 0x1ee   :  { %v3662_v26 = vpack.c.bf16 %v2950_v38, %v2950_v38  ;;  %v2802_v16 = vmax.f32 %v2800_v35, %v2801_v9 }
 0x1ef   :  { %v2951_v53 = vmax.f32 %v2887_v50, 0.0  ;;  %v3660_v28 = vpack.c.bf16 %v2948_v18, %v2948_v18 }
 0x1f0   :  { %3271 = vst.msk [vmem:[%s6081_s3 + $0xf8] sm:$0xf] %vm3208_vm1, %v3662_v26  ;;  %v2885_v19 = vadd.f32 %v5915_v42, %v2802_v16 }
 0x1f1   :  { %v3663_v20 = vpack.c.bf16 %v2951_v53, %v2951_v53  ;;  %3269 = vst.msk [vmem:[%s6081_s3 + $0xf0] sm:$0xf] %vm3208_vm1, %v3660_v28 }
 0x1f2   :  { %v2949_v52 = vmax.f32 %v2885_v19, 0.0 }
 0x1f3   :  { %3272 = vst.msk [vmem:[%s6081_s3 + $0xfc] sm:$0xf] %vm3208_vm1, %v3663_v20 }
 0x1f4   :  { %v3661_v43 = vpack.c.bf16 %v2949_v52, %v2949_v52 }
 0x1f6   :  { %3270 = vst.msk [vmem:[%s6081_s3 + $0xf4] sm:$0xf] %vm3208_vm1, %v3661_v43 }

// kernel: cifarnet_forward.4
= control target key start
LH: loop header
LB: loop body
LE: loop exit
PB: predicated region body
PF: predicated region fallthrough
CT: control target
= control target key end

     0   :  { %v2139_v0 = vmov 0   ;;  %vm767_vm0 = vcmask 261120   ;;  %vm1442_vm1 = vcmask 523264   ;;  %vm1658_vm2 = vcmask 519168   ;;  %s3000_s1 = inlined_call_operand.vmem [shape: bf16[288,64], index: 1, kind: input, shape index: {}]   ;;  %s3001_s0 = inlined_call_operand.vmem [shape: bf16[4,128,288], index: 0, kind: input, shape index: {}]   ;;  %s3002_s2 = inlined_call_operand.vmem [shape: f32[1,64], index: 2, kind: input, shape index: {}]   ;;  %s3003_s3 = inlined_call_operand.vmem [shape: bf16[128,64], index: 3, kind: output, shape index: {}]  }
   0x1   :  { %864 = vmatprep.subr.bf16.mxu0 %v2139_v0  ;;  %1960 = vmatprep.subr.bf16.mxu1 %v2139_v0  ;;  %v1993_v1 = vld [vmem:[%s3000_s1] sm:$0xff]   ;;  %v1994_v2 = vld [vmem:[%s3000_s1 + $0x8] sm:$0xff]   ;;  %v1995_v3 = vld [vmem:[%s3000_s1 + $0x10] sm:$0xff]  }
   0x2   :  { %865 = vmatpush1.bf16.msra.mxu0 %v1993_v1  ;;  %1976 = vmatpush1.bf16.msra.mxu1 %v1993_v1  ;;  %v1996_v4 = vld [vmem:[%s3000_s1 + $0x18] sm:$0xff]   ;;  %v1997_v5 = vld [vmem:[%s3000_s1 + $0x20] sm:$0xff]   ;;  %v1998_v7 = vld [vmem:[%s3000_s1 + $0x28] sm:$0xff]  }
   0x3   :  { %866 = vmatprep.subr.bf16.mxu0 %v2139_v0  ;;  %1961 = vmatprep.subr.bf16.mxu1 %v2139_v0  ;;  %v2011_v6 = vld [vmem:[%s3001_s0 + $0x4] ss:$12 sps:$4 sm:$0xff]   ;;  %v2000_v10 = vld [vmem:[%s3000_s1 + $0x38] sm:$0xff]   ;;  %v2002_v12 = vld [vmem:[%s3000_s1 + $0x48] sm:$0xff]  }
   0x4   :  { %v2014_v8 = vld [vmem:[%s3001_s0 + $0x244] ss:$12 sps:$4 sm:$0xff]   ;;  %896 = vmatprep.mubr.bf16.mxu0 %v2011_v6  ;;  %v2004_v14 = vld [vmem:[%s3000_s1 + $0x58] sm:$0xff]   ;;  %v2006_v16 = vld [vmem:[%s3000_s1 + $0x68] sm:$0xff]  }
   0x5   :  { %1088 = vmatprep.mubr.bf16.mxu1 %v2014_v8  ;;  %v1999_v9 = vld [vmem:[%s3000_s1 + $0x30] sm:$0xff]   ;;  %v2001_v11 = vld [vmem:[%s3000_s1 + $0x40] sm:$0xff]   ;;  %v2008_v18 = vld [vmem:[%s3000_s1 + $0x78] sm:$0xff]  }
   0x6   :  { %867 = vmatpush1.bf16.msra.mxu0 %v1994_v2  ;;  %1977 = vmatpush1.bf16.msra.mxu1 %v1994_v2  ;;  %v2003_v13 = vld [vmem:[%s3000_s1 + $0x50] sm:$0xff]   ;;  %v2005_v15 = vld [vmem:[%s3000_s1 + $0x60] sm:$0xff]   ;;  %v2016_v22 = vld [vmem:[%s3001_s0 + $0x1c] ss:$12 sps:$4 sm:$0xff]  }
   0x7   :  { %868 = vmatprep.subr.bf16.mxu0 %v2139_v0  ;;  %1962 = vmatprep.subr.bf16.mxu1 %v2139_v0  ;;  %v2007_v17 = vld [vmem:[%s3000_s1 + $0x70] sm:$0xff]   ;;  %v2015_v19 = vld [vmem:[%s3000_s1 + $0x80] sm:$0xff]   ;;  %v2018_v23 = vld [vmem:[%s3001_s0 + $0x25c] ss:$12 sps:$4 sm:$0xff]  }
   0x8   :  { %v2009_v20 = vld [vmem:[%s3001_s0] ss:$12 sps:$4 sm:$0xff]   ;;  %v2020_v25 = vld [vmem:[%s3001_s0 + $0x18] ss:$12 sps:$4 sm:$0xff]   ;;  %v2026_v29 = vld [vmem:[%s3001_s0 + $0x30] ss:$12 sps:$4 sm:$0xff]  }
   0x9   :  { %v2012_v21 = vld [vmem:[%s3001_s0 + $0x240] ss:$12 sps:$4 sm:$0xff]   ;;  %v2021_v26 = vld [vmem:[%s3001_s0 + $0x258] ss:$12 sps:$4 sm:$0xff]   ;;  %v2027_v30 = vld [vmem:[%s3001_s0 + $0x270] ss:$12 sps:$4 sm:$0xff]  }
   0xa   :  { %869 = vmatpush1.bf16.msra.mxu0 %v1995_v3  ;;  %1978 = vmatpush1.bf16.msra.mxu1 %v1995_v3  ;;  %v2040_v24 = vld [vmem:[%s3000_s1 + $0x88] sm:$0xff]   ;;  %v2022_v27 = vld [vmem:[%s3001_s0 + $0x34] ss:$12 sps:$4 sm:$0xff]   ;;  %v2034_v35 = vld [vmem:[%s3001_s0 + $0x64] ss:$12 sps:$4 sm:$0xff]  }
   0xb   :  { %870 = vmatprep.subr.bf16.mxu0 %v2139_v0  ;;  %1963 = vmatprep.subr.bf16.mxu1 %v2139_v0  ;;  %v2024_v28 = vld [vmem:[%s3001_s0 + $0x274] ss:$12 sps:$4 sm:$0xff]   ;;  %v2028_v31 = vld [vmem:[%s3001_s0 + $0x4c] ss:$12 sps:$4 sm:$0xff]   ;;  %v2036_v36 = vld [vmem:[%s3001_s0 + $0x2a4] ss:$12 sps:$4 sm:$0xff]  }
   0xc   :  { %v2030_v32 = vld [vmem:[%s3001_s0 + $0x28c] ss:$12 sps:$4 sm:$0xff]   ;;  %v2032_v33 = vld [vmem:[%s3001_s0 + $0x48] ss:$12 sps:$4 sm:$0xff]   ;;  %v2051_v45 = vld [vmem:[%s3001_s0 + $0x90] ss:$12 sps:$4 sm:$0xff]  }
   0xd   :  { %v2033_v34 = vld [vmem:[%s3001_s0 + $0x288] ss:$12 sps:$4 sm:$0xff]   ;;  %v2038_v37 = vld [vmem:[%s3001_s0 + $0x60] ss:$12 sps:$4 sm:$0xff]   ;;  %v2045_v41 = vld [vmem:[%s3001_s0 + $0x78] ss:$12 sps:$4 sm:$0xff]  }
   0xe   :  { %871 = vmatpush1.bf16.msra.mxu0 %v1996_v4  ;;  %1979 = vmatpush1.bf16.msra.mxu1 %v1996_v4  ;;  %v2039_v38 = vld [vmem:[%s3001_s0 + $0x2a0] ss:$12 sps:$4 sm:$0xff]   ;;  %v2041_v39 = vld [vmem:[%s3001_s0 + $0x7c] ss:$12 sps:$4 sm:$0xff]   ;;  %v2046_v42 = vld [vmem:[%s3001_s0 + $0x2b8] ss:$12 sps:$4 sm:$0xff]  }
   0xf   :  { %872 = vmatprep.subr.bf16.mxu0 %v2139_v0  ;;  %1964 = vmatprep.subr.bf16.mxu1 %v2139_v0  ;;  %v2043_v40 = vld [vmem:[%s3001_s0 + $0x2bc] ss:$12 sps:$4 sm:$0xff]   ;;  %v2047_v43 = vld [vmem:[%s3001_s0 + $0x94] ss:$12 sps:$4 sm:$0xff]   ;;  %v2053_v47 = vld [vmem:[%s3001_s0 + $0xac] ss:$12 sps:$4 sm:$0xff]  }
  0x10   :  { %v2049_v44 = vld [vmem:[%s3001_s0 + $0x2d4] ss:$12 sps:$4 sm:$0xff]   ;;  %v2052_v46 = vld [vmem:[%s3001_s0 + $0x2d0] ss:$12 sps:$4 sm:$0xff]   ;;  %v2055_v48 = vld [vmem:[%s3001_s0 + $0x2ec] ss:$12 sps:$4 sm:$0xff]  }
  0x11   :  { %v2057_v49 = vld [vmem:[%s3001_s0 + $0xa8] ss:$12 sps:$4 sm:$0xff]   ;;  %v2059_v51 = vld [vmem:[%s3001_s0 + $0xc4] ss:$12 sps:$4 sm:$0xff]   ;;  %v2062_v53 = vld [vmem:[%s3001_s0 + $0xc0] ss:$12 sps:$4 sm:$0xff]  }
  0x12   :  { %873 = vmatpush1.bf16.msra.mxu0 %v1997_v5  ;;  %1980 = vmatpush1.bf16.msra.mxu1 %v1997_v5  ;;  %v2058_v50 = vld [vmem:[%s3001_s0 + $0x2e8] ss:$12 sps:$4 sm:$0xff]   ;;  %v2063_v54 = vld [vmem:[%s3001_s0 + $0x20] ss:$12 sps:$4 sm:$0xff]   ;;  %v2066_v56 = vld [vmem:[%s3001_s0 + $0x38] ss:$12 sps:$4 sm:$0xff]  }
  0x13   :  { %874 = vmatprep.subr.bf16.mxu0 %v2139_v0  ;;  %1965 = vmatprep.subr.bf16.mxu1 %v2139_v0  ;;  %v2061_v52 = vld [vmem:[%s3001_s0 + $0x8] ss:$12 sps:$4 sm:$0xff]   ;;  %v2067_v57 = vld [vmem:[%s3001_s0 + $0xd8] ss:$12 sps:$4 sm:$0xff]   ;;  %v2068_v58 = vld [vmem:[%s3001_s0 + $0x50] ss:$12 sps:$4 sm:$0xff]  }
  0x14   :  { %v2064_v55 = vld [vmem:[%s3001_s0 + $0xdc] ss:$12 sps:$4 sm:$0xff]   ;;  %v2069_v59 = vld [vmem:[%s3001_s0 + $0xf4] ss:$12 sps:$4 sm:$0xff]   ;;  %v2074_v63 = vld [vmem:[%s3001_s0 + $0x10c] ss:$12 sps:$4 sm:$0xff]  }
  0x15   :  { %v2071_v60 = vld [vmem:[%s3001_s0 + $0x68] ss:$12 sps:$4 sm:$0xff]   ;;  %v2072_v61 = vld [vmem:[%s3001_s0 + $0xf0] ss:$12 sps:$4 sm:$0xff]   ;;  %v2073_v62 = vld [vmem:[%s3001_s0 + $0x80] ss:$12 sps:$4 sm:$0xff]  }
  0x16   :  { %875 = vmatpush1.bf16.msra.mxu0 %v1998_v7  ;;  %1981 = vmatpush1.bf16.msra.mxu1 %v1998_v7  ;;  %v2077_v1 = vld [vmem:[%s3001_s0 + $0x108] ss:$12 sps:$4 sm:$0xff]   ;;  %v2078_v2 = vld [vmem:[%s3001_s0 + $0xb0] ss:$12 sps:$4 sm:$0xff]   ;;  %v2082_v5 = vld [vmem:[%s3001_s0 + $0x120] ss:$12 sps:$4 sm:$0xff]  }
  0x17   :  { %876 = vmatprep.subr.bf16.mxu0 %v2139_v0  ;;  %1966 = vmatprep.subr.bf16.mxu1 %v2139_v0  ;;  %v2079_v3 = vld [vmem:[%s3001_s0 + $0x124] ss:$12 sps:$4 sm:$0xff]   ;;  %v2081_v4 = vld [vmem:[%s3001_s0 + $0xc8] ss:$12 sps:$4 sm:$0xff]   ;;  %v2083_v6 = vld [vmem:[%s3001_s0 + $0xe0] ss:$12 sps:$4 sm:$0xff]  }
  0x18   :  { %v2084_v7 = vld [vmem:[%s3001_s0 + $0x13c] ss:$12 sps:$4 sm:$0xff]   ;;  %v2086_v8 = vld [vmem:[%s3001_s0 + $0xf8] ss:$12 sps:$4 sm:$0xff]  }
  0x1a   :  { %877 = vmatpush1.bf16.msra.mxu0 %v1999_v9  ;;  %1982 = vmatpush1.bf16.msra.mxu1 %v1999_v9  ;;  %v2087_v9 = vld [vmem:[%s3001_s0 + $0x138] ss:$12 sps:$4 sm:$0xff]  }
  0x1b   :  { %878 = vmatprep.subr.bf16.mxu0 %v2139_v0  ;;  %1967 = vmatprep.subr.bf16.mxu1 %v2139_v0 }
  0x1e   :  { %879 = vmatpush1.bf16.msra.mxu0 %v2000_v10  ;;  %1983 = vmatpush1.bf16.msra.mxu1 %v2000_v10  ;;  %v2088_v10 = vld [vmem:[%s3001_s0 + $0x110] ss:$12 sps:$4 sm:$0xff]  }
  0x1f   :  { %880 = vmatprep.subr.bf16.mxu0 %v2139_v0  ;;  %1968 = vmatprep.subr.bf16.mxu1 %v2139_v0 }
  0x22   :  { %881 = vmatpush1.bf16.msra.mxu0 %v2001_v11  ;;  %1984 = vmatpush1.bf16.msra.mxu1 %v2001_v11  ;;  %v2089_v11 = vld [vmem:[%s3001_s0 + $0x154] ss:$12 sps:$4 sm:$0xff]  }
  0x23   :  { %882 = vmatprep.subr.bf16.mxu0 %v2139_v0  ;;  %1969 = vmatprep.subr.bf16.mxu1 %v2139_v0 }
  0x26   :  { %883 = vmatpush1.bf16.msra.mxu0 %v2002_v12  ;;  %1985 = vmatpush1.bf16.msra.mxu1 %v2002_v12  ;;  %v2091_v12 = vld [vmem:[%s3001_s0 + $0x128] ss:$12 sps:$4 sm:$0xff]  }
  0x27   :  { %884 = vmatprep.subr.bf16.mxu0 %v2139_v0  ;;  %1970 = vmatprep.subr.bf16.mxu1 %v2139_v0 }
  0x2a   :  { %885 = vmatpush1.bf16.msra.mxu0 %v2003_v13  ;;  %1986 = vmatpush1.bf16.msra.mxu1 %v2003_v13  ;;  %v2092_v13 = vld [vmem:[%s3001_s0 + $0x150] ss:$12 sps:$4 sm:$0xff]  }
  0x2b   :  { %886 = vmatprep.subr.bf16.mxu0 %v2139_v0  ;;  %1971 = vmatprep.subr.bf16.mxu1 %v2139_v0 }
  0x2e   :  { %887 = vmatpush1.bf16.msra.mxu0 %v2004_v14  ;;  %1987 = vmatpush1.bf16.msra.mxu1 %v2004_v14  ;;  %v2093_v14 = vld [vmem:[%s3001_s0 + $0x140] ss:$12 sps:$4 sm:$0xff]  }
  0x2f   :  { %888 = vmatprep.subr.bf16.mxu0 %v2139_v0  ;;  %1972 = vmatprep.subr.bf16.mxu1 %v2139_v0 }
  0x32   :  { %889 = vmatpush1.bf16.msra.mxu0 %v2005_v15  ;;  %1988 = vmatpush1.bf16.msra.mxu1 %v2005_v15  ;;  %v2094_v15 = vld [vmem:[%s3001_s0 + $0x16c] ss:$12 sps:$4 sm:$0xff]  }
  0x33   :  { %890 = vmatprep.subr.bf16.mxu0 %v2139_v0  ;;  %1973 = vmatprep.subr.bf16.mxu1 %v2139_v0 }
  0x36   :  { %891 = vmatpush1.bf16.msra.mxu0 %v2006_v16  ;;  %1989 = vmatpush1.bf16.msra.mxu1 %v2006_v16  ;;  %v2096_v16 = vld [vmem:[%s3001_s0 + $0x158] ss:$12 sps:$4 sm:$0xff]  }
  0x37   :  { %892 = vmatprep.subr.bf16.mxu0 %v2139_v0  ;;  %1974 = vmatprep.subr.bf16.mxu1 %v2139_v0 }
  0x3a   :  { %893 = vmatpush1.bf16.msra.mxu0 %v2007_v17  ;;  %1990 = vmatpush1.bf16.msra.mxu1 %v2007_v17  ;;  %v2097_v17 = vld [vmem:[%s3001_s0 + $0x168] ss:$12 sps:$4 sm:$0xff]  }
  0x3b   :  { %894 = vmatprep.subr.bf16.mxu0 %v2139_v0  ;;  %1975 = vmatprep.subr.bf16.mxu1 %v2139_v0  ;;  %v2076_v0 = vld [vmem:[%s3001_s0 + $0x98] ss:$12 sps:$4 sm:$0xff]  }
  0x3e   :  { %895 = vmatpush1.bf16.msra.mxu0 %v2008_v18  ;;  %1991 = vmatpush1.bf16.msra.mxu1 %v2008_v18  ;;  %v2098_v18 = vld [vmem:[%s3001_s0 + $0x170] ss:$12 sps:$4 sm:$0xff]  }
  0x3f   :  { %1892 = vmatprep.subr.bf16.mxu1 %v2015_v19 }
  0x41   :  { %897 = vmatmul.mubr.bf16.vlgmr.msra.gmra.mrb[0].mxu0 %v2009_v20  ;;  %1089 = vmatmul.mubr.bf16.vlgmr.msra.gmra.mrb[0].mxu1 %v2012_v21  ;;  %v2101_v20 = vld [vmem:[%s3001_s0 + $0x188] ss:$12 sps:$4 sm:$0xff]   ;;  %v2102_v21 = vld [vmem:[%s3001_s0 + $0x180] ss:$12 sps:$4 sm:$0xff]  }
  0x42   :  { %1893 = vmatpush3.bf16.msra.mxu1 %v2015_v19  ;;  %904 = vmatprep.mubr.bf16.mxu0 %v2016_v22  ;;  %v2099_v19 = vld [vmem:[%s3001_s0 + $0x184] ss:$12 sps:$4 sm:$0xff]   ;;  %v2103_v22 = vld [vmem:[%s3001_s0 + $0x1a0] ss:$12 sps:$4 sm:$0xff]  }
  0x43   :  { %1096 = vmatprep.mubr.bf16.mxu1 %v2018_v23  ;;  %1894 = vmatprep.subr.bf16.mxu1 %v2040_v24  ;;  %v2104_v23 = vld [vmem:[%s3001_s0 + $0x19c] ss:$12 sps:$4 sm:$0xff]  }
  0x46   :  { %1895 = vmatpush3.bf16.msra.mxu1 %v2040_v24  ;;  %v2106_v24 = vld [vmem:[%s3001_s0 + $0x1b8] ss:$12 sps:$4 sm:$0xff]  }
  0x49   :  { %905 = vmatmul.mubr.bf16.gmra.mrb[4].mxu0 %v2020_v25  ;;  %1097 = vmatmul.mubr.bf16.gmra.mrb[4].mxu1 %v2021_v26  ;;  %v2107_v25 = vld [vmem:[%s3001_s0 + $0x198] ss:$12 sps:$4 sm:$0xff]   ;;  %v2108_v26 = vld [vmem:[%s3001_s0 + $0x1d0] ss:$12 sps:$4 sm:$0xff]  }
  0x4a   :  { %912 = vmatprep.mubr.bf16.mxu0 %v2022_v27  ;;  %1104 = vmatprep.mubr.bf16.mxu1 %v2024_v28  ;;  %v2109_v27 = vld [vmem:[%s3001_s0 + $0x1b4] ss:$12 sps:$4 sm:$0xff]  }
  0x4b   :  { %v2111_v28 = vld [vmem:[%s3001_s0 + $0x1e8] ss:$12 sps:$4 sm:$0xff]  }
  0x51   :  { %913 = vmatmul.mubr.bf16.gmra.mrb[8].mxu0 %v2026_v29  ;;  %1105 = vmatmul.mubr.bf16.gmra.mrb[8].mxu1 %v2027_v30  ;;  %v2112_v29 = vld [vmem:[%s3001_s0 + $0x1b0] ss:$12 sps:$4 sm:$0xff]   ;;  %v2113_v30 = vld [vmem:[%s3001_s0 + $0x200] ss:$12 sps:$4 sm:$0xff]  }
  0x52   :  { %920 = vmatprep.mubr.bf16.mxu0 %v2028_v31  ;;  %1112 = vmatprep.mubr.bf16.mxu1 %v2030_v32  ;;  %v2114_v31 = vld [vmem:[%s3001_s0 + $0x1cc] ss:$12 sps:$4 sm:$0xff]  }
  0x53   :  { %v2116_v32 = vld [vmem:[%s3001_s0 + $0x218] ss:$12 sps:$4 sm:$0xff]  }
  0x59   :  { %921 = vmatmul.mubr.bf16.gmra.mrb[12].mxu0 %v2032_v33  ;;  %1113 = vmatmul.mubr.bf16.gmra.mrb[12].mxu1 %v2033_v34  ;;  %v2117_v33 = vld [vmem:[%s3001_s0 + $0x1c8] ss:$12 sps:$4 sm:$0xff]   ;;  %v2118_v34 = vld [vmem:[%s3001_s0 + $0x230] ss:$12 sps:$4 sm:$0xff]  }
  0x5a   :  { %928 = vmatprep.mubr.bf16.mxu0 %v2034_v35  ;;  %1120 = vmatprep.mubr.bf16.mxu1 %v2036_v36  ;;  %v2119_v35 = vld [vmem:[%s3001_s0 + $0x1e4] ss:$12 sps:$4 sm:$0xff]   ;;  %v2121_v36 = vld [vmem:[%s3001_s0 + $0x248] ss:$12 sps:$4 sm:$0xff]  }
  0x61   :  { %929 = vmatmul.mubr.bf16.gmra.mrb[16].mxu0 %v2038_v37  ;;  %1121 = vmatmul.mubr.bf16.gmra.mrb[16].mxu1 %v2039_v38  ;;  %v2122_v37 = vld [vmem:[%s3001_s0 + $0x1e0] ss:$12 sps:$4 sm:$0xff]  }
  0x62   :  { %936 = vmatprep.mubr.bf16.mxu0 %v2041_v39  ;;  %1128 = vmatprep.mubr.bf16.mxu1 %v2043_v40  ;;  %v2123_v38 = vld [vmem:[%s3001_s0 + $0x260] ss:$12 sps:$4 sm:$0xff]   ;;  %v2124_v39 = vld [vmem:[%s3001_s0 + $0x1fc] ss:$12 sps:$4 sm:$0xff]   ;;  %v2126_v40 = vld [vmem:[%s3001_s0 + $0x278] ss:$12 sps:$4 sm:$0xff]  }
  0x69   :  { %937 = vmatmul.mubr.bf16.gmra.mrb[20].mxu0 %v2045_v41  ;;  %1129 = vmatmul.mubr.bf16.gmra.mrb[20].mxu1 %v2046_v42  ;;  %v2127_v41 = vld [vmem:[%s3001_s0 + $0x1f8] ss:$12 sps:$4 sm:$0xff]   ;;  %v2128_v42 = vld [vmem:[%s3001_s0 + $0x290] ss:$12 sps:$4 sm:$0xff]  }
  0x6a   :  { %944 = vmatprep.mubr.bf16.mxu0 %v2047_v43  ;;  %1136 = vmatprep.mubr.bf16.mxu1 %v2049_v44  ;;  %v2129_v43 = vld [vmem:[%s3001_s0 + $0x214] ss:$12 sps:$4 sm:$0xff]  }
  0x6b   :  { %v2131_v44 = vld [vmem:[%s3001_s0 + $0x2a8] ss:$12 sps:$4 sm:$0xff]  }
  0x71   :  { %945 = vmatmul.mubr.bf16.gmra.mrb[24].mxu0 %v2051_v45  ;;  %1137 = vmatmul.mubr.bf16.gmra.mrb[24].mxu1 %v2052_v46  ;;  %v2132_v45 = vld [vmem:[%s3001_s0 + $0x210] ss:$12 sps:$4 sm:$0xff]   ;;  %v2133_v46 = vld [vmem:[%s3001_s0 + $0x2c0] ss:$12 sps:$4 sm:$0xff]  }
  0x72   :  { %952 = vmatprep.mubr.bf16.mxu0 %v2053_v47  ;;  %1144 = vmatprep.mubr.bf16.mxu1 %v2055_v48  ;;  %v2134_v47 = vld [vmem:[%s3001_s0 + $0x22c] ss:$12 sps:$4 sm:$0xff]  }
  0x73   :  { %v2136_v48 = vld [vmem:[%s3001_s0 + $0x2d8] ss:$12 sps:$4 sm:$0xff]  }
  0x79   :  { %953 = vmatmul.mubr.bf16.gmra.mrb[28].mxu0 %v2057_v49  ;;  %1145 = vmatmul.mubr.bf16.gmra.mrb[28].mxu1 %v2058_v50  ;;  %v2137_v49 = vld [vmem:[%s3001_s0 + $0x228] ss:$12 sps:$4 sm:$0xff]   ;;  %v2138_v50 = vld [vmem:[%s3001_s0 + $0x2f0] ss:$12 sps:$4 sm:$0xff]  }
  0x7a   :  { %960 = vmatprep.mubr.bf16.mxu0 %v2059_v51  ;;  %1896 = vmatprep.mubr.msk.bf16.mxu1 %vm767_vm0, %v2061_v52 }
  0x81   :  { %961 = vmatmul.mubr.bf16.gmra.mrb[32].mxu0 %v2062_v53  ;;  %1897 = vmatmul.mubr.msk.bf16.vlgmr.msra.gmra.mrb[32].mxu1 %vm767_vm0, %v2063_v54 }
  0x82   :  { %968 = vmatprep.mubr.bf16.mxu0 %v2064_v55  ;;  %1900 = vmatprep.mubr.msk.bf16.mxu1 %vm767_vm0, %v2066_v56 }
  0x89   :  { %969 = vmatmul.mubr.bf16.gmra.mrb[36].mxu0 %v2067_v57  ;;  %1901 = vmatmul.mubr.msk.bf16.gmra.mrb[36].mxu1 %vm767_vm0, %v2068_v58 }
  0x8a   :  { %976 = vmatprep.mubr.bf16.mxu0 %v2069_v59  ;;  %1904 = vmatprep.mubr.msk.bf16.mxu1 %vm767_vm0, %v2071_v60 }
  0x91   :  { %977 = vmatmul.mubr.bf16.gmra.mrb[40].mxu0 %v2072_v61  ;;  %1905 = vmatmul.mubr.msk.bf16.gmra.mrb[40].mxu1 %vm767_vm0, %v2073_v62 }
  0x92   :  { %984 = vmatprep.mubr.bf16.mxu0 %v2074_v63  ;;  %1908 = vmatprep.mubr.msk.bf16.mxu1 %vm767_vm0, %v2076_v0 }
  0x99   :  { %985 = vmatmul.mubr.bf16.gmra.mrb[44].mxu0 %v2077_v1  ;;  %1909 = vmatmul.mubr.msk.bf16.gmra.mrb[44].mxu1 %vm767_vm0, %v2078_v2 }
  0x9a   :  { %992 = vmatprep.mubr.bf16.mxu0 %v2079_v3  ;;  %1912 = vmatprep.mubr.msk.bf16.mxu1 %vm767_vm0, %v2081_v4 }
  0xa1   :  { %993 = vmatmul.mubr.bf16.gmra.mrb[48].mxu0 %v2082_v5  ;;  %1913 = vmatmul.mubr.msk.bf16.gmra.mrb[48].mxu1 %vm767_vm0, %v2083_v6 }
  0xa2   :  { %1000 = vmatprep.mubr.bf16.mxu0 %v2084_v7  ;;  %1916 = vmatprep.mubr.msk.bf16.mxu1 %vm767_vm0, %v2086_v8 }
  0xa9   :  { %1001 = vmatmul.mubr.bf16.gmra.mrb[52].mxu0 %v2087_v9  ;;  %1917 = vmatmul.mubr.msk.bf16.gmra.mrb[52].mxu1 %vm767_vm0, %v2088_v10 }
  0xaa   :  { %1008 = vmatprep.mubr.bf16.mxu0 %v2089_v11  ;;  %1920 = vmatprep.mubr.msk.bf16.mxu1 %vm767_vm0, %v2091_v12 }
  0xb1   :  { %1009 = vmatmul.mubr.bf16.gmra.mrb[56].mxu0 %v2092_v13  ;;  %1921 = vmatmul.mubr.msk.bf16.gmra.mrb[56].mxu1 %vm767_vm0, %v2093_v14 }
  0xb2   :  { %1016 = vmatprep.mubr.bf16.mxu0 %v2094_v15  ;;  %1924 = vmatprep.mubr.msk.bf16.mxu1 %vm767_vm0, %v2096_v16 }
  0xb9   :  { %1017 = vmatmul.mubr.bf16.gmra.mrb[60].mxu0 %v2097_v17  ;;  %1925 = vmatmul.mubr.msk.bf16.gmra.mrb[60].mxu1 %vm767_vm0, %v2098_v18 }
  0xba   :  { %1024 = vmatprep.mubr.bf16.mxu0 %v2099_v19  ;;  %1928 = vmatprep.mubr.msk.bf16.mxu1 %vm767_vm0, %v2101_v20 }
  0xc1   :  { %1025 = vmatmul.mubr.bf16.gmra.mrb[64].mxu0 %v2102_v21  ;;  %1929 = vmatmul.mubr.msk.bf16.gmra.mrb[64].mxu1 %vm767_vm0, %v2103_v22 }
  0xc2   :  { %1032 = vmatprep.mubr.bf16.mxu0 %v2104_v23  ;;  %1932 = vmatprep.mubr.msk.bf16.mxu1 %vm767_vm0, %v2106_v24 }
  0xc9   :  { %1033 = vmatmul.mubr.bf16.gmra.mrb[68].mxu0 %v2107_v25  ;;  %1933 = vmatmul.mubr.msk.bf16.gmra.mrb[68].mxu1 %vm767_vm0, %v2108_v26 }
  0xca   :  { %1040 = vmatprep.mubr.bf16.mxu0 %v2109_v27  ;;  %1936 = vmatprep.mubr.msk.bf16.mxu1 %vm767_vm0, %v2111_v28 }
  0xd1   :  { %1041 = vmatmul.mubr.bf16.gmra.mrb[72].mxu0 %v2112_v29  ;;  %1937 = vmatmul.mubr.msk.bf16.gmra.mrb[72].mxu1 %vm767_vm0, %v2113_v30 }
  0xd2   :  { %1048 = vmatprep.mubr.bf16.mxu0 %v2114_v31  ;;  %1940 = vmatprep.mubr.msk.bf16.mxu1 %vm767_vm0, %v2116_v32 }
  0xd9   :  { %1049 = vmatmul.mubr.bf16.gmra.mrb[76].mxu0 %v2117_v33  ;;  %1941 = vmatmul.mubr.msk.bf16.gmra.mrb[76].mxu1 %vm767_vm0, %v2118_v34 }
  0xda   :  { %1056 = vmatprep.mubr.bf16.mxu0 %v2119_v35  ;;  %1944 = vmatprep.mubr.msk.bf16.mxu1 %vm767_vm0, %v2121_v36 }
  0xe1   :  { %1057 = vmatmul.mubr.bf16.gmra.mrb[80].mxu0 %v2122_v37  ;;  %1945 = vmatmul.mubr.msk.bf16.gmra.mrb[80].mxu1 %vm767_vm0, %v2123_v38 }
  0xe2   :  { %1064 = vmatprep.mubr.bf16.mxu0 %v2124_v39  ;;  %1948 = vmatprep.mubr.msk.bf16.mxu1 %vm767_vm0, %v2126_v40 }
  0xe9   :  { %1065 = vmatmul.mubr.bf16.gmra.mrb[84].mxu0 %v2127_v41  ;;  %1949 = vmatmul.mubr.msk.bf16.gmra.mrb[84].mxu1 %vm767_vm0, %v2128_v42 }
  0xea   :  { %1072 = vmatprep.mubr.bf16.mxu0 %v2129_v43  ;;  %1952 = vmatprep.mubr.msk.bf16.mxu1 %vm767_vm0, %v2131_v44 }
  0xf1   :  { %1073 = vmatmul.mubr.bf16.gmra.mrb[88].mxu0 %v2132_v45  ;;  %1953 = vmatmul.mubr.msk.bf16.gmra.mrb[88].mxu1 %vm767_vm0, %v2133_v46 }
  0xf2   :  { %1080 = vmatprep.mubr.bf16.mxu0 %v2134_v47  ;;  %1956 = vmatprep.mubr.msk.bf16.mxu1 %vm767_vm0, %v2136_v48 }
  0xf9   :  { %1081 = vmatmul.mubr.bf16.gmra.mrb[92].mxu0 %v2137_v49  ;;  %1957 = vmatmul.mubr.msk.bf16.gmra.mrb[92].mxu1 %vm767_vm0, %v2138_v50 }
 0x114   :  { %v2566_v51 = vpop.f32.mrb[0].mxu0  ;;  %v2568_v52 = vpop.f32.mrb[0].mxu1 }
 0x115   :  { %v900_v53 = vpop.f32.mrb[1].mxu0  ;;  %v1092_v54 = vpop.f32.mrb[1].mxu1 }
 0x116   :  { %v2570_v55 = vpop.f32.mrb[2].mxu0  ;;  %v2572_v56 = vpop.f32.mrb[2].mxu1 }
 0x117   :  { %v903_v57 = vpop.f32.mrb[3].mxu0  ;;  %v1095_v58 = vpop.f32.mrb[3].mxu1 }
 0x11c   :  { %v906_v59 = vpop.f32.mrb[4].mxu0  ;;  %v2574_v60 = vpop.f32.mrb[4].mxu1 }
 0x11d   :  { %v908_v61 = vpop.f32.mrb[5].mxu0  ;;  %v1100_v62 = vpop.f32.mrb[5].mxu1 }
 0x11e   :  { %v909_v63 = vpop.f32.mrb[6].mxu0  ;;  %v2576_v0 = vpop.f32.mrb[6].mxu1 }
 0x11f   :  { %v911_v1 = vpop.f32.mrb[7].mxu0  ;;  %v1103_v2 = vpop.f32.mrb[7].mxu1 }
 0x124   :  { %v2578_v3 = vpop.f32.mrb[8].mxu0  ;;  %v2580_v4 = vpop.f32.mrb[8].mxu1 }
 0x125   :  { %v916_v5 = vpop.f32.mrb[9].mxu0  ;;  %v1108_v6 = vpop.f32.mrb[9].mxu1 }
 0x126   :  { %v2582_v7 = vpop.f32.mrb[10].mxu0  ;;  %v2584_v8 = vpop.f32.mrb[10].mxu1 }
 0x127   :  { %v919_v9 = vpop.f32.mrb[11].mxu0  ;;  %v1111_v10 = vpop.f32.mrb[11].mxu1 }
 0x12c   :  { %v922_v11 = vpop.f32.mrb[12].mxu0  ;;  %v2586_v12 = vpop.f32.mrb[12].mxu1 }
 0x12d   :  { %v924_v13 = vpop.f32.mrb[13].mxu0  ;;  %v1116_v14 = vpop.f32.mrb[13].mxu1 }
 0x12e   :  { %v925_v15 = vpop.f32.mrb[14].mxu0  ;;  %v2588_v16 = vpop.f32.mrb[14].mxu1 }
 0x12f   :  { %v927_v17 = vpop.f32.mrb[15].mxu0  ;;  %v1119_v18 = vpop.f32.mrb[15].mxu1 }
 0x134   :  { %v930_v19 = vpop.f32.mrb[16].mxu0  ;;  %v2590_v20 = vpop.f32.mrb[16].mxu1 }
 0x135   :  { %v932_v21 = vpop.f32.mrb[17].mxu0  ;;  %v1124_v22 = vpop.f32.mrb[17].mxu1 }
 0x136   :  { %v2592_v23 = vpop.f32.mrb[18].mxu0  ;;  %v2594_v24 = vpop.f32.mrb[18].mxu1 }
 0x137   :  { %v935_v25 = vpop.f32.mrb[19].mxu0  ;;  %v1127_v26 = vpop.f32.mrb[19].mxu1 }
 0x13c   :  { %v938_v27 = vpop.f32.mrb[20].mxu0  ;;  %v2596_v28 = vpop.f32.mrb[20].mxu1 }
 0x13d   :  { %v940_v29 = vpop.f32.mrb[21].mxu0  ;;  %v1132_v30 = vpop.f32.mrb[21].mxu1 }
 0x13e   :  { %v941_v31 = vpop.f32.mrb[22].mxu0  ;;  %v2598_v32 = vpop.f32.mrb[22].mxu1 }
 0x13f   :  { %v943_v33 = vpop.f32.mrb[23].mxu0  ;;  %v1135_v34 = vpop.f32.mrb[23].mxu1 }
 0x144   :  { %v946_v35 = vpop.f32.mrb[24].mxu0  ;;  %v2600_v36 = vpop.f32.mrb[24].mxu1 }
 0x145   :  { %v948_v37 = vpop.f32.mrb[25].mxu0  ;;  %v1140_v38 = vpop.f32.mrb[25].mxu1 }
 0x146   :  { %v949_v39 = vpop.f32.mrb[26].mxu0  ;;  %v2602_v40 = vpop.f32.mrb[26].mxu1 }
 0x147   :  { %v951_v41 = vpop.f32.mrb[27].mxu0  ;;  %v1143_v42 = vpop.f32.mrb[27].mxu1 }
 0x14c   :  { %v954_v43 = vpop.f32.mrb[28].mxu0  ;;  %v2604_v44 = vpop.f32.mrb[28].mxu1 }
 0x14d   :  { %v956_v45 = vpop.f32.mrb[29].mxu0  ;;  %v1148_v46 = vpop.f32.mrb[29].mxu1 }
 0x14e   :  { %v957_v47 = vpop.f32.mrb[30].mxu0  ;;  %v2606_v48 = vpop.f32.mrb[30].mxu1 }
 0x14f   :  { %v959_v49 = vpop.f32.mrb[31].mxu0  ;;  %v1151_v50 = vpop.f32.mrb[31].mxu1 }
 0x154   :  { %v962_v53 = vpop.f32.mrb[32].mxu0  ;;  %v1898_v54 = vpop.f32.mrb[32].mxu1 }
 0x155   :  { %v1196_v57 = vadd.f32 %v1898_v54, %v906_v59  ;;  %v964_v58 = vpop.f32.mrb[33].mxu0  ;;  %v1187_v61 = vpop.f32.mrb[33].mxu1 }
 0x156   :  { %v1188_v62 = vadd.f32 %v1187_v61, %v2566_v51  ;;  %v965_v1 = vpop.f32.mrb[34].mxu0  ;;  %v1899_v2 = vpop.f32.mrb[34].mxu1 }
 0x157   :  { %v1199_v5 = vadd.f32 %v1899_v2, %v909_v63  ;;  %v967_v6 = vpop.f32.mrb[35].mxu0  ;;  %v1190_v9 = vpop.f32.mrb[35].mxu1 }
 0x158   :  { %v1191_v10 = vadd.f32 %v1190_v9, %v2570_v55 }
 0x15c   :  { %v970_v13 = vpop.f32.mrb[36].mxu0  ;;  %v1902_v14 = vpop.f32.mrb[36].mxu1 }
 0x15d   :  { %v2610_v17 = vadd.f32 %v1902_v14, %v922_v11  ;;  %v972_v18 = vpop.f32.mrb[37].mxu0  ;;  %v1203_v21 = vpop.f32.mrb[37].mxu1 }
 0x15e   :  { %v2613_v22 = vadd.f32 %v1203_v21, %v2578_v3  ;;  %v973_v59 = vpop.f32.mrb[38].mxu0  ;;  %v1903_v25 = vpop.f32.mrb[38].mxu1 }
 0x15f   :  { %v2615_v26 = vadd.f32 %v1903_v25, %v925_v15  ;;  %v975_v51 = vpop.f32.mrb[39].mxu0  ;;  %v1206_v29 = vpop.f32.mrb[39].mxu1 }
 0x160   :  { %v2618_v63 = vadd.f32 %v1206_v29, %v2582_v7 }
 0x164   :  { %v978_v30 = vpop.f32.mrb[40].mxu0  ;;  %v1906_v55 = vpop.f32.mrb[40].mxu1 }
 0x165   :  { %v2620_v33 = vadd.f32 %v1906_v55, %v938_v27  ;;  %v980_v11 = vpop.f32.mrb[41].mxu0  ;;  %v1219_v34 = vpop.f32.mrb[41].mxu1 }
 0x166   :  { %v2622_v37 = vadd.f32 %v1219_v34, %v930_v19  ;;  %v981_v38 = vpop.f32.mrb[42].mxu0  ;;  %v1907_v3 = vpop.f32.mrb[42].mxu1 }
 0x167   :  { %v2624_v41 = vadd.f32 %v1907_v3, %v941_v31  ;;  %v983_v42 = vpop.f32.mrb[43].mxu0  ;;  %v1222_v15 = vpop.f32.mrb[43].mxu1  ;;  %v2652_v3 = vsel %vm1442_vm1, %v1199_v5, -inf }
 0x168   :  { %v2627_v45 = vadd.f32 %v1222_v15, %v2592_v23  ;;  %v2660_v42 = vsel %vm1442_vm1, %v1191_v10, -inf  ;;  %v2671_v10 = vsel %vm1442_vm1, %v2610_v17, -inf  ;;  %v2687_v17 = vsel %vm1442_vm1, %v2615_v26, -inf }
 0x16c   :  { %v986_v46 = vpop.f32.mrb[44].mxu0  ;;  %v1910_v7 = vpop.f32.mrb[44].mxu1 }
 0x16d   :  { %v2629_v49 = vadd.f32 %v1910_v7, %v954_v43  ;;  %v988_v50 = vpop.f32.mrb[45].mxu0  ;;  %v1235_v27 = vpop.f32.mrb[45].mxu1 }
 0x16e   :  { %v2631_v54 = vadd.f32 %v1235_v27, %v946_v35  ;;  %v989_v58 = vpop.f32.mrb[46].mxu0  ;;  %v1911_v19 = vpop.f32.mrb[46].mxu1  ;;  %v2638_v35 = vsel %vm1442_vm1, %v1196_v57, -inf }
 0x16f   :  { %v2633_v61 = vadd.f32 %v1911_v19, %v957_v47  ;;  %v991_v2 = vpop.f32.mrb[47].mxu0  ;;  %v1238_v31 = vpop.f32.mrb[47].mxu1 }
 0x170   :  { %v2635_v6 = vadd.f32 %v1238_v31, %v949_v39  ;;  %v2644_v39 = vsel %vm1442_vm1, %v1188_v62, -inf }
 0x174   :  { %v994_v9 = vpop.f32.mrb[48].mxu0  ;;  %v1914_v23 = vpop.f32.mrb[48].mxu1 }
 0x175   :  { %v1260_v14 = vadd.f32 %v1914_v23, %v970_v13  ;;  %v996_v18 = vpop.f32.mrb[49].mxu0  ;;  %v1251_v21 = vpop.f32.mrb[49].mxu1 }
 0x176   :  { %v1252_v43 = vadd.f32 %v1251_v21, %v962_v53  ;;  %v997_v25 = vpop.f32.mrb[50].mxu0  ;;  %v1915_v51 = vpop.f32.mrb[50].mxu1 }
 0x177   :  { %v2641_v29 = vsel %vm1442_vm1, %v1260_v14, -inf  ;;  %v1263_v47 = vadd.f32 %v1915_v51, %v973_v59  ;;  %v999_v55 = vpop.f32.mrb[51].mxu0  ;;  %v1254_v11 = vpop.f32.mrb[51].mxu1  ;;  %v2678_v51 = vsel %vm1442_vm1, %v2613_v22, -inf  ;;  %v2696_v22 = vsel %vm1442_vm1, %v2618_v63, -inf }
 0x178   :  { %v2649_v34 = vsel %vm1442_vm1, %v1252_v43, -inf  ;;  %v1255_v53 = vadd.f32 %v1254_v11, %v965_v1  ;;  %v2707_v63 = vsel %vm1442_vm1, %v2620_v33, -inf  ;;  %v2723_v33 = vsel %vm1442_vm1, %v2624_v41, -inf }
 0x179   :  { %v1445_v57 = vmax.f32 %v2644_v39, %v2649_v34  ;;  %v2657_v59 = vsel %vm1442_vm1, %v1263_v47, -inf  ;;  %v2750_v41 = vsel %vm1442_vm1, %v2631_v54, -inf  ;;  %v2768_v54 = vsel %vm1442_vm1, %v2635_v6, -inf }
 0x17a   :  { %v2665_v15 = vsel %vm1442_vm1, %v1255_v53, -inf }
 0x17b   :  { %v1452_v1 = vmax.f32 %v2660_v42, %v2665_v15  ;;  %v3009_v15 = vmax.f32 %v2652_v3, %v2657_v59 }
 0x17c   :  { %v1002_v5 = vpop.f32.mrb[52].mxu0  ;;  %v1918_v7 = vpop.f32.mrb[52].mxu1 }
 0x17d   :  { %v1276_v50 = vadd.f32 %v1918_v7, %v986_v46  ;;  %v1004_v27 = vpop.f32.mrb[53].mxu0  ;;  %v1267_v19 = vpop.f32.mrb[53].mxu1  ;;  %v2714_v46 = vsel %vm1442_vm1, %v2622_v37, -inf  ;;  %v2732_v37 = vsel %vm1442_vm1, %v2627_v45, -inf  ;;  %v2743_v45 = vsel %vm1442_vm1, %v2629_v49, -inf }
 0x17e   :  { %v1268_v2 = vadd.f32 %v1267_v19, %v978_v30  ;;  %v1005_v31 = vpop.f32.mrb[54].mxu0  ;;  %v1919_v23 = vpop.f32.mrb[54].mxu1  ;;  %v2759_v49 = vsel %vm1442_vm1, %v2633_v61, -inf }
 0x17f   :  { %v2674_v14 = vsel %vm1442_vm1, %v1276_v50, -inf  ;;  %v1279_v18 = vadd.f32 %v1919_v23, %v989_v58  ;;  %v1007_v21 = vpop.f32.mrb[55].mxu0  ;;  %v1270_v43 = vpop.f32.mrb[55].mxu1  ;;  %3006 = vst [vmem:[#allocation2_spill] sm:$0xff] %v2759_v49 }
 0x180   :  { %v2683_v30 = vsel %vm1442_vm1, %v1268_v2, -inf  ;;  %v1271_v47 = vadd.f32 %v1270_v43, %v981_v38 }
 0x181   :  { %v2692_v55 = vsel %vm1442_vm1, %v1279_v18, -inf }
 0x182   :  { %v2701_v53 = vsel %vm1442_vm1, %v1271_v47, -inf }
 0x183   :  { %v3011_v59 = vmax.f32 %v2696_v22, %v2701_v53  ;;  %v3012_v22 = vmax.f32 %v2671_v10, %v2674_v14 }
 0x184   :  { %v1010_v38 = vpop.f32.mrb[56].mxu0  ;;  %v1922_v7 = vpop.f32.mrb[56].mxu1 }
 0x185   :  { %v1292_v50 = vadd.f32 %v1922_v7, %v1002_v5  ;;  %v1012_v27 = vpop.f32.mrb[57].mxu0  ;;  %v1283_v19 = vpop.f32.mrb[57].mxu1 }
 0x186   :  { %v1284_v2 = vadd.f32 %v1283_v19, %v994_v9  ;;  %v1013_v23 = vpop.f32.mrb[58].mxu0  ;;  %v1923_v18 = vpop.f32.mrb[58].mxu1 }
 0x187   :  { %v2710_v21 = vsel %vm1442_vm1, %v1292_v50, -inf  ;;  %v1295_v43 = vadd.f32 %v1923_v18, %v1005_v31  ;;  %v1015_v47 = vpop.f32.mrb[59].mxu0  ;;  %v1286_v11 = vpop.f32.mrb[59].mxu1 }
 0x188   :  { %v2719_v9 = vsel %vm1442_vm1, %v1284_v2, -inf  ;;  %v1287_v7 = vadd.f32 %v1286_v11, %v997_v25 }
 0x189   :  { %v2728_v50 = vsel %vm1442_vm1, %v1295_v43, -inf }
 0x18a   :  { %v2737_v19 = vsel %vm1442_vm1, %v1287_v7, -inf }
 0x18c   :  { %v1018_v25 = vpop.f32.mrb[60].mxu0  ;;  %v1926_v11 = vpop.f32.mrb[60].mxu1 }
 0x18d   :  { %v1308_v2 = vadd.f32 %v1926_v11, %v1018_v25  ;;  %v1020_v18 = vpop.f32.mrb[61].mxu0  ;;  %v1299_v47 = vpop.f32.mrb[61].mxu1 }
 0x18e   :  { %v1300_v43 = vadd.f32 %v1299_v47, %v1010_v38  ;;  %v1021_v5 = vpop.f32.mrb[62].mxu0  ;;  %v1927_v31 = vpop.f32.mrb[62].mxu1 }
 0x18f   :  { %v2746_v27 = vsel %vm1442_vm1, %v1308_v2, -inf  ;;  %v1311_v7 = vadd.f32 %v1927_v31, %v1021_v5  ;;  %v1023_v26 = vpop.f32.mrb[63].mxu0  ;;  %v1302_v58 = vpop.f32.mrb[63].mxu1 }
 0x190   :  { %v2755_v38 = vsel %vm1442_vm1, %v1300_v43, -inf  ;;  %v1303_v11 = vadd.f32 %v1302_v58, %v1013_v23 }
 0x191   :  { %v2764_v26 = vsel %vm1442_vm1, %v1311_v7, -inf }
 0x192   :  { %3007 = vst [vmem:[#allocation3_spill] sm:$0xff] %v2764_v26  ;;  %v2773_v2 = vsel %vm1442_vm1, %v1303_v11, -inf }
 0x194   :  { %v1026_v58 = vpop.f32.mrb[64].mxu0  ;;  %v1930_v23 = vpop.f32.mrb[64].mxu1 }
 0x195   :  { %v1028_v18 = vpop.f32.mrb[65].mxu0  ;;  %v1315_v47 = vpop.f32.mrb[65].mxu1 }
 0x196   :  { %v1316_v43 = vadd.f32 %v1315_v47, %v1026_v58  ;;  %v1029_v7 = vpop.f32.mrb[66].mxu0  ;;  %v1931_v25 = vpop.f32.mrb[66].mxu1 }
 0x197   :  { %v1031_v5 = vpop.f32.mrb[67].mxu0  ;;  %v1318_v62 = vpop.f32.mrb[67].mxu1 }
 0x198   :  { %v1446_v6 = vsel %vm1442_vm1, %v1316_v43, -inf  ;;  %v1319_v13 = vadd.f32 %v1318_v62, %v1029_v7 }
 0x199   :  { %v2781_v11 = vmax.f32 %v1445_v57, %v1446_v6 }
 0x19a   :  { %v1453_v31 = vsel %vm1442_vm1, %v1319_v13, -inf  ;;  %v3008_v13 = vmax.f32 %v2638_v35, %v2641_v29 }
 0x19b   :  { %v2787_v18 = vmax.f32 %v1452_v1, %v1453_v31 }
 0x19c   :  { %v1034_v58 = vpop.f32.mrb[68].mxu0  ;;  %v1934_v47 = vpop.f32.mrb[68].mxu1 }
 0x19d   :  { %v1324_v61 = vadd.f32 %v1930_v23, %v1034_v58  ;;  %v1036_v5 = vpop.f32.mrb[69].mxu0  ;;  %v1331_v26 = vpop.f32.mrb[69].mxu1 }
 0x19e   :  { %v1037_v49 = vpop.f32.mrb[70].mxu0  ;;  %v1935_v43 = vpop.f32.mrb[70].mxu1 }
 0x19f   :  { %v1460_v62 = vsel %vm1442_vm1, %v1324_v61, -inf  ;;  %v1327_v7 = vadd.f32 %v1931_v25, %v1037_v49  ;;  %v1039_v39 = vpop.f32.mrb[71].mxu0  ;;  %v1334_v34 = vpop.f32.mrb[71].mxu1 }
 0x1a0   :  { %v1461_v57 = vmax.f32 %v3008_v13, %v1460_v62  ;;  %v3010_v62 = vmax.f32 %v2678_v51, %v2683_v30 }
 0x1a1   :  { %v1467_v42 = vsel %vm1442_vm1, %v1327_v7, -inf }
 0x1a2   :  { %v1468_v1 = vmax.f32 %v3009_v15, %v1467_v42 }
 0x1a4   :  { %v1042_v31 = vpop.f32.mrb[72].mxu0  ;;  %v2797_v23 = vpop.f32.mrb[72].mxu1 }
 0x1a5   :  { %v1332_v6 = vadd.f32 %v1331_v26, %v1042_v31  ;;  %v1044_v58 = vpop.f32.mrb[73].mxu0  ;;  %v1347_v5 = vpop.f32.mrb[73].mxu1 }
 0x1a6   :  { %v1045_v61 = vpop.f32.mrb[74].mxu0  ;;  %v2799_v25 = vpop.f32.mrb[74].mxu1 }
 0x1a7   :  { %v1474_v49 = vsel %vm1442_vm1, %v1332_v6, -inf  ;;  %v1335_v39 = vadd.f32 %v1334_v34, %v1045_v61  ;;  %v1047_v35 = vpop.f32.mrb[75].mxu0  ;;  %v1350_v29 = vpop.f32.mrb[75].mxu1 }
 0x1a8   :  { %v2805_v7 = vmax.f32 %v3010_v62, %v1474_v49 }
 0x1a9   :  { %v1481_v3 = vsel %vm1442_vm1, %v1335_v39, -inf }
 0x1aa   :  { %v2811_v26 = vmax.f32 %v3011_v59, %v1481_v3 }
 0x1ac   :  { %v1050_v13 = vpop.f32.mrb[76].mxu0  ;;  %v2813_v42 = vpop.f32.mrb[76].mxu1 }
 0x1ad   :  { %v1340_v15 = vadd.f32 %v1934_v47, %v1050_v13  ;;  %v1052_v31 = vpop.f32.mrb[77].mxu0  ;;  %v2815_v34 = vpop.f32.mrb[77].mxu1  ;;  %v3013_v47 = vmax.f32 %v2687_v17, %v2692_v55  ;;  %v2840_v17 = vld [vmem:[%s3002_s2] ss:$0 sm:$0xff] }
 0x1ae   :  { %v1053_v6 = vpop.f32.mrb[78].mxu0  ;;  %v2817_v58 = vpop.f32.mrb[78].mxu1 }
 0x1af   :  { %v1488_v51 = vsel %vm1442_vm1, %v1340_v15, -inf  ;;  %v1343_v30 = vadd.f32 %v1935_v43, %v1053_v6  ;;  %v1055_v61 = vpop.f32.mrb[79].mxu0  ;;  %v2820_v49 = vpop.f32.mrb[79].mxu1 }
 0x1b0   :  { %v2825_v53 = vmax.f32 %v3012_v22, %v1488_v51  ;;  %v3014_v61 = vmax.f32 %v2714_v46, %v2719_v9 }
 0x1b1   :  { %v1495_v39 = vsel %vm1442_vm1, %v1343_v30, -inf }
 0x1b2   :  { %v2831_v35 = vmax.f32 %v3013_v47, %v1495_v39 }
 0x1b4   :  { %v1058_v62 = vpop.f32.mrb[80].mxu0  ;;  %v1946_v3 = vpop.f32.mrb[80].mxu1 }
 0x1b5   :  { %v1348_v59 = vadd.f32 %v1347_v5, %v1058_v62  ;;  %v1388_v43 = vadd.f32 %v1946_v3, %v2574_v60  ;;  %v1060_v13 = vpop.f32.mrb[81].mxu0  ;;  %v1379_v15 = vpop.f32.mrb[81].mxu1 }
 0x1b6   :  { %v1380_v31 = vadd.f32 %v1379_v15, %v2568_v52  ;;  %v1061_v6 = vpop.f32.mrb[82].mxu0  ;;  %v1947_v10 = vpop.f32.mrb[82].mxu1 }
 0x1b7   :  { %v1502_v14 = vsel %vm1442_vm1, %v1348_v59, -inf  ;;  %v1462_v51 = vsel %vm1442_vm1, %v1388_v43, -inf  ;;  %v1351_v55 = vadd.f32 %v1350_v29, %v1061_v6  ;;  %v1391_v5 = vadd.f32 %v1947_v10, %v2576_v0  ;;  %v1063_v30 = vpop.f32.mrb[83].mxu0  ;;  %v1382_v60 = vpop.f32.mrb[83].mxu1 }
 0x1b8   :  { %v2846_v52 = vmax.f32 %v3014_v61, %v1502_v14  ;;  %v1463_v22 = vmax.f32 %v1461_v57, %v1462_v51  ;;  %v1448_v39 = vsel %vm1442_vm1, %v1380_v31, -inf  ;;  %v1383_v47 = vadd.f32 %v1382_v60, %v2572_v56 }
 0x1b9   :  { %v1449_v62 = vmax.f32 %v2781_v11, %v1448_v39  ;;  %v1509_v3 = vsel %vm1442_vm1, %v1351_v55, -inf  ;;  %v1469_v29 = vsel %vm1442_vm1, %v1391_v5, -inf  ;;  %v3015_v59 = vmax.f32 %v2732_v37, %v2737_v19 }
 0x1ba   :  { %v1564_v0 = vadd.f32 %v2840_v17, %v1463_v22  ;;  %v1470_v46 = vmax.f32 %v1468_v1, %v1469_v29  ;;  %v1455_v9 = vsel %vm1442_vm1, %v1383_v47, -inf }
 0x1bb   :  { %v2857_v43 = vmax.f32 %v3015_v59, %v1509_v3  ;;  %v1562_v57 = vadd.f32 %v2840_v17, %v1449_v62  ;;  %v1456_v56 = vmax.f32 %v2787_v18, %v1455_v9 }
 0x1bc   :  { %v1580_v13 = vmax.f32 %v1564_v0, 0.0  ;;  %v1565_v11 = vadd.f32 %v2840_v17, %v1470_v46  ;;  %v1066_v15 = vpop.f32.mrb[84].mxu0  ;;  %v1950_v31 = vpop.f32.mrb[84].mxu1 }
 0x1bd   :  { %v1578_v6 = vmax.f32 %v1562_v57, 0.0  ;;  %v1563_v10 = vadd.f32 %v2840_v17, %v1456_v56  ;;  %v1356_v37 = vadd.f32 %v2797_v23, %v1066_v15  ;;  %v1404_v19 = vadd.f32 %v1950_v31, %v2586_v12  ;;  %v1068_v1 = vpop.f32.mrb[85].mxu0  ;;  %v1395_v14 = vpop.f32.mrb[85].mxu1 }
 0x1be   :  { %v1844_v51 = vpack.c.bf16 %v1580_v13, %v1580_v13  ;;  %v1581_v55 = vmax.f32 %v1565_v11, 0.0  ;;  %v1396_v5 = vadd.f32 %v1395_v14, %v2580_v4  ;;  %v1069_v18 = vpop.f32.mrb[86].mxu0  ;;  %v1951_v30 = vpop.f32.mrb[86].mxu1  ;;  %v3016_v23 = vmax.f32 %v2707_v63, %v2710_v21 }
 0x1bf   :  { %v1842_v60 = vpack.c.bf16 %v1578_v6, %v1578_v6  ;;  %v1579_v61 = vmax.f32 %v1563_v10, 0.0  ;;  %v1516_v22 = vsel %vm1442_vm1, %v1356_v37, -inf  ;;  %v1490_v39 = vsel %vm1442_vm1, %v1404_v19, -inf  ;;  %v1071_v47 = vpop.f32.mrb[87].mxu0  ;;  %v1398_v62 = vpop.f32.mrb[87].mxu1 }
 0x1c0   :  { %1661 = vst.msk [vmem:[%s3003_s3 + $0x8] sm:$0xf] %vm1658_vm2, %v1844_v51  ;;  %v1845_v12 = vpack.c.bf16 %v1581_v55, %v1581_v55  ;;  %v1517_v4 = vmax.f32 %v3016_v23, %v1516_v22  ;;  %v1491_v3 = vmax.f32 %v2825_v53, %v1490_v39  ;;  %v1476_v29 = vsel %vm1442_vm1, %v1396_v5, -inf }
 0x1c1   :  { %1659 = vst.msk [vmem:[%s3003_s3] sm:$0xf] %vm1658_vm2, %v1842_v60  ;;  %v1843_v0 = vpack.c.bf16 %v1579_v61, %v1579_v61  ;;  %v1477_v59 = vmax.f32 %v2805_v7, %v1476_v29  ;;  %v1359_v46 = vadd.f32 %v2799_v25, %v1069_v18  ;;  %v1407_v9 = vadd.f32 %v1951_v30, %v2588_v16 }
 0x1c2   :  { %1662 = vst.msk [vmem:[%s3003_s3 + $0xc] sm:$0xf] %vm1658_vm2, %v1845_v12  ;;  %v1568_v63 = vadd.f32 %v2840_v17, %v1491_v3  ;;  %v1399_v21 = vadd.f32 %v1398_v62, %v2584_v8  ;;  %v3017_v57 = vmax.f32 %v2723_v33, %v2728_v50 }
 0x1c3   :  { %1660 = vst.msk [vmem:[%s3003_s3 + $0x4] sm:$0xf] %vm1658_vm2, %v1843_v0  ;;  %v1566_v7 = vadd.f32 %v2840_v17, %v1477_v59  ;;  %v1523_v25 = vsel %vm1442_vm1, %v1359_v46, -inf  ;;  %v1497_v16 = vsel %vm1442_vm1, %v1407_v9, -inf }
 0x1c4   :  { %v1584_v53 = vmax.f32 %v1568_v63, 0.0  ;;  %v1524_v56 = vmax.f32 %v3017_v57, %v1523_v25  ;;  %v1498_v13 = vmax.f32 %v2831_v35, %v1497_v16  ;;  %v1483_v8 = vsel %vm1442_vm1, %v1399_v21, -inf  ;;  %v1074_v11 = vpop.f32.mrb[88].mxu0  ;;  %v1954_v15 = vpop.f32.mrb[88].mxu1 }
 0x1c5   :  { %v1582_v31 = vmax.f32 %v1566_v7, 0.0  ;;  %v1484_v6 = vmax.f32 %v2811_v26, %v1483_v8  ;;  %v1364_v10 = vadd.f32 %v2815_v34, %v1074_v11  ;;  %v1420_v37 = vadd.f32 %v1954_v15, %v2596_v28  ;;  %v1076_v19 = vpop.f32.mrb[89].mxu0  ;;  %v1411_v1 = vpop.f32.mrb[89].mxu1 }
 0x1c6   :  { %v1848_v14 = vpack.c.bf16 %v1584_v53, %v1584_v53  ;;  %v1569_v51 = vadd.f32 %v2840_v17, %v1498_v13  ;;  %v1412_v33 = vadd.f32 %v1411_v1, %v2590_v20  ;;  %v1077_v50 = vpop.f32.mrb[90].mxu0  ;;  %v1955_v35 = vpop.f32.mrb[90].mxu1  ;;  %v3018_v20 = vmax.f32 %v2750_v41, %v2755_v38 }
 0x1c7   :  { %v1846_v55 = vpack.c.bf16 %v1582_v31, %v1582_v31  ;;  %v1567_v5 = vadd.f32 %v2840_v17, %v1484_v6  ;;  %v1530_v18 = vsel %vm1442_vm1, %v1364_v10, -inf  ;;  %v1518_v26 = vsel %vm1442_vm1, %v1420_v37, -inf  ;;  %v1079_v30 = vpop.f32.mrb[91].mxu0  ;;  %v1414_v34 = vpop.f32.mrb[91].mxu1 }
 0x1c8   :  { %1665 = vst.msk [vmem:[%s3003_s3 + $0x18] sm:$0xf] %vm1658_vm2, %v1848_v14  ;;  %v1585_v28 = vmax.f32 %v1569_v51, 0.0  ;;  %v1531_v60 = vmax.f32 %v3018_v20, %v1530_v18  ;;  %v1519_v61 = vmax.f32 %v1517_v4, %v1518_v26  ;;  %v1504_v22 = vsel %vm1442_vm1, %v1412_v33, -inf }
 0x1c9   :  { %1663 = vst.msk [vmem:[%s3003_s3 + $0x10] sm:$0xf] %vm1658_vm2, %v1846_v55  ;;  %v1583_v39 = vmax.f32 %v1567_v5, 0.0  ;;  %v1505_v47 = vmax.f32 %v2846_v52, %v1504_v22  ;;  %v1367_v62 = vadd.f32 %v2820_v49, %v1077_v50  ;;  %v1423_v12 = vadd.f32 %v1955_v35, %v2598_v32  ;;  %v3021_v55 = vld [vmem:[#allocation2_spill] sm:$0xff] }
 0x1ca   :  { %v1849_v23 = vpack.c.bf16 %v1585_v28, %v1585_v28  ;;  %v1572_v3 = vadd.f32 %v2840_v17, %v1519_v61  ;;  %v1415_v41 = vadd.f32 %v1414_v34, %v2594_v24  ;;  %v3019_v32 = vmax.f32 %v2768_v54, %v2773_v2 }
 0x1cb   :  { %v1847_v38 = vpack.c.bf16 %v1583_v39, %v1583_v39  ;;  %v1570_v4 = vadd.f32 %v2840_v17, %v1505_v47  ;;  %v1537_v29 = vsel %vm1442_vm1, %v1367_v62, -inf  ;;  %v1525_v0 = vsel %vm1442_vm1, %v1423_v12, -inf }
 0x1cc   :  { %1666 = vst.msk [vmem:[%s3003_s3 + $0x1c] sm:$0xf] %vm1658_vm2, %v1849_v23  ;;  %v1588_v49 = vmax.f32 %v1572_v3, 0.0  ;;  %v1538_v52 = vmax.f32 %v3019_v32, %v1537_v29  ;;  %v1526_v59 = vmax.f32 %v1524_v56, %v1525_v0  ;;  %v1511_v24 = vsel %vm1442_vm1, %v1415_v41, -inf  ;;  %v1082_v46 = vpop.f32.mrb[92].mxu0  ;;  %v1958_v9 = vpop.f32.mrb[92].mxu1 }
 0x1cd   :  { %1664 = vst.msk [vmem:[%s3003_s3 + $0x14] sm:$0xf] %vm1658_vm2, %v1847_v38  ;;  %v1586_v63 = vmax.f32 %v1570_v4, 0.0  ;;  %v1512_v21 = vmax.f32 %v2857_v43, %v1511_v24  ;;  %v1372_v7 = vadd.f32 %v2813_v42, %v1082_v46  ;;  %v1436_v25 = vadd.f32 %v1958_v9, %v2604_v44  ;;  %v1084_v16 = vpop.f32.mrb[93].mxu0  ;;  %v1427_v54 = vpop.f32.mrb[93].mxu1 }
 0x1ce   :  { %v1852_v2 = vpack.c.bf16 %v1588_v49, %v1588_v49  ;;  %v1573_v53 = vadd.f32 %v2840_v17, %v1526_v59  ;;  %v1428_v57 = vadd.f32 %v1427_v54, %v2600_v36  ;;  %v1085_v56 = vpop.f32.mrb[94].mxu0  ;;  %v1959_v13 = vpop.f32.mrb[94].mxu1  ;;  %v3020_v36 = vmax.f32 %v2743_v45, %v2746_v27 }
 0x1cf   :  { %v1850_v8 = vpack.c.bf16 %v1586_v63, %v1586_v63  ;;  %v1571_v11 = vadd.f32 %v2840_v17, %v1512_v21  ;;  %v1544_v15 = vsel %vm1442_vm1, %v1372_v7, -inf  ;;  %v1546_v43 = vsel %vm1442_vm1, %v1436_v25, -inf  ;;  %v1087_v31 = vpop.f32.mrb[95].mxu0  ;;  %v1430_v42 = vpop.f32.mrb[95].mxu1 }
 0x1d0   :  { %1669 = vst.msk [vmem:[%s3003_s3 + $0x28] sm:$0xf] %vm1658_vm2, %v1852_v2  ;;  %v1589_v44 = vmax.f32 %v1573_v53, 0.0  ;;  %v1545_v6 = vmax.f32 %v3020_v36, %v1544_v15  ;;  %v1532_v10 = vsel %vm1442_vm1, %v1428_v57, -inf  ;;  %v1375_v37 = vadd.f32 %v2817_v58, %v1085_v56  ;;  %v3022_v58 = vld [vmem:[#allocation3_spill] sm:$0xff] }
 0x1d1   :  { %1667 = vst.msk [vmem:[%s3003_s3 + $0x20] sm:$0xf] %vm1658_vm2, %v1850_v8  ;;  %v1587_v19 = vmax.f32 %v1571_v11, 0.0  ;;  %v1533_v1 = vmax.f32 %v1531_v60, %v1532_v10  ;;  %v1439_v14 = vadd.f32 %v1959_v13, %v2606_v48  ;;  %v1431_v51 = vadd.f32 %v1430_v42, %v2602_v40 }
 0x1d2   :  { %v1853_v33 = vpack.c.bf16 %v1589_v44, %v1589_v44  ;;  %v1547_v50 = vmax.f32 %v1545_v6, %v1546_v43  ;;  %v1551_v27 = vsel %vm1442_vm1, %v1375_v37, -inf  ;;  %v3023_v5 = vmax.f32 %v3021_v55, %v3022_v58 }
 0x1d3   :  { %v1851_v45 = vpack.c.bf16 %v1587_v19, %v1587_v19  ;;  %v1574_v35 = vadd.f32 %v2840_v17, %v1533_v1  ;;  %v1553_v40 = vsel %vm1442_vm1, %v1439_v14, -inf  ;;  %v1539_v26 = vsel %vm1442_vm1, %v1431_v51, -inf }
 0x1d4   :  { %v1552_v18 = vmax.f32 %v3023_v5, %v1551_v27  ;;  %1670 = vst.msk [vmem:[%s3003_s3 + $0x2c] sm:$0xf] %vm1658_vm2, %v1853_v33  ;;  %v1576_v48 = vadd.f32 %v2840_v17, %v1547_v50  ;;  %v1540_v28 = vmax.f32 %v1538_v52, %v1539_v26 }
 0x1d5   :  { %1668 = vst.msk [vmem:[%s3003_s3 + $0x24] sm:$0xf] %vm1658_vm2, %v1851_v45  ;;  %v1590_v30 = vmax.f32 %v1574_v35, 0.0 }
 0x1d6   :  { %v1554_v34 = vmax.f32 %v1552_v18, %v1553_v40  ;;  %v1592_v20 = vmax.f32 %v1576_v48, 0.0  ;;  %v1575_v22 = vadd.f32 %v2840_v17, %v1540_v28 }
 0x1d7   :  { %v1854_v60 = vpack.c.bf16 %v1590_v30, %v1590_v30 }
 0x1d8   :  { %v1577_v61 = vadd.f32 %v2840_v17, %v1554_v34  ;;  %v1856_v39 = vpack.c.bf16 %v1592_v20, %v1592_v20  ;;  %v1591_v62 = vmax.f32 %v1575_v22, 0.0 }
 0x1d9   :  { %1671 = vst.msk [vmem:[%s3003_s3 + $0x30] sm:$0xf] %vm1658_vm2, %v1854_v60 }
 0x1da   :  { %v1593_v47 = vmax.f32 %v1577_v61, 0.0  ;;  %1673 = vst.msk [vmem:[%s3003_s3 + $0x38] sm:$0xf] %vm1658_vm2, %v1856_v39  ;;  %v1855_v23 = vpack.c.bf16 %v1591_v62, %v1591_v62 }
 0x1dc   :  { %v1857_v12 = vpack.c.bf16 %v1593_v47, %v1593_v47  ;;  %1672 = vst.msk [vmem:[%s3003_s3 + $0x34] sm:$0xf] %vm1658_vm2, %v1855_v23 }
 0x1de   :  { %1674 = vst.msk [vmem:[%s3003_s3 + $0x3c] sm:$0xf] %vm1658_vm2, %v1857_v12 }

// kernel: cifarnet_forward.5
= control target key start
LH: loop header
LB: loop body
LE: loop exit
PB: predicated region body
PF: predicated region fallthrough
CT: control target
= control target key end

     0   :  { %v540_v36 = vlaneseq  ;;  %v5618_v37 = vmov 1966171168   ;;  %s7415_s0 = inlined_call_operand.vmem [shape: bf16[2,4096], index: 0, kind: input, shape index: {}]   ;;  %s7416_s1 = inlined_call_operand.vmem [shape: bf16[4096,256], index: 1, kind: input, shape index: {}]   ;;  %s7417_s2 = inlined_call_operand.vmem [shape: f32[1,256], index: 2, kind: input, shape index: {}]   ;;  %s7418_s3 = inlined_call_operand.vmem [shape: bf16[256,10], index: 3, kind: input, shape index: {}]   ;;  %s7419_s4 = inlined_call_operand.vmem [shape: f32[1,10], index: 4, kind: input, shape index: {}]   ;;  %s7420_s5 = inlined_call_operand.hbm [shape: f32[2,10], index: 5, kind: output, shape index: {}]  }
   0x1   :  { %v4806_v0 = vld [vmem:[%s7416_s1 + $0x4] ss:$8 sps:$4 sm:$0xff]   ;;  %v4810_v2 = vld [vmem:[%s7416_s1] ss:$8 sps:$4 sm:$0xff]   ;;  %v4812_v4 = vld [vmem:[%s7416_s1 + $0x14] ss:$8 sps:$4 sm:$0xff]   ;;  %v556_v38 = vunpack.c.l.s4 %v5618_v37 }
   0x2   :  { %v4808_v1 = vld [vmem:[%s7416_s1 + $0x804] ss:$8 sps:$4 sm:$0xff]   ;;  %3342 = vmatprep.subr.bf16.mxu1 %v4806_v0  ;;  %v4811_v3 = vld [vmem:[%s7416_s1 + $0x800] ss:$8 sps:$4 sm:$0xff]   ;;  %v4814_v5 = vld [vmem:[%s7416_s1 + $0x814] ss:$8 sps:$4 sm:$0xff]  }
   0x3   :  { %3670 = vmatprep.subr.bf16.mxu0 %v4808_v1  ;;  %3343 = vmatpush1.bf16.msra.mxu1 %v4810_v2  ;;  %v4816_v6 = vld [vmem:[%s7416_s1 + $0x10] ss:$8 sps:$4 sm:$0xff]   ;;  %v4818_v8 = vld [vmem:[%s7416_s1 + $0x24] ss:$8 sps:$4 sm:$0xff]   ;;  %v4822_v10 = vld [vmem:[%s7416_s1 + $0x20] ss:$8 sps:$4 sm:$0xff]   ;;  %v557_v43 = vunpack.c.0.s8 %v556_v38 }
   0x4   :  { %3671 = vmatpush1.bf16.msra.mxu0 %v4811_v3  ;;  %3344 = vmatprep.subr.bf16.mxu1 %v4812_v4  ;;  %v4817_v7 = vld [vmem:[%s7416_s1 + $0x810] ss:$8 sps:$4 sm:$0xff]   ;;  %v4820_v9 = vld [vmem:[%s7416_s1 + $0x824] ss:$8 sps:$4 sm:$0xff]   ;;  %v4823_v11 = vld [vmem:[%s7416_s1 + $0x820] ss:$8 sps:$4 sm:$0xff]  }
   0x5   :  { %3672 = vmatprep.subr.bf16.mxu0 %v4814_v5  ;;  %v4824_v12 = vld [vmem:[%s7416_s1 + $0x34] ss:$8 sps:$4 sm:$0xff]   ;;  %v4828_v14 = vld [vmem:[%s7416_s1 + $0x30] ss:$8 sps:$4 sm:$0xff]   ;;  %v4830_v16 = vld [vmem:[%s7416_s1 + $0x44] ss:$8 sps:$4 sm:$0xff]  }
   0x6   :  { %v4826_v13 = vld [vmem:[%s7416_s1 + $0x834] ss:$8 sps:$4 sm:$0xff]   ;;  %v4829_v15 = vld [vmem:[%s7416_s1 + $0x830] ss:$8 sps:$4 sm:$0xff]   ;;  %v4832_v17 = vld [vmem:[%s7416_s1 + $0x844] ss:$8 sps:$4 sm:$0xff]  }
   0x7   :  { %3345 = vmatpush1.bf16.msra.mxu1 %v4816_v6  ;;  %v4834_v18 = vld [vmem:[%s7416_s1 + $0x40] ss:$8 sps:$4 sm:$0xff]   ;;  %v4836_v20 = vld [vmem:[%s7416_s1 + $0x54] ss:$8 sps:$4 sm:$0xff]   ;;  %v4840_v22 = vld [vmem:[%s7416_s1 + $0x50] ss:$8 sps:$4 sm:$0xff]  }
   0x8   :  { %3673 = vmatpush1.bf16.msra.mxu0 %v4817_v7  ;;  %3346 = vmatprep.subr.bf16.mxu1 %v4818_v8  ;;  %v4835_v19 = vld [vmem:[%s7416_s1 + $0x840] ss:$8 sps:$4 sm:$0xff]   ;;  %v4838_v21 = vld [vmem:[%s7416_s1 + $0x854] ss:$8 sps:$4 sm:$0xff]   ;;  %v4841_v23 = vld [vmem:[%s7416_s1 + $0x850] ss:$8 sps:$4 sm:$0xff]  }
   0x9   :  { %3674 = vmatprep.subr.bf16.mxu0 %v4820_v9  ;;  %v4842_v24 = vld [vmem:[%s7416_s1 + $0x64] ss:$8 sps:$4 sm:$0xff]   ;;  %v4846_v26 = vld [vmem:[%s7416_s1 + $0x60] ss:$8 sps:$4 sm:$0xff]   ;;  %v4848_v28 = vld [vmem:[%s7416_s1 + $0x74] ss:$8 sps:$4 sm:$0xff]  }
   0xa   :  { %v4844_v25 = vld [vmem:[%s7416_s1 + $0x864] ss:$8 sps:$4 sm:$0xff]   ;;  %v4847_v27 = vld [vmem:[%s7416_s1 + $0x860] ss:$8 sps:$4 sm:$0xff]   ;;  %v4850_v29 = vld [vmem:[%s7416_s1 + $0x874] ss:$8 sps:$4 sm:$0xff]  }
   0xb   :  { %3347 = vmatpush1.bf16.msra.mxu1 %v4822_v10  ;;  %v4852_v30 = vld [vmem:[%s7416_s1 + $0x70] ss:$8 sps:$4 sm:$0xff]   ;;  %v4854_v32 = vld [vmem:[%s7416_s1 + $0x84] ss:$8 sps:$4 sm:$0xff]   ;;  %v4858_v34 = vld [vmem:[%s7416_s1 + $0x80] ss:$8 sps:$4 sm:$0xff]  }
   0xc   :  { %3675 = vmatpush1.bf16.msra.mxu0 %v4823_v11  ;;  %3348 = vmatprep.subr.bf16.mxu1 %v4824_v12  ;;  %v4853_v31 = vld [vmem:[%s7416_s1 + $0x870] ss:$8 sps:$4 sm:$0xff]   ;;  %v4856_v33 = vld [vmem:[%s7416_s1 + $0x884] ss:$8 sps:$4 sm:$0xff]   ;;  %v4859_v35 = vld [vmem:[%s7416_s1 + $0x880] ss:$8 sps:$4 sm:$0xff]  }
   0xd   :  { %3676 = vmatprep.subr.bf16.mxu0 %v4826_v13  ;;  %v4860_v39 = vld [vmem:[%s7416_s1 + $0x94] ss:$8 sps:$4 sm:$0xff]   ;;  %v4864_v41 = vld [vmem:[%s7416_s1 + $0x90] ss:$8 sps:$4 sm:$0xff]   ;;  %v5767_v42 = vshrl.u32 %v540_v36, 7  ;;  %v5796_v52 = vld [vmem:[%s7415_s0] sm:$0xff] }
   0xe   :  { %v4862_v40 = vld [vmem:[%s7416_s1 + $0x894] ss:$8 sps:$4 sm:$0xff]   ;;  %v4865_v44 = vld [vmem:[%s7416_s1 + $0x890] ss:$8 sps:$4 sm:$0xff]   ;;  %v4866_v45 = vld [vmem:[%s7416_s1 + $0xa4] ss:$8 sps:$4 sm:$0xff]  }
   0xf   :  { %3349 = vmatpush1.bf16.msra.mxu1 %v4828_v14  ;;  %v4868_v46 = vld [vmem:[%s7416_s1 + $0x8a4] ss:$8 sps:$4 sm:$0xff]   ;;  %v4870_v47 = vld [vmem:[%s7416_s1 + $0xa0] ss:$8 sps:$4 sm:$0xff]   ;;  %v5785_v49 = vsub.s32 %v557_v43, %v5767_v42  ;;  %v4872_v50 = vld [vmem:[%s7416_s1 + $0xb4] ss:$8 sps:$4 sm:$0xff]  }
  0x10   :  { %3677 = vmatpush1.bf16.msra.mxu0 %v4829_v15  ;;  %3350 = vmatprep.subr.bf16.mxu1 %v4830_v16  ;;  %v4871_v48 = vld [vmem:[%s7416_s1 + $0x8a0] ss:$8 sps:$4 sm:$0xff]   ;;  %v4874_v51 = vld [vmem:[%s7416_s1 + $0x8b4] ss:$8 sps:$4 sm:$0xff]   ;;  %v4876_v53 = vld [vmem:[%s7416_s1 + $0xb0] ss:$8 sps:$4 sm:$0xff]  }
  0x11   :  { %3678 = vmatprep.subr.bf16.mxu0 %v4832_v17  ;;  %v561_v54 = vrot.slane %v5796_v52, %v5785_v49  ;;  %v4877_v55 = vld [vmem:[%s7416_s1 + $0x8b0] ss:$8 sps:$4 sm:$0xff]   ;;  %v4878_v57 = vld [vmem:[%s7416_s1 + $0xc4] ss:$8 sps:$4 sm:$0xff]   ;;  %v4882_v63 = vld [vmem:[%s7416_s1 + $0xc0] ss:$8 sps:$4 sm:$0xff]  }
  0x12   :  { %v5809_v56 = vld [vmem:[%s7415_s0 + $0x10] sm:$0xff]  ;;  %v4880_v58 = vld [vmem:[%s7416_s1 + $0x8c4] ss:$8 sps:$4 sm:$0xff]   ;;  %v4883_v0 = vld [vmem:[%s7416_s1 + $0x8c0] ss:$8 sps:$4 sm:$0xff]  }
  0x13   :  { %3351 = vmatpush1.bf16.msra.mxu1 %v4834_v18  ;;  %v569_v59 = vcombine.high %v561_v54, %v561_v54  ;;  %v659_v60 = vrot.slane %v5809_v56, %v5785_v49  ;;  %v4884_v1 = vld [vmem:[%s7416_s1 + $0xd4] ss:$8 sps:$4 sm:$0xff]   ;;  %v4888_v4 = vld [vmem:[%s7416_s1 + $0xd0] ss:$8 sps:$4 sm:$0xff]   ;;  %v4890_v6 = vld [vmem:[%s7416_s1 + $0xe4] ss:$8 sps:$4 sm:$0xff]   ;;  %v5870_v16 = vrot.slane %v561_v54, %v5785_v49 }
  0x14   :  { %3679 = vmatpush1.bf16.msra.mxu0 %v4835_v19  ;;  %3352 = vmatprep.subr.bf16.mxu1 %v4836_v20  ;;  %v4886_v2 = vld [vmem:[%s7416_s1 + $0x8d4] ss:$8 sps:$4 sm:$0xff]   ;;  %v4889_v5 = vld [vmem:[%s7416_s1 + $0x8d0] ss:$8 sps:$4 sm:$0xff]   ;;  %v4892_v7 = vld [vmem:[%s7416_s1 + $0x8e4] ss:$8 sps:$4 sm:$0xff]  }
  0x15   :  { %3680 = vmatprep.subr.bf16.mxu0 %v4838_v21  ;;  %v591_v61 = vrot.slane %v569_v59, %v5785_v49  ;;  %v667_v62 = vcombine.high %v659_v60, %v659_v60  ;;  %v4894_v8 = vld [vmem:[%s7416_s1 + $0xe0] ss:$8 sps:$4 sm:$0xff]   ;;  %v4896_v10 = vld [vmem:[%s7416_s1 + $0xf4] ss:$8 sps:$4 sm:$0xff]   ;;  %v4900_v12 = vld [vmem:[%s7416_s1 + $0xf0] ss:$8 sps:$4 sm:$0xff]   ;;  %v5873_v17 = vrot.slane %v659_v60, %v5785_v49 }
  0x16   :  { %v4895_v9 = vld [vmem:[%s7416_s1 + $0x8e0] ss:$8 sps:$4 sm:$0xff]   ;;  %v4898_v11 = vld [vmem:[%s7416_s1 + $0x8f4] ss:$8 sps:$4 sm:$0xff]   ;;  %v4901_v13 = vld [vmem:[%s7416_s1 + $0x8f0] ss:$8 sps:$4 sm:$0xff]  }
  0x17   :  { %3353 = vmatpush1.bf16.msra.mxu1 %v4840_v22  ;;  %v689_v3 = vrot.slane %v667_v62, %v5785_v49  ;;  %3374 = vmatprep.mubr.bf16.mxu1 %v591_v61  ;;  %v4905_v14 = vld [vmem:[%s7416_s1 + $0x104] ss:$8 sps:$4 sm:$0xff]   ;;  %v4903_v18 = vld [vmem:[%s7416_s1 + $0x100] ss:$8 sps:$4 sm:$0xff]   ;;  %v4912_v20 = vld [vmem:[%s7416_s1 + $0x114] ss:$8 sps:$4 sm:$0xff]   ;;  %v601_v22 = vcombine.high %v591_v61, %v591_v61 }
  0x18   :  { %3681 = vmatpush1.bf16.msra.mxu0 %v4841_v23  ;;  %3354 = vmatprep.subr.bf16.mxu1 %v4842_v24  ;;  %v4909_v15 = vld [vmem:[%s7416_s1 + $0x904] ss:$8 sps:$4 sm:$0xff]   ;;  %v4907_v19 = vld [vmem:[%s7416_s1 + $0x900] ss:$8 sps:$4 sm:$0xff]   ;;  %v4915_v21 = vld [vmem:[%s7416_s1 + $0x914] ss:$8 sps:$4 sm:$0xff]  }
  0x19   :  { %3682 = vmatprep.subr.bf16.mxu0 %v4844_v25  ;;  %3702 = vmatprep.mubr.bf16.mxu0 %v689_v3  ;;  %v699_v23 = vcombine.high %v689_v3, %v689_v3  ;;  %v4910_v24 = vld [vmem:[%s7416_s1 + $0x110] ss:$8 sps:$4 sm:$0xff]   ;;  %v4928_v36 = vld [vmem:[%s7416_s1 + $0x140] ss:$8 sps:$4 sm:$0xff]   ;;  %v4936_v38 = vld [vmem:[%s7416_s1 + $0x154] ss:$8 sps:$4 sm:$0xff]  }
  0x1a   :  { %v4913_v25 = vld [vmem:[%s7416_s1 + $0x910] ss:$8 sps:$4 sm:$0xff]   ;;  %v4931_v37 = vld [vmem:[%s7416_s1 + $0x940] ss:$8 sps:$4 sm:$0xff]   ;;  %v4942_v43 = vld [vmem:[%s7416_s1 + $0x164] ss:$8 sps:$4 sm:$0xff]  }
  0x1b   :  { %3355 = vmatpush1.bf16.msra.mxu1 %v4846_v26  ;;  %v4918_v26 = vld [vmem:[%s7416_s1 + $0x124] ss:$8 sps:$4 sm:$0xff]   ;;  %v4963_v59 = vld [vmem:[%s7416_s1 + $0x994] ss:$8 sps:$4 sm:$0xff]   ;;  %v4958_v60 = vld [vmem:[%s7416_s1 + $0x190] ss:$8 sps:$4 sm:$0xff]  }
  0x1c   :  { %3683 = vmatpush1.bf16.msra.mxu0 %v4847_v27  ;;  %3356 = vmatprep.subr.bf16.mxu1 %v4848_v28  ;;  %v4921_v27 = vld [vmem:[%s7416_s1 + $0x924] ss:$8 sps:$4 sm:$0xff]   ;;  %v4916_v28 = vld [vmem:[%s7416_s1 + $0x120] ss:$8 sps:$4 sm:$0xff]   ;;  %v4961_v61 = vld [vmem:[%s7416_s1 + $0x990] ss:$8 sps:$4 sm:$0xff]  }
  0x1d   :  { %3684 = vmatprep.subr.bf16.mxu0 %v4850_v29  ;;  %v4919_v29 = vld [vmem:[%s7416_s1 + $0x920] ss:$8 sps:$4 sm:$0xff]   ;;  %v4957_v54 = vld [vmem:[%s7416_s1 + $0x984] ss:$8 sps:$4 sm:$0xff]   ;;  %v4975_v3 = vld [vmem:[%s7416_s1 + $0x9b4] ss:$8 sps:$4 sm:$0xff]  }
  0x1e   :  { %v4966_v62 = vld [vmem:[%s7416_s1 + $0x1a4] ss:$8 sps:$4 sm:$0xff]  }
  0x1f   :  { %3357 = vmatpush1.bf16.msra.mxu1 %v4852_v30  ;;  %v4924_v30 = vld [vmem:[%s7416_s1 + $0x134] ss:$8 sps:$4 sm:$0xff]  }
  0x20   :  { %3685 = vmatpush1.bf16.msra.mxu0 %v4853_v31  ;;  %3358 = vmatprep.subr.bf16.mxu1 %v4854_v32  ;;  %v4927_v31 = vld [vmem:[%s7416_s1 + $0x934] ss:$8 sps:$4 sm:$0xff]   ;;  %v4922_v32 = vld [vmem:[%s7416_s1 + $0x130] ss:$8 sps:$4 sm:$0xff]  }
  0x21   :  { %3686 = vmatprep.subr.bf16.mxu0 %v4856_v33  ;;  %v4925_v33 = vld [vmem:[%s7416_s1 + $0x930] ss:$8 sps:$4 sm:$0xff]  }
  0x23   :  { %3359 = vmatpush1.bf16.msra.mxu1 %v4858_v34  ;;  %v4930_v34 = vld [vmem:[%s7416_s1 + $0x144] ss:$8 sps:$4 sm:$0xff]  }
  0x24   :  { %3687 = vmatpush1.bf16.msra.mxu0 %v4859_v35  ;;  %3360 = vmatprep.subr.bf16.mxu1 %v4860_v39  ;;  %v4933_v35 = vld [vmem:[%s7416_s1 + $0x944] ss:$8 sps:$4 sm:$0xff]   ;;  %v4939_v39 = vld [vmem:[%s7416_s1 + $0x954] ss:$8 sps:$4 sm:$0xff]  }
  0x25   :  { %3688 = vmatprep.subr.bf16.mxu0 %v4862_v40  ;;  %v4934_v40 = vld [vmem:[%s7416_s1 + $0x150] ss:$8 sps:$4 sm:$0xff]  }
  0x27   :  { %3361 = vmatpush1.bf16.msra.mxu1 %v4864_v41  ;;  %v4937_v41 = vld [vmem:[%s7416_s1 + $0x950] ss:$8 sps:$4 sm:$0xff]  }
  0x28   :  { %3689 = vmatpush1.bf16.msra.mxu0 %v4865_v44  ;;  %3362 = vmatprep.subr.bf16.mxu1 %v4866_v45  ;;  %v4945_v44 = vld [vmem:[%s7416_s1 + $0x964] ss:$8 sps:$4 sm:$0xff]   ;;  %v4940_v45 = vld [vmem:[%s7416_s1 + $0x160] ss:$8 sps:$4 sm:$0xff]  }
  0x29   :  { %3690 = vmatprep.subr.bf16.mxu0 %v4868_v46  ;;  %v4943_v46 = vld [vmem:[%s7416_s1 + $0x960] ss:$8 sps:$4 sm:$0xff]  }
  0x2b   :  { %3363 = vmatpush1.bf16.msra.mxu1 %v4870_v47  ;;  %v4948_v47 = vld [vmem:[%s7416_s1 + $0x174] ss:$8 sps:$4 sm:$0xff]  }
  0x2c   :  { %3691 = vmatpush1.bf16.msra.mxu0 %v4871_v48  ;;  %3364 = vmatprep.subr.bf16.mxu1 %v4872_v50  ;;  %v4951_v48 = vld [vmem:[%s7416_s1 + $0x974] ss:$8 sps:$4 sm:$0xff]   ;;  %v4946_v50 = vld [vmem:[%s7416_s1 + $0x170] ss:$8 sps:$4 sm:$0xff]  }
  0x2d   :  { %3692 = vmatprep.subr.bf16.mxu0 %v4874_v51  ;;  %v4949_v51 = vld [vmem:[%s7416_s1 + $0x970] ss:$8 sps:$4 sm:$0xff]  }
  0x2f   :  { %3365 = vmatpush1.bf16.msra.mxu1 %v4876_v53  ;;  %v4954_v53 = vld [vmem:[%s7416_s1 + $0x184] ss:$8 sps:$4 sm:$0xff]  }
  0x30   :  { %3693 = vmatpush1.bf16.msra.mxu0 %v4877_v55  ;;  %3366 = vmatprep.subr.bf16.mxu1 %v4878_v57  ;;  %v4952_v55 = vld [vmem:[%s7416_s1 + $0x180] ss:$8 sps:$4 sm:$0xff]  }
  0x31   :  { %3694 = vmatprep.subr.bf16.mxu0 %v4880_v58  ;;  %v4955_v57 = vld [vmem:[%s7416_s1 + $0x980] ss:$8 sps:$4 sm:$0xff]   ;;  %v4960_v58 = vld [vmem:[%s7416_s1 + $0x194] ss:$8 sps:$4 sm:$0xff]  }
  0x33   :  { %3367 = vmatpush1.bf16.msra.mxu1 %v4882_v63  ;;  %v4969_v63 = vld [vmem:[%s7416_s1 + $0x9a4] ss:$8 sps:$4 sm:$0xff]  }
  0x34   :  { %3695 = vmatpush1.bf16.msra.mxu0 %v4883_v0  ;;  %3368 = vmatprep.subr.bf16.mxu1 %v4884_v1  ;;  %v4964_v0 = vld [vmem:[%s7416_s1 + $0x1a0] ss:$8 sps:$4 sm:$0xff]  }
  0x35   :  { %3696 = vmatprep.subr.bf16.mxu0 %v4886_v2  ;;  %v4967_v1 = vld [vmem:[%s7416_s1 + $0x9a0] ss:$8 sps:$4 sm:$0xff]   ;;  %v4972_v2 = vld [vmem:[%s7416_s1 + $0x1b4] ss:$8 sps:$4 sm:$0xff]  }
  0x37   :  { %3369 = vmatpush1.bf16.msra.mxu1 %v4888_v4  ;;  %v4970_v4 = vld [vmem:[%s7416_s1 + $0x1b0] ss:$8 sps:$4 sm:$0xff]  }
  0x38   :  { %3697 = vmatpush1.bf16.msra.mxu0 %v4889_v5  ;;  %3370 = vmatprep.subr.bf16.mxu1 %v4890_v6  ;;  %v4973_v5 = vld [vmem:[%s7416_s1 + $0x9b0] ss:$8 sps:$4 sm:$0xff]   ;;  %v4978_v6 = vld [vmem:[%s7416_s1 + $0x1c4] ss:$8 sps:$4 sm:$0xff]  }
  0x39   :  { %3698 = vmatprep.subr.bf16.mxu0 %v4892_v7  ;;  %v4981_v7 = vld [vmem:[%s7416_s1 + $0x9c4] ss:$8 sps:$4 sm:$0xff]  }
  0x3b   :  { %3371 = vmatpush1.bf16.msra.mxu1 %v4894_v8  ;;  %v4976_v8 = vld [vmem:[%s7416_s1 + $0x1c0] ss:$8 sps:$4 sm:$0xff]  }
  0x3c   :  { %3699 = vmatpush1.bf16.msra.mxu0 %v4895_v9  ;;  %3372 = vmatprep.subr.bf16.mxu1 %v4896_v10  ;;  %v4979_v9 = vld [vmem:[%s7416_s1 + $0x9c0] ss:$8 sps:$4 sm:$0xff]   ;;  %v4984_v10 = vld [vmem:[%s7416_s1 + $0x1d4] ss:$8 sps:$4 sm:$0xff]  }
  0x3d   :  { %3700 = vmatprep.subr.bf16.mxu0 %v4898_v11  ;;  %v4987_v11 = vld [vmem:[%s7416_s1 + $0x9d4] ss:$8 sps:$4 sm:$0xff]  }
  0x3f   :  { %3373 = vmatpush1.bf16.msra.mxu1 %v4900_v12  ;;  %v4982_v12 = vld [vmem:[%s7416_s1 + $0x1d0] ss:$8 sps:$4 sm:$0xff]  }
  0x40   :  { %3701 = vmatpush1.bf16.msra.mxu0 %v4901_v13  ;;  %3383 = vmatprep.subr.bf16.mxu1 %v4905_v14  ;;  %v4985_v13 = vld [vmem:[%s7416_s1 + $0x9d0] ss:$8 sps:$4 sm:$0xff]   ;;  %v4990_v14 = vld [vmem:[%s7416_s1 + $0x1e4] ss:$8 sps:$4 sm:$0xff]  }
  0x41   :  { %3711 = vmatprep.subr.bf16.mxu0 %v4909_v15  ;;  %v4993_v15 = vld [vmem:[%s7416_s1 + $0x9e4] ss:$8 sps:$4 sm:$0xff]  }
  0x42   :  { %3375 = vmatmul.mubr.bf16.vlgmr.msra.gmra.mrb[0].mxu1 %v5870_v16 }
  0x43   :  { %3703 = vmatmul.mubr.bf16.vlgmr.msra.gmra.mrb[0].mxu0 %v5873_v17  ;;  %3384 = vmatpush1.bf16.msra.mxu1 %v4903_v18  ;;  %v554_v18 = vcombine.high %v5796_v52, %v5796_v52  ;;  %v4999_v52 = vld [vmem:[%s7416_s1 + $0x9f4] ss:$8 sps:$4 sm:$0xff]  }
  0x44   :  { %3712 = vmatpush1.bf16.msra.mxu0 %v4907_v19  ;;  %3385 = vmatprep.subr.bf16.mxu1 %v4912_v20  ;;  %v652_v19 = vcombine.high %v5809_v56, %v5809_v56  ;;  %v4988_v20 = vld [vmem:[%s7416_s1 + $0x1e0] ss:$8 sps:$4 sm:$0xff]  }
  0x45   :  { %3713 = vmatprep.subr.bf16.mxu0 %v4915_v21  ;;  %3415 = vmatprep.mubr.bf16.mxu1 %v601_v22  ;;  %v4991_v21 = vld [vmem:[%s7416_s1 + $0x9e0] ss:$8 sps:$4 sm:$0xff]   ;;  %v4996_v22 = vld [vmem:[%s7416_s1 + $0x1f4] ss:$8 sps:$4 sm:$0xff]   ;;  %v6062_v56 = vrot.slane %v554_v18, %v5785_v49  ;;  %v5066_v18 = vld [vmem:[%s7416_s1 + $0x2b0] ss:$8 sps:$4 sm:$0xff]  }
  0x46   :  { %3743 = vmatprep.mubr.bf16.mxu0 %v699_v23  ;;  %v6065_v23 = vrot.slane %v652_v19, %v5785_v49  ;;  %v5069_v19 = vld [vmem:[%s7416_s1 + $0xab0] ss:$8 sps:$4 sm:$0xff]  }
  0x47   :  { %3386 = vmatpush1.bf16.msra.mxu1 %v4910_v24  ;;  %v4994_v24 = vld [vmem:[%s7416_s1 + $0x1f0] ss:$8 sps:$4 sm:$0xff]  }
  0x48   :  { %3714 = vmatpush1.bf16.msra.mxu0 %v4913_v25  ;;  %3387 = vmatprep.subr.bf16.mxu1 %v4918_v26  ;;  %v4997_v25 = vld [vmem:[%s7416_s1 + $0x9f0] ss:$8 sps:$4 sm:$0xff]   ;;  %v5002_v26 = vld [vmem:[%s7416_s1 + $0x204] ss:$8 sps:$4 sm:$0xff]  }
  0x49   :  { %3715 = vmatprep.subr.bf16.mxu0 %v4921_v27  ;;  %v5005_v27 = vld [vmem:[%s7416_s1 + $0xa04] ss:$8 sps:$4 sm:$0xff]  }
  0x4b   :  { %3388 = vmatpush1.bf16.msra.mxu1 %v4916_v28  ;;  %v570_v28 = vcombine.high %v6062_v56, %v6062_v56 }
  0x4c   :  { %3716 = vmatpush1.bf16.msra.mxu0 %v4919_v29  ;;  %3389 = vmatprep.subr.bf16.mxu1 %v4924_v30  ;;  %v668_v29 = vcombine.high %v6065_v23, %v6065_v23  ;;  %v599_v30 = vcombine.high %v5870_v16, %v5870_v16  ;;  %v5011_v16 = vld [vmem:[%s7416_s1 + $0xa14] ss:$8 sps:$4 sm:$0xff]  }
  0x4d   :  { %3717 = vmatprep.subr.bf16.mxu0 %v4927_v31  ;;  %v697_v31 = vcombine.high %v5873_v17, %v5873_v17  ;;  %v6100_v17 = vrot.slane %v570_v28, %v5785_v49  ;;  %v5086_v28 = vld [vmem:[%s7416_s1 + $0x2e4] ss:$8 sps:$4 sm:$0xff]  }
  0x4f   :  { %3390 = vmatpush1.bf16.msra.mxu1 %v4922_v32  ;;  %v5000_v32 = vld [vmem:[%s7416_s1 + $0x200] ss:$8 sps:$4 sm:$0xff]  }
  0x50   :  { %3718 = vmatpush1.bf16.msra.mxu0 %v4925_v33  ;;  %3391 = vmatprep.subr.bf16.mxu1 %v4930_v34  ;;  %v5003_v33 = vld [vmem:[%s7416_s1 + $0xa00] ss:$8 sps:$4 sm:$0xff]   ;;  %v5008_v34 = vld [vmem:[%s7416_s1 + $0x214] ss:$8 sps:$4 sm:$0xff]  }
  0x51   :  { %3719 = vmatprep.subr.bf16.mxu0 %v4933_v35  ;;  %v6103_v35 = vrot.slane %v668_v29, %v5785_v49  ;;  %v5089_v29 = vld [vmem:[%s7416_s1 + $0xae4] ss:$8 sps:$4 sm:$0xff]  }
  0x53   :  { %3392 = vmatpush1.bf16.msra.mxu1 %v4928_v36  ;;  %v5006_v36 = vld [vmem:[%s7416_s1 + $0x210] ss:$8 sps:$4 sm:$0xff]  }
  0x54   :  { %3720 = vmatpush1.bf16.msra.mxu0 %v4931_v37  ;;  %3393 = vmatprep.subr.bf16.mxu1 %v4936_v38  ;;  %v5009_v37 = vld [vmem:[%s7416_s1 + $0xa10] ss:$8 sps:$4 sm:$0xff]   ;;  %v5014_v38 = vld [vmem:[%s7416_s1 + $0x224] ss:$8 sps:$4 sm:$0xff]  }
  0x55   :  { %3721 = vmatprep.subr.bf16.mxu0 %v4939_v39  ;;  %v5017_v39 = vld [vmem:[%s7416_s1 + $0xa24] ss:$8 sps:$4 sm:$0xff]  }
  0x57   :  { %3394 = vmatpush1.bf16.msra.mxu1 %v4934_v40  ;;  %v5012_v40 = vld [vmem:[%s7416_s1 + $0x220] ss:$8 sps:$4 sm:$0xff]  }
  0x58   :  { %3722 = vmatpush1.bf16.msra.mxu0 %v4937_v41  ;;  %3395 = vmatprep.subr.bf16.mxu1 %v4942_v43  ;;  %v5015_v41 = vld [vmem:[%s7416_s1 + $0xa20] ss:$8 sps:$4 sm:$0xff]   ;;  %v5020_v43 = vld [vmem:[%s7416_s1 + $0x234] ss:$8 sps:$4 sm:$0xff]  }
  0x59   :  { %3723 = vmatprep.subr.bf16.mxu0 %v4945_v44  ;;  %v5023_v44 = vld [vmem:[%s7416_s1 + $0xa34] ss:$8 sps:$4 sm:$0xff]  }
  0x5b   :  { %3396 = vmatpush1.bf16.msra.mxu1 %v4940_v45  ;;  %v5018_v45 = vld [vmem:[%s7416_s1 + $0x230] ss:$8 sps:$4 sm:$0xff]  }
  0x5c   :  { %3724 = vmatpush1.bf16.msra.mxu0 %v4943_v46  ;;  %3397 = vmatprep.subr.bf16.mxu1 %v4948_v47  ;;  %v5021_v46 = vld [vmem:[%s7416_s1 + $0xa30] ss:$8 sps:$4 sm:$0xff]   ;;  %v5026_v47 = vld [vmem:[%s7416_s1 + $0x244] ss:$8 sps:$4 sm:$0xff]  }
  0x5d   :  { %3725 = vmatprep.subr.bf16.mxu0 %v4951_v48  ;;  %v5029_v48 = vld [vmem:[%s7416_s1 + $0xa44] ss:$8 sps:$4 sm:$0xff]  }
  0x5f   :  { %3398 = vmatpush1.bf16.msra.mxu1 %v4946_v50  ;;  %v5024_v50 = vld [vmem:[%s7416_s1 + $0x240] ss:$8 sps:$4 sm:$0xff]  }
  0x60   :  { %3726 = vmatpush1.bf16.msra.mxu0 %v4949_v51  ;;  %3399 = vmatprep.subr.bf16.mxu1 %v4954_v53  ;;  %v5027_v51 = vld [vmem:[%s7416_s1 + $0xa40] ss:$8 sps:$4 sm:$0xff]   ;;  %v5032_v53 = vld [vmem:[%s7416_s1 + $0x254] ss:$8 sps:$4 sm:$0xff]  }
  0x61   :  { %3727 = vmatprep.subr.bf16.mxu0 %v4957_v54  ;;  %v5035_v54 = vld [vmem:[%s7416_s1 + $0xa54] ss:$8 sps:$4 sm:$0xff]  }
  0x63   :  { %3400 = vmatpush1.bf16.msra.mxu1 %v4952_v55  ;;  %v5030_v55 = vld [vmem:[%s7416_s1 + $0x250] ss:$8 sps:$4 sm:$0xff]  }
  0x64   :  { %3728 = vmatpush1.bf16.msra.mxu0 %v4955_v57  ;;  %3401 = vmatprep.subr.bf16.mxu1 %v4960_v58  ;;  %v5033_v57 = vld [vmem:[%s7416_s1 + $0xa50] ss:$8 sps:$4 sm:$0xff]   ;;  %v5038_v58 = vld [vmem:[%s7416_s1 + $0x264] ss:$8 sps:$4 sm:$0xff]  }
  0x65   :  { %3729 = vmatprep.subr.bf16.mxu0 %v4963_v59  ;;  %v5041_v59 = vld [vmem:[%s7416_s1 + $0xa64] ss:$8 sps:$4 sm:$0xff]  }
  0x67   :  { %3402 = vmatpush1.bf16.msra.mxu1 %v4958_v60  ;;  %v5036_v60 = vld [vmem:[%s7416_s1 + $0x260] ss:$8 sps:$4 sm:$0xff]  }
  0x68   :  { %3730 = vmatpush1.bf16.msra.mxu0 %v4961_v61  ;;  %3403 = vmatprep.subr.bf16.mxu1 %v4966_v62  ;;  %v5039_v61 = vld [vmem:[%s7416_s1 + $0xa60] ss:$8 sps:$4 sm:$0xff]   ;;  %v5044_v62 = vld [vmem:[%s7416_s1 + $0x274] ss:$8 sps:$4 sm:$0xff]  }
  0x69   :  { %3731 = vmatprep.subr.bf16.mxu0 %v4969_v63  ;;  %v5047_v63 = vld [vmem:[%s7416_s1 + $0xa74] ss:$8 sps:$4 sm:$0xff]  }
  0x6b   :  { %3404 = vmatpush1.bf16.msra.mxu1 %v4964_v0  ;;  %v5042_v0 = vld [vmem:[%s7416_s1 + $0x270] ss:$8 sps:$4 sm:$0xff]  }
  0x6c   :  { %3732 = vmatpush1.bf16.msra.mxu0 %v4967_v1  ;;  %3405 = vmatprep.subr.bf16.mxu1 %v4972_v2  ;;  %v5045_v1 = vld [vmem:[%s7416_s1 + $0xa70] ss:$8 sps:$4 sm:$0xff]   ;;  %v5050_v2 = vld [vmem:[%s7416_s1 + $0x284] ss:$8 sps:$4 sm:$0xff]  }
  0x6d   :  { %3733 = vmatprep.subr.bf16.mxu0 %v4975_v3  ;;  %v5053_v3 = vld [vmem:[%s7416_s1 + $0xa84] ss:$8 sps:$4 sm:$0xff]  }
  0x6f   :  { %3406 = vmatpush1.bf16.msra.mxu1 %v4970_v4  ;;  %v5048_v4 = vld [vmem:[%s7416_s1 + $0x280] ss:$8 sps:$4 sm:$0xff]  }
  0x70   :  { %3734 = vmatpush1.bf16.msra.mxu0 %v4973_v5  ;;  %3407 = vmatprep.subr.bf16.mxu1 %v4978_v6  ;;  %v5051_v5 = vld [vmem:[%s7416_s1 + $0xa80] ss:$8 sps:$4 sm:$0xff]   ;;  %v5056_v6 = vld [vmem:[%s7416_s1 + $0x294] ss:$8 sps:$4 sm:$0xff]  }
  0x71   :  { %3735 = vmatprep.subr.bf16.mxu0 %v4981_v7  ;;  %v5059_v7 = vld [vmem:[%s7416_s1 + $0xa94] ss:$8 sps:$4 sm:$0xff]  }
  0x73   :  { %3408 = vmatpush1.bf16.msra.mxu1 %v4976_v8  ;;  %v5054_v8 = vld [vmem:[%s7416_s1 + $0x290] ss:$8 sps:$4 sm:$0xff]  }
  0x74   :  { %3736 = vmatpush1.bf16.msra.mxu0 %v4979_v9  ;;  %3409 = vmatprep.subr.bf16.mxu1 %v4984_v10  ;;  %v5057_v9 = vld [vmem:[%s7416_s1 + $0xa90] ss:$8 sps:$4 sm:$0xff]   ;;  %v5062_v10 = vld [vmem:[%s7416_s1 + $0x2a4] ss:$8 sps:$4 sm:$0xff]  }
  0x75   :  { %3737 = vmatprep.subr.bf16.mxu0 %v4987_v11  ;;  %v5065_v11 = vld [vmem:[%s7416_s1 + $0xaa4] ss:$8 sps:$4 sm:$0xff]  }
  0x77   :  { %3410 = vmatpush1.bf16.msra.mxu1 %v4982_v12  ;;  %v5060_v12 = vld [vmem:[%s7416_s1 + $0x2a0] ss:$8 sps:$4 sm:$0xff]  }
  0x78   :  { %3738 = vmatpush1.bf16.msra.mxu0 %v4985_v13  ;;  %3411 = vmatprep.subr.bf16.mxu1 %v4990_v14  ;;  %v5063_v13 = vld [vmem:[%s7416_s1 + $0xaa0] ss:$8 sps:$4 sm:$0xff]   ;;  %v5068_v14 = vld [vmem:[%s7416_s1 + $0x2b4] ss:$8 sps:$4 sm:$0xff]  }
  0x79   :  { %3739 = vmatprep.subr.bf16.mxu0 %v4993_v15  ;;  %v5071_v15 = vld [vmem:[%s7416_s1 + $0xab4] ss:$8 sps:$4 sm:$0xff]  }
  0x7b   :  { %3412 = vmatpush1.bf16.msra.mxu1 %v4988_v20  ;;  %v5074_v20 = vld [vmem:[%s7416_s1 + $0x2c4] ss:$8 sps:$4 sm:$0xff]  }
  0x7c   :  { %3740 = vmatpush1.bf16.msra.mxu0 %v4991_v21  ;;  %3413 = vmatprep.subr.bf16.mxu1 %v4996_v22  ;;  %v5077_v21 = vld [vmem:[%s7416_s1 + $0xac4] ss:$8 sps:$4 sm:$0xff]   ;;  %v5072_v22 = vld [vmem:[%s7416_s1 + $0x2c0] ss:$8 sps:$4 sm:$0xff]  }
  0x7d   :  { %3741 = vmatprep.subr.bf16.mxu0 %v4999_v52  ;;  %v5075_v52 = vld [vmem:[%s7416_s1 + $0xac0] ss:$8 sps:$4 sm:$0xff]  }
  0x7f   :  { %3414 = vmatpush1.bf16.msra.mxu1 %v4994_v24  ;;  %v5080_v24 = vld [vmem:[%s7416_s1 + $0x2d4] ss:$8 sps:$4 sm:$0xff]  }
  0x80   :  { %3742 = vmatpush1.bf16.msra.mxu0 %v4997_v25  ;;  %3424 = vmatprep.subr.bf16.mxu1 %v5002_v26  ;;  %v5083_v25 = vld [vmem:[%s7416_s1 + $0xad4] ss:$8 sps:$4 sm:$0xff]   ;;  %v5078_v26 = vld [vmem:[%s7416_s1 + $0x2d0] ss:$8 sps:$4 sm:$0xff]  }
  0x81   :  { %3752 = vmatprep.subr.bf16.mxu0 %v5005_v27  ;;  %v5081_v27 = vld [vmem:[%s7416_s1 + $0xad0] ss:$8 sps:$4 sm:$0xff]  }
  0x82   :  { %3416 = vmatmul.mubr.bf16.vlgmr.msra.gmra.mrb[0].mxu1 %v599_v30  ;;  %v5084_v30 = vld [vmem:[%s7416_s1 + $0x2e0] ss:$8 sps:$4 sm:$0xff]  }
  0x83   :  { %3744 = vmatmul.mubr.bf16.vlgmr.msra.gmra.mrb[0].mxu0 %v697_v31  ;;  %3425 = vmatpush1.bf16.msra.mxu1 %v5000_v32  ;;  %v5087_v31 = vld [vmem:[%s7416_s1 + $0xae0] ss:$8 sps:$4 sm:$0xff]   ;;  %v5092_v32 = vld [vmem:[%s7416_s1 + $0x2f4] ss:$8 sps:$4 sm:$0xff]  }
  0x84   :  { %3753 = vmatpush1.bf16.msra.mxu0 %v5003_v33  ;;  %3426 = vmatprep.subr.bf16.mxu1 %v5008_v34  ;;  %v5095_v33 = vld [vmem:[%s7416_s1 + $0xaf4] ss:$8 sps:$4 sm:$0xff]   ;;  %v5090_v34 = vld [vmem:[%s7416_s1 + $0x2f0] ss:$8 sps:$4 sm:$0xff]  }
  0x85   :  { %3754 = vmatprep.subr.bf16.mxu0 %v5011_v16  ;;  %3456 = vmatprep.mubr.bf16.mxu1 %v6100_v17  ;;  %v5093_v16 = vld [vmem:[%s7416_s1 + $0xaf0] ss:$8 sps:$4 sm:$0xff]  }
  0x86   :  { %3784 = vmatprep.mubr.bf16.mxu0 %v6103_v35 }
  0x87   :  { %3427 = vmatpush1.bf16.msra.mxu1 %v5006_v36  ;;  %v5098_v36 = vld [vmem:[%s7416_s1 + $0x304] ss:$8 sps:$4 sm:$0xff]  }
  0x88   :  { %3755 = vmatpush1.bf16.msra.mxu0 %v5009_v37  ;;  %3428 = vmatprep.subr.bf16.mxu1 %v5014_v38  ;;  %v5101_v37 = vld [vmem:[%s7416_s1 + $0xb04] ss:$8 sps:$4 sm:$0xff]   ;;  %v6289_v38 = vrot.slane %v6062_v56, %v5785_v49  ;;  %v5104_v56 = vld [vmem:[%s7416_s1 + $0x314] ss:$8 sps:$4 sm:$0xff]  }
  0x89   :  { %3756 = vmatprep.subr.bf16.mxu0 %v5017_v39  ;;  %v6293_v39 = vrot.slane %v6065_v23, %v5785_v49  ;;  %v5107_v23 = vld [vmem:[%s7416_s1 + $0xb14] ss:$8 sps:$4 sm:$0xff]  }
  0x8b   :  { %3429 = vmatpush1.bf16.msra.mxu1 %v5012_v40  ;;  %v5096_v40 = vld [vmem:[%s7416_s1 + $0x300] ss:$8 sps:$4 sm:$0xff]  }
  0x8c   :  { %3757 = vmatpush1.bf16.msra.mxu0 %v5015_v41  ;;  %3430 = vmatprep.subr.bf16.mxu1 %v5020_v43  ;;  %v5099_v41 = vld [vmem:[%s7416_s1 + $0xb00] ss:$8 sps:$4 sm:$0xff]   ;;  %v602_v43 = vcombine.high %v6100_v17, %v6100_v17  ;;  %v5110_v17 = vld [vmem:[%s7416_s1 + $0x324] ss:$8 sps:$4 sm:$0xff]  }
  0x8d   :  { %3758 = vmatprep.subr.bf16.mxu0 %v5023_v44  ;;  %v700_v44 = vcombine.high %v6103_v35, %v6103_v35  ;;  %v5113_v35 = vld [vmem:[%s7416_s1 + $0xb24] ss:$8 sps:$4 sm:$0xff]  }
  0x8f   :  { %3431 = vmatpush1.bf16.msra.mxu1 %v5018_v45  ;;  %v5102_v45 = vld [vmem:[%s7416_s1 + $0x310] ss:$8 sps:$4 sm:$0xff]  }
  0x90   :  { %3759 = vmatpush1.bf16.msra.mxu0 %v5021_v46  ;;  %3432 = vmatprep.subr.bf16.mxu1 %v5026_v47  ;;  %v5105_v46 = vld [vmem:[%s7416_s1 + $0xb10] ss:$8 sps:$4 sm:$0xff]   ;;  %v5108_v47 = vld [vmem:[%s7416_s1 + $0x320] ss:$8 sps:$4 sm:$0xff]  }
  0x91   :  { %3760 = vmatprep.subr.bf16.mxu0 %v5029_v48  ;;  %v5111_v48 = vld [vmem:[%s7416_s1 + $0xb20] ss:$8 sps:$4 sm:$0xff]  }
  0x93   :  { %3433 = vmatpush1.bf16.msra.mxu1 %v5024_v50  ;;  %v5116_v50 = vld [vmem:[%s7416_s1 + $0x334] ss:$8 sps:$4 sm:$0xff]  }
  0x94   :  { %3761 = vmatpush1.bf16.msra.mxu0 %v5027_v51  ;;  %3434 = vmatprep.subr.bf16.mxu1 %v5032_v53  ;;  %v5119_v51 = vld [vmem:[%s7416_s1 + $0xb34] ss:$8 sps:$4 sm:$0xff]   ;;  %v5114_v53 = vld [vmem:[%s7416_s1 + $0x330] ss:$8 sps:$4 sm:$0xff]  }
  0x95   :  { %3762 = vmatprep.subr.bf16.mxu0 %v5035_v54  ;;  %v5117_v54 = vld [vmem:[%s7416_s1 + $0xb30] ss:$8 sps:$4 sm:$0xff]  }
  0x97   :  { %3435 = vmatpush1.bf16.msra.mxu1 %v5030_v55  ;;  %v5122_v55 = vld [vmem:[%s7416_s1 + $0x344] ss:$8 sps:$4 sm:$0xff]  }
  0x98   :  { %3763 = vmatpush1.bf16.msra.mxu0 %v5033_v57  ;;  %3436 = vmatprep.subr.bf16.mxu1 %v5038_v58  ;;  %v5125_v57 = vld [vmem:[%s7416_s1 + $0xb44] ss:$8 sps:$4 sm:$0xff]   ;;  %v5120_v58 = vld [vmem:[%s7416_s1 + $0x340] ss:$8 sps:$4 sm:$0xff]  }
  0x99   :  { %3764 = vmatprep.subr.bf16.mxu0 %v5041_v59  ;;  %v5123_v59 = vld [vmem:[%s7416_s1 + $0xb40] ss:$8 sps:$4 sm:$0xff]  }
  0x9b   :  { %3437 = vmatpush1.bf16.msra.mxu1 %v5036_v60  ;;  %v5128_v60 = vld [vmem:[%s7416_s1 + $0x354] ss:$8 sps:$4 sm:$0xff]  }
  0x9c   :  { %3765 = vmatpush1.bf16.msra.mxu0 %v5039_v61  ;;  %3438 = vmatprep.subr.bf16.mxu1 %v5044_v62  ;;  %v5131_v61 = vld [vmem:[%s7416_s1 + $0xb54] ss:$8 sps:$4 sm:$0xff]   ;;  %v5126_v62 = vld [vmem:[%s7416_s1 + $0x350] ss:$8 sps:$4 sm:$0xff]  }
  0x9d   :  { %3766 = vmatprep.subr.bf16.mxu0 %v5047_v63  ;;  %v5129_v63 = vld [vmem:[%s7416_s1 + $0xb50] ss:$8 sps:$4 sm:$0xff]  }
  0x9f   :  { %3439 = vmatpush1.bf16.msra.mxu1 %v5042_v0  ;;  %v5134_v0 = vld [vmem:[%s7416_s1 + $0x364] ss:$8 sps:$4 sm:$0xff]  }
  0xa0   :  { %3767 = vmatpush1.bf16.msra.mxu0 %v5045_v1  ;;  %3440 = vmatprep.subr.bf16.mxu1 %v5050_v2  ;;  %v5137_v1 = vld [vmem:[%s7416_s1 + $0xb64] ss:$8 sps:$4 sm:$0xff]   ;;  %v5132_v2 = vld [vmem:[%s7416_s1 + $0x360] ss:$8 sps:$4 sm:$0xff]  }
  0xa1   :  { %3768 = vmatprep.subr.bf16.mxu0 %v5053_v3  ;;  %v5135_v3 = vld [vmem:[%s7416_s1 + $0xb60] ss:$8 sps:$4 sm:$0xff]  }
  0xa3   :  { %3441 = vmatpush1.bf16.msra.mxu1 %v5048_v4  ;;  %v5140_v4 = vld [vmem:[%s7416_s1 + $0x374] ss:$8 sps:$4 sm:$0xff]  }
  0xa4   :  { %3769 = vmatpush1.bf16.msra.mxu0 %v5051_v5  ;;  %3442 = vmatprep.subr.bf16.mxu1 %v5056_v6  ;;  %v5143_v5 = vld [vmem:[%s7416_s1 + $0xb74] ss:$8 sps:$4 sm:$0xff]   ;;  %v5138_v6 = vld [vmem:[%s7416_s1 + $0x370] ss:$8 sps:$4 sm:$0xff]  }
  0xa5   :  { %3770 = vmatprep.subr.bf16.mxu0 %v5059_v7  ;;  %v5141_v7 = vld [vmem:[%s7416_s1 + $0xb70] ss:$8 sps:$4 sm:$0xff]  }
  0xa7   :  { %3443 = vmatpush1.bf16.msra.mxu1 %v5054_v8  ;;  %v5146_v8 = vld [vmem:[%s7416_s1 + $0x384] ss:$8 sps:$4 sm:$0xff]  }
  0xa8   :  { %3771 = vmatpush1.bf16.msra.mxu0 %v5057_v9  ;;  %3444 = vmatprep.subr.bf16.mxu1 %v5062_v10  ;;  %v5149_v9 = vld [vmem:[%s7416_s1 + $0xb84] ss:$8 sps:$4 sm:$0xff]   ;;  %v5144_v10 = vld [vmem:[%s7416_s1 + $0x380] ss:$8 sps:$4 sm:$0xff]  }
  0xa9   :  { %3772 = vmatprep.subr.bf16.mxu0 %v5065_v11  ;;  %v5147_v11 = vld [vmem:[%s7416_s1 + $0xb80] ss:$8 sps:$4 sm:$0xff]  }
  0xab   :  { %3445 = vmatpush1.bf16.msra.mxu1 %v5060_v12  ;;  %v5152_v12 = vld [vmem:[%s7416_s1 + $0x394] ss:$8 sps:$4 sm:$0xff]  }
  0xac   :  { %3773 = vmatpush1.bf16.msra.mxu0 %v5063_v13  ;;  %3446 = vmatprep.subr.bf16.mxu1 %v5068_v14  ;;  %v5155_v13 = vld [vmem:[%s7416_s1 + $0xb94] ss:$8 sps:$4 sm:$0xff]   ;;  %v5150_v14 = vld [vmem:[%s7416_s1 + $0x390] ss:$8 sps:$4 sm:$0xff]  }
  0xad   :  { %3774 = vmatprep.subr.bf16.mxu0 %v5071_v15  ;;  %v5153_v15 = vld [vmem:[%s7416_s1 + $0xb90] ss:$8 sps:$4 sm:$0xff]  }
  0xaf   :  { %3447 = vmatpush1.bf16.msra.mxu1 %v5066_v18  ;;  %v5158_v18 = vld [vmem:[%s7416_s1 + $0x3a4] ss:$8 sps:$4 sm:$0xff]  }
  0xb0   :  { %3775 = vmatpush1.bf16.msra.mxu0 %v5069_v19  ;;  %3448 = vmatprep.subr.bf16.mxu1 %v5074_v20  ;;  %v5161_v19 = vld [vmem:[%s7416_s1 + $0xba4] ss:$8 sps:$4 sm:$0xff]   ;;  %v5156_v20 = vld [vmem:[%s7416_s1 + $0x3a0] ss:$8 sps:$4 sm:$0xff]  }
  0xb1   :  { %3776 = vmatprep.subr.bf16.mxu0 %v5077_v21  ;;  %v5159_v21 = vld [vmem:[%s7416_s1 + $0xba0] ss:$8 sps:$4 sm:$0xff]  }
  0xb3   :  { %3449 = vmatpush1.bf16.msra.mxu1 %v5072_v22  ;;  %v5164_v22 = vld [vmem:[%s7416_s1 + $0x3b4] ss:$8 sps:$4 sm:$0xff]  }
  0xb4   :  { %3777 = vmatpush1.bf16.msra.mxu0 %v5075_v52  ;;  %3450 = vmatprep.subr.bf16.mxu1 %v5080_v24  ;;  %v5167_v52 = vld [vmem:[%s7416_s1 + $0xbb4] ss:$8 sps:$4 sm:$0xff]   ;;  %v5162_v24 = vld [vmem:[%s7416_s1 + $0x3b0] ss:$8 sps:$4 sm:$0xff]  }
  0xb5   :  { %3778 = vmatprep.subr.bf16.mxu0 %v5083_v25  ;;  %v5165_v25 = vld [vmem:[%s7416_s1 + $0xbb0] ss:$8 sps:$4 sm:$0xff]  }
  0xb7   :  { %3451 = vmatpush1.bf16.msra.mxu1 %v5078_v26  ;;  %v5170_v26 = vld [vmem:[%s7416_s1 + $0x3c4] ss:$8 sps:$4 sm:$0xff]  }
  0xb8   :  { %3779 = vmatpush1.bf16.msra.mxu0 %v5081_v27  ;;  %3452 = vmatprep.subr.bf16.mxu1 %v5086_v28  ;;  %v5173_v27 = vld [vmem:[%s7416_s1 + $0xbc4] ss:$8 sps:$4 sm:$0xff]   ;;  %v5168_v28 = vld [vmem:[%s7416_s1 + $0x3c0] ss:$8 sps:$4 sm:$0xff]  }
  0xb9   :  { %3780 = vmatprep.subr.bf16.mxu0 %v5089_v29  ;;  %v5171_v29 = vld [vmem:[%s7416_s1 + $0xbc0] ss:$8 sps:$4 sm:$0xff]  }
  0xbb   :  { %3453 = vmatpush1.bf16.msra.mxu1 %v5084_v30  ;;  %v5176_v30 = vld [vmem:[%s7416_s1 + $0x3d4] ss:$8 sps:$4 sm:$0xff]  }
  0xbc   :  { %3781 = vmatpush1.bf16.msra.mxu0 %v5087_v31  ;;  %3454 = vmatprep.subr.bf16.mxu1 %v5092_v32  ;;  %v5179_v31 = vld [vmem:[%s7416_s1 + $0xbd4] ss:$8 sps:$4 sm:$0xff]   ;;  %v5174_v32 = vld [vmem:[%s7416_s1 + $0x3d0] ss:$8 sps:$4 sm:$0xff]  }
  0xbd   :  { %3782 = vmatprep.subr.bf16.mxu0 %v5095_v33  ;;  %v5177_v33 = vld [vmem:[%s7416_s1 + $0xbd0] ss:$8 sps:$4 sm:$0xff]  }
  0xbf   :  { %3455 = vmatpush1.bf16.msra.mxu1 %v5090_v34  ;;  %v5182_v34 = vld [vmem:[%s7416_s1 + $0x3e4] ss:$8 sps:$4 sm:$0xff]  }
  0xc0   :  { %3783 = vmatpush1.bf16.msra.mxu0 %v5093_v16  ;;  %3465 = vmatprep.subr.bf16.mxu1 %v5098_v36  ;;  %v5185_v16 = vld [vmem:[%s7416_s1 + $0xbe4] ss:$8 sps:$4 sm:$0xff]   ;;  %v5180_v36 = vld [vmem:[%s7416_s1 + $0x3e0] ss:$8 sps:$4 sm:$0xff]  }
  0xc1   :  { %3793 = vmatprep.subr.bf16.mxu0 %v5101_v37  ;;  %v5183_v37 = vld [vmem:[%s7416_s1 + $0xbe0] ss:$8 sps:$4 sm:$0xff]  }
  0xc2   :  { %3457 = vmatmul.mubr.bf16.vlgmr.msra.gmra.mrb[0].mxu1 %v6289_v38 }
  0xc3   :  { %3785 = vmatmul.mubr.bf16.vlgmr.msra.gmra.mrb[0].mxu0 %v6293_v39  ;;  %3466 = vmatpush1.bf16.msra.mxu1 %v5096_v40  ;;  %v6478_v40 = vld [vmem:[%s7415_s0 + $0x8] sm:$0xff] }
  0xc4   :  { %3794 = vmatpush1.bf16.msra.mxu0 %v5099_v41  ;;  %3467 = vmatprep.subr.bf16.mxu1 %v5104_v56  ;;  %v6483_v41 = vld [vmem:[%s7415_s0 + $0x18] sm:$0xff] }
  0xc5   :  { %3795 = vmatprep.subr.bf16.mxu0 %v5107_v23  ;;  %3497 = vmatprep.mubr.bf16.mxu1 %v602_v43  ;;  %v5188_v56 = vld [vmem:[%s7416_s1 + $0x3f4] ss:$8 sps:$4 sm:$0xff]   ;;  %v6493_v43 = vrot.slane %v6478_v40, %v5785_v49 }
  0xc6   :  { %3825 = vmatprep.mubr.bf16.mxu0 %v700_v44  ;;  %v5191_v23 = vld [vmem:[%s7416_s1 + $0xbf4] ss:$8 sps:$4 sm:$0xff]   ;;  %v6497_v44 = vrot.slane %v6483_v41, %v5785_v49 }
  0xc7   :  { %3468 = vmatpush1.bf16.msra.mxu1 %v5102_v45  ;;  %v5186_v45 = vld [vmem:[%s7416_s1 + $0x3f0] ss:$8 sps:$4 sm:$0xff]  }
  0xc8   :  { %3796 = vmatpush1.bf16.msra.mxu0 %v5105_v46  ;;  %3469 = vmatprep.subr.bf16.mxu1 %v5110_v17  ;;  %v5189_v46 = vld [vmem:[%s7416_s1 + $0xbf0] ss:$8 sps:$4 sm:$0xff]   ;;  %v5194_v17 = vld [vmem:[%s7416_s1 + $0x404] ss:$8 sps:$4 sm:$0xff]  }
  0xc9   :  { %3797 = vmatprep.subr.bf16.mxu0 %v5113_v35  ;;  %v5197_v35 = vld [vmem:[%s7416_s1 + $0xc04] ss:$8 sps:$4 sm:$0xff]  }
  0xcb   :  { %3470 = vmatpush1.bf16.msra.mxu1 %v5108_v47  ;;  %v618_v47 = vcombine.high %v6493_v43, %v6493_v43 }
  0xcc   :  { %3798 = vmatpush1.bf16.msra.mxu0 %v5111_v48  ;;  %3471 = vmatprep.subr.bf16.mxu1 %v5116_v50  ;;  %v716_v48 = vcombine.high %v6497_v44, %v6497_v44  ;;  %v5192_v50 = vld [vmem:[%s7416_s1 + $0x400] ss:$8 sps:$4 sm:$0xff]  }
  0xcd   :  { %3799 = vmatprep.subr.bf16.mxu0 %v5119_v51  ;;  %v5195_v51 = vld [vmem:[%s7416_s1 + $0xc00] ss:$8 sps:$4 sm:$0xff]  }
  0xcf   :  { %3472 = vmatpush1.bf16.msra.mxu1 %v5114_v53  ;;  %v600_v53 = vcombine.high %v6289_v38, %v6289_v38  ;;  %v6535_v38 = vrot.slane %v716_v48, %v5785_v49  ;;  %v5273_v48 = vld [vmem:[%s7416_s1 + $0xcd0] ss:$8 sps:$4 sm:$0xff]  }
  0xd0   :  { %3800 = vmatpush1.bf16.msra.mxu0 %v5117_v54  ;;  %3473 = vmatprep.subr.bf16.mxu1 %v5122_v55  ;;  %v698_v54 = vcombine.high %v6293_v39, %v6293_v39  ;;  %v5200_v55 = vld [vmem:[%s7416_s1 + $0x414] ss:$8 sps:$4 sm:$0xff]   ;;  %v5198_v39 = vld [vmem:[%s7416_s1 + $0x410] ss:$8 sps:$4 sm:$0xff]  }
  0xd1   :  { %3801 = vmatprep.subr.bf16.mxu0 %v5125_v57  ;;  %v5203_v57 = vld [vmem:[%s7416_s1 + $0xc14] ss:$8 sps:$4 sm:$0xff]  }
  0xd3   :  { %3474 = vmatpush1.bf16.msra.mxu1 %v5120_v58  ;;  %v6532_v58 = vrot.slane %v618_v47, %v5785_v49  ;;  %v5270_v47 = vld [vmem:[%s7416_s1 + $0x4d0] ss:$8 sps:$4 sm:$0xff]  }
  0xd4   :  { %3802 = vmatpush1.bf16.msra.mxu0 %v5123_v59  ;;  %3475 = vmatprep.subr.bf16.mxu1 %v5128_v60  ;;  %v5201_v59 = vld [vmem:[%s7416_s1 + $0xc10] ss:$8 sps:$4 sm:$0xff]   ;;  %v5206_v60 = vld [vmem:[%s7416_s1 + $0x424] ss:$8 sps:$4 sm:$0xff]  }
  0xd5   :  { %3803 = vmatprep.subr.bf16.mxu0 %v5131_v61  ;;  %v5209_v61 = vld [vmem:[%s7416_s1 + $0xc24] ss:$8 sps:$4 sm:$0xff]  }
  0xd7   :  { %3476 = vmatpush1.bf16.msra.mxu1 %v5126_v62  ;;  %v5204_v62 = vld [vmem:[%s7416_s1 + $0x420] ss:$8 sps:$4 sm:$0xff]  }
  0xd8   :  { %3804 = vmatpush1.bf16.msra.mxu0 %v5129_v63  ;;  %3477 = vmatprep.subr.bf16.mxu1 %v5134_v0  ;;  %v5207_v63 = vld [vmem:[%s7416_s1 + $0xc20] ss:$8 sps:$4 sm:$0xff]   ;;  %v5212_v0 = vld [vmem:[%s7416_s1 + $0x434] ss:$8 sps:$4 sm:$0xff]  }
  0xd9   :  { %3805 = vmatprep.subr.bf16.mxu0 %v5137_v1  ;;  %v5215_v1 = vld [vmem:[%s7416_s1 + $0xc34] ss:$8 sps:$4 sm:$0xff]  }
  0xdb   :  { %3478 = vmatpush1.bf16.msra.mxu1 %v5132_v2  ;;  %v5210_v2 = vld [vmem:[%s7416_s1 + $0x430] ss:$8 sps:$4 sm:$0xff]  }
  0xdc   :  { %3806 = vmatpush1.bf16.msra.mxu0 %v5135_v3  ;;  %3479 = vmatprep.subr.bf16.mxu1 %v5140_v4  ;;  %v5213_v3 = vld [vmem:[%s7416_s1 + $0xc30] ss:$8 sps:$4 sm:$0xff]   ;;  %v5218_v4 = vld [vmem:[%s7416_s1 + $0x444] ss:$8 sps:$4 sm:$0xff]  }
  0xdd   :  { %3807 = vmatprep.subr.bf16.mxu0 %v5143_v5  ;;  %v5221_v5 = vld [vmem:[%s7416_s1 + $0xc44] ss:$8 sps:$4 sm:$0xff]  }
  0xdf   :  { %3480 = vmatpush1.bf16.msra.mxu1 %v5138_v6  ;;  %v5216_v6 = vld [vmem:[%s7416_s1 + $0x440] ss:$8 sps:$4 sm:$0xff]  }
  0xe0   :  { %3808 = vmatpush1.bf16.msra.mxu0 %v5141_v7  ;;  %3481 = vmatprep.subr.bf16.mxu1 %v5146_v8  ;;  %v5219_v7 = vld [vmem:[%s7416_s1 + $0xc40] ss:$8 sps:$4 sm:$0xff]   ;;  %v5224_v8 = vld [vmem:[%s7416_s1 + $0x454] ss:$8 sps:$4 sm:$0xff]  }
  0xe1   :  { %3809 = vmatprep.subr.bf16.mxu0 %v5149_v9  ;;  %v5227_v9 = vld [vmem:[%s7416_s1 + $0xc54] ss:$8 sps:$4 sm:$0xff]  }
  0xe3   :  { %3482 = vmatpush1.bf16.msra.mxu1 %v5144_v10  ;;  %v5222_v10 = vld [vmem:[%s7416_s1 + $0x450] ss:$8 sps:$4 sm:$0xff]  }
  0xe4   :  { %3810 = vmatpush1.bf16.msra.mxu0 %v5147_v11  ;;  %3483 = vmatprep.subr.bf16.mxu1 %v5152_v12  ;;  %v5225_v11 = vld [vmem:[%s7416_s1 + $0xc50] ss:$8 sps:$4 sm:$0xff]   ;;  %v5230_v12 = vld [vmem:[%s7416_s1 + $0x464] ss:$8 sps:$4 sm:$0xff]  }
  0xe5   :  { %3811 = vmatprep.subr.bf16.mxu0 %v5155_v13  ;;  %v5233_v13 = vld [vmem:[%s7416_s1 + $0xc64] ss:$8 sps:$4 sm:$0xff]  }
  0xe7   :  { %3484 = vmatpush1.bf16.msra.mxu1 %v5150_v14  ;;  %v5228_v14 = vld [vmem:[%s7416_s1 + $0x460] ss:$8 sps:$4 sm:$0xff]  }
  0xe8   :  { %3812 = vmatpush1.bf16.msra.mxu0 %v5153_v15  ;;  %3485 = vmatprep.subr.bf16.mxu1 %v5158_v18  ;;  %v5231_v15 = vld [vmem:[%s7416_s1 + $0xc60] ss:$8 sps:$4 sm:$0xff]   ;;  %v5236_v18 = vld [vmem:[%s7416_s1 + $0x474] ss:$8 sps:$4 sm:$0xff]  }
  0xe9   :  { %3813 = vmatprep.subr.bf16.mxu0 %v5161_v19  ;;  %v5239_v19 = vld [vmem:[%s7416_s1 + $0xc74] ss:$8 sps:$4 sm:$0xff]  }
  0xeb   :  { %3486 = vmatpush1.bf16.msra.mxu1 %v5156_v20  ;;  %v5234_v20 = vld [vmem:[%s7416_s1 + $0x470] ss:$8 sps:$4 sm:$0xff]  }
  0xec   :  { %3814 = vmatpush1.bf16.msra.mxu0 %v5159_v21  ;;  %3487 = vmatprep.subr.bf16.mxu1 %v5164_v22  ;;  %v5237_v21 = vld [vmem:[%s7416_s1 + $0xc70] ss:$8 sps:$4 sm:$0xff]   ;;  %v5242_v22 = vld [vmem:[%s7416_s1 + $0x484] ss:$8 sps:$4 sm:$0xff]  }
  0xed   :  { %3815 = vmatprep.subr.bf16.mxu0 %v5167_v52  ;;  %v5245_v52 = vld [vmem:[%s7416_s1 + $0xc84] ss:$8 sps:$4 sm:$0xff]  }
  0xef   :  { %3488 = vmatpush1.bf16.msra.mxu1 %v5162_v24  ;;  %v5240_v24 = vld [vmem:[%s7416_s1 + $0x480] ss:$8 sps:$4 sm:$0xff]  }
  0xf0   :  { %3816 = vmatpush1.bf16.msra.mxu0 %v5165_v25  ;;  %3489 = vmatprep.subr.bf16.mxu1 %v5170_v26  ;;  %v5243_v25 = vld [vmem:[%s7416_s1 + $0xc80] ss:$8 sps:$4 sm:$0xff]   ;;  %v5248_v26 = vld [vmem:[%s7416_s1 + $0x494] ss:$8 sps:$4 sm:$0xff]  }
  0xf1   :  { %3817 = vmatprep.subr.bf16.mxu0 %v5173_v27  ;;  %v5251_v27 = vld [vmem:[%s7416_s1 + $0xc94] ss:$8 sps:$4 sm:$0xff]  }
  0xf3   :  { %3490 = vmatpush1.bf16.msra.mxu1 %v5168_v28  ;;  %v5246_v28 = vld [vmem:[%s7416_s1 + $0x490] ss:$8 sps:$4 sm:$0xff]  }
  0xf4   :  { %3818 = vmatpush1.bf16.msra.mxu0 %v5171_v29  ;;  %3491 = vmatprep.subr.bf16.mxu1 %v5176_v30  ;;  %v5249_v29 = vld [vmem:[%s7416_s1 + $0xc90] ss:$8 sps:$4 sm:$0xff]   ;;  %v5254_v30 = vld [vmem:[%s7416_s1 + $0x4a4] ss:$8 sps:$4 sm:$0xff]  }
  0xf5   :  { %3819 = vmatprep.subr.bf16.mxu0 %v5179_v31  ;;  %v5257_v31 = vld [vmem:[%s7416_s1 + $0xca4] ss:$8 sps:$4 sm:$0xff]  }
  0xf7   :  { %3492 = vmatpush1.bf16.msra.mxu1 %v5174_v32  ;;  %v5252_v32 = vld [vmem:[%s7416_s1 + $0x4a0] ss:$8 sps:$4 sm:$0xff]  }
  0xf8   :  { %3820 = vmatpush1.bf16.msra.mxu0 %v5177_v33  ;;  %3493 = vmatprep.subr.bf16.mxu1 %v5182_v34  ;;  %v5255_v33 = vld [vmem:[%s7416_s1 + $0xca0] ss:$8 sps:$4 sm:$0xff]   ;;  %v5260_v34 = vld [vmem:[%s7416_s1 + $0x4b4] ss:$8 sps:$4 sm:$0xff]  }
  0xf9   :  { %3821 = vmatprep.subr.bf16.mxu0 %v5185_v16  ;;  %v5263_v16 = vld [vmem:[%s7416_s1 + $0xcb4] ss:$8 sps:$4 sm:$0xff]  }
  0xfb   :  { %3494 = vmatpush1.bf16.msra.mxu1 %v5180_v36  ;;  %v5258_v36 = vld [vmem:[%s7416_s1 + $0x4b0] ss:$8 sps:$4 sm:$0xff]  }
  0xfc   :  { %3822 = vmatpush1.bf16.msra.mxu0 %v5183_v37  ;;  %3495 = vmatprep.subr.bf16.mxu1 %v5188_v56  ;;  %v5261_v37 = vld [vmem:[%s7416_s1 + $0xcb0] ss:$8 sps:$4 sm:$0xff]   ;;  %v5266_v56 = vld [vmem:[%s7416_s1 + $0x4c4] ss:$8 sps:$4 sm:$0xff]  }
  0xfd   :  { %3823 = vmatprep.subr.bf16.mxu0 %v5191_v23  ;;  %v5269_v23 = vld [vmem:[%s7416_s1 + $0xcc4] ss:$8 sps:$4 sm:$0xff]  }
  0xff   :  { %3496 = vmatpush1.bf16.msra.mxu1 %v5186_v45  ;;  %v5264_v45 = vld [vmem:[%s7416_s1 + $0x4c0] ss:$8 sps:$4 sm:$0xff]  }
 0x100   :  { %3824 = vmatpush1.bf16.msra.mxu0 %v5189_v46  ;;  %3506 = vmatprep.subr.bf16.mxu1 %v5194_v17  ;;  %v5267_v46 = vld [vmem:[%s7416_s1 + $0xcc0] ss:$8 sps:$4 sm:$0xff]   ;;  %v5272_v17 = vld [vmem:[%s7416_s1 + $0x4d4] ss:$8 sps:$4 sm:$0xff]  }
 0x101   :  { %3834 = vmatprep.subr.bf16.mxu0 %v5197_v35  ;;  %v5275_v35 = vld [vmem:[%s7416_s1 + $0xcd4] ss:$8 sps:$4 sm:$0xff]  }
 0x102   :  { %3498 = vmatmul.mubr.bf16.vlgmr.msra.gmra.mrb[0].mxu1 %v600_v53  ;;  %v5276_v53 = vld [vmem:[%s7416_s1 + $0x4e0] ss:$8 sps:$4 sm:$0xff]  }
 0x103   :  { %3826 = vmatmul.mubr.bf16.vlgmr.msra.gmra.mrb[0].mxu0 %v698_v54  ;;  %3507 = vmatpush1.bf16.msra.mxu1 %v5192_v50  ;;  %v5278_v50 = vld [vmem:[%s7416_s1 + $0x4e4] ss:$8 sps:$4 sm:$0xff]   ;;  %v5279_v54 = vld [vmem:[%s7416_s1 + $0xce0] ss:$8 sps:$4 sm:$0xff]  }
 0x104   :  { %3835 = vmatpush1.bf16.msra.mxu0 %v5195_v51  ;;  %3508 = vmatprep.subr.bf16.mxu1 %v5200_v55  ;;  %v5281_v51 = vld [vmem:[%s7416_s1 + $0xce4] ss:$8 sps:$4 sm:$0xff]   ;;  %v5284_v55 = vld [vmem:[%s7416_s1 + $0x4f4] ss:$8 sps:$4 sm:$0xff]  }
 0x105   :  { %3836 = vmatprep.subr.bf16.mxu0 %v5203_v57  ;;  %3538 = vmatprep.mubr.bf16.mxu1 %v6532_v58  ;;  %v5287_v57 = vld [vmem:[%s7416_s1 + $0xcf4] ss:$8 sps:$4 sm:$0xff]  }
 0x106   :  { %3866 = vmatprep.mubr.bf16.mxu0 %v6535_v38 }
 0x107   :  { %3509 = vmatpush1.bf16.msra.mxu1 %v5198_v39  ;;  %v5282_v39 = vld [vmem:[%s7416_s1 + $0x4f0] ss:$8 sps:$4 sm:$0xff]  }
 0x108   :  { %3837 = vmatpush1.bf16.msra.mxu0 %v5201_v59  ;;  %3510 = vmatprep.subr.bf16.mxu1 %v5206_v60  ;;  %v5285_v59 = vld [vmem:[%s7416_s1 + $0xcf0] ss:$8 sps:$4 sm:$0xff]   ;;  %v5290_v60 = vld [vmem:[%s7416_s1 + $0x504] ss:$8 sps:$4 sm:$0xff]  }
 0x109   :  { %3838 = vmatprep.subr.bf16.mxu0 %v5209_v61  ;;  %v5293_v61 = vld [vmem:[%s7416_s1 + $0xd04] ss:$8 sps:$4 sm:$0xff]  }
 0x10b   :  { %3511 = vmatpush1.bf16.msra.mxu1 %v5204_v62  ;;  %v6721_v62 = vrot.slane %v6493_v43, %v5785_v49  ;;  %v5296_v43 = vld [vmem:[%s7416_s1 + $0x514] ss:$8 sps:$4 sm:$0xff]  }
 0x10c   :  { %3839 = vmatpush1.bf16.msra.mxu0 %v5207_v63  ;;  %3512 = vmatprep.subr.bf16.mxu1 %v5212_v0  ;;  %v6725_v63 = vrot.slane %v6497_v44, %v5785_v49  ;;  %v5288_v0 = vld [vmem:[%s7416_s1 + $0x500] ss:$8 sps:$4 sm:$0xff]   ;;  %v5299_v44 = vld [vmem:[%s7416_s1 + $0xd14] ss:$8 sps:$4 sm:$0xff]  }
 0x10d   :  { %3840 = vmatprep.subr.bf16.mxu0 %v5215_v1  ;;  %v5291_v1 = vld [vmem:[%s7416_s1 + $0xd00] ss:$8 sps:$4 sm:$0xff]  }
 0x10f   :  { %3513 = vmatpush1.bf16.msra.mxu1 %v5210_v2  ;;  %v650_v2 = vcombine.high %v6532_v58, %v6532_v58  ;;  %v5302_v58 = vld [vmem:[%s7416_s1 + $0x524] ss:$8 sps:$4 sm:$0xff]  }
 0x110   :  { %3841 = vmatpush1.bf16.msra.mxu0 %v5213_v3  ;;  %3514 = vmatprep.subr.bf16.mxu1 %v5218_v4  ;;  %v748_v3 = vcombine.high %v6535_v38, %v6535_v38  ;;  %v5294_v4 = vld [vmem:[%s7416_s1 + $0x510] ss:$8 sps:$4 sm:$0xff]   ;;  %v5305_v38 = vld [vmem:[%s7416_s1 + $0xd24] ss:$8 sps:$4 sm:$0xff]  }
 0x111   :  { %3842 = vmatprep.subr.bf16.mxu0 %v5221_v5  ;;  %v5297_v5 = vld [vmem:[%s7416_s1 + $0xd10] ss:$8 sps:$4 sm:$0xff]  }
 0x113   :  { %3515 = vmatpush1.bf16.msra.mxu1 %v5216_v6  ;;  %v5300_v6 = vld [vmem:[%s7416_s1 + $0x520] ss:$8 sps:$4 sm:$0xff]  }
 0x114   :  { %3843 = vmatpush1.bf16.msra.mxu0 %v5219_v7  ;;  %3516 = vmatprep.subr.bf16.mxu1 %v5224_v8  ;;  %v5303_v7 = vld [vmem:[%s7416_s1 + $0xd20] ss:$8 sps:$4 sm:$0xff]   ;;  %v5308_v8 = vld [vmem:[%s7416_s1 + $0x534] ss:$8 sps:$4 sm:$0xff]  }
 0x115   :  { %3844 = vmatprep.subr.bf16.mxu0 %v5227_v9  ;;  %v5311_v9 = vld [vmem:[%s7416_s1 + $0xd34] ss:$8 sps:$4 sm:$0xff]  }
 0x117   :  { %3517 = vmatpush1.bf16.msra.mxu1 %v5222_v10  ;;  %v5306_v10 = vld [vmem:[%s7416_s1 + $0x530] ss:$8 sps:$4 sm:$0xff]  }
 0x118   :  { %3845 = vmatpush1.bf16.msra.mxu0 %v5225_v11  ;;  %3518 = vmatprep.subr.bf16.mxu1 %v5230_v12  ;;  %v5309_v11 = vld [vmem:[%s7416_s1 + $0xd30] ss:$8 sps:$4 sm:$0xff]   ;;  %v5314_v12 = vld [vmem:[%s7416_s1 + $0x544] ss:$8 sps:$4 sm:$0xff]  }
 0x119   :  { %3846 = vmatprep.subr.bf16.mxu0 %v5233_v13  ;;  %v5317_v13 = vld [vmem:[%s7416_s1 + $0xd44] ss:$8 sps:$4 sm:$0xff]  }
 0x11b   :  { %3519 = vmatpush1.bf16.msra.mxu1 %v5228_v14  ;;  %v5312_v14 = vld [vmem:[%s7416_s1 + $0x540] ss:$8 sps:$4 sm:$0xff]  }
 0x11c   :  { %3847 = vmatpush1.bf16.msra.mxu0 %v5231_v15  ;;  %3520 = vmatprep.subr.bf16.mxu1 %v5236_v18  ;;  %v5315_v15 = vld [vmem:[%s7416_s1 + $0xd40] ss:$8 sps:$4 sm:$0xff]   ;;  %v5320_v18 = vld [vmem:[%s7416_s1 + $0x554] ss:$8 sps:$4 sm:$0xff]  }
 0x11d   :  { %3848 = vmatprep.subr.bf16.mxu0 %v5239_v19  ;;  %v5323_v19 = vld [vmem:[%s7416_s1 + $0xd54] ss:$8 sps:$4 sm:$0xff]  }
 0x11f   :  { %3521 = vmatpush1.bf16.msra.mxu1 %v5234_v20 }
 0x120   :  { %3849 = vmatpush1.bf16.msra.mxu0 %v5237_v21  ;;  %3522 = vmatprep.subr.bf16.mxu1 %v5242_v22 }
 0x121   :  { %3850 = vmatprep.subr.bf16.mxu0 %v5245_v52 }
 0x123   :  { %3523 = vmatpush1.bf16.msra.mxu1 %v5240_v24 }
 0x124   :  { %3851 = vmatpush1.bf16.msra.mxu0 %v5243_v25  ;;  %3524 = vmatprep.subr.bf16.mxu1 %v5248_v26 }
 0x125   :  { %3852 = vmatprep.subr.bf16.mxu0 %v5251_v27 }
 0x127   :  { %3525 = vmatpush1.bf16.msra.mxu1 %v5246_v28 }
 0x128   :  { %3853 = vmatpush1.bf16.msra.mxu0 %v5249_v29  ;;  %3526 = vmatprep.subr.bf16.mxu1 %v5254_v30 }
 0x129   :  { %3854 = vmatprep.subr.bf16.mxu0 %v5257_v31 }
 0x12b   :  { %3527 = vmatpush1.bf16.msra.mxu1 %v5252_v32 }
 0x12c   :  { %3855 = vmatpush1.bf16.msra.mxu0 %v5255_v33  ;;  %3528 = vmatprep.subr.bf16.mxu1 %v5260_v34 }
 0x12d   :  { %3856 = vmatprep.subr.bf16.mxu0 %v5263_v16 }
 0x12f   :  { %3529 = vmatpush1.bf16.msra.mxu1 %v5258_v36 }
 0x130   :  { %3857 = vmatpush1.bf16.msra.mxu0 %v5261_v37  ;;  %3530 = vmatprep.subr.bf16.mxu1 %v5266_v56 }
 0x131   :  { %3858 = vmatprep.subr.bf16.mxu0 %v5269_v23 }
 0x133   :  { %3531 = vmatpush1.bf16.msra.mxu1 %v5264_v45 }
 0x134   :  { %3859 = vmatpush1.bf16.msra.mxu0 %v5267_v46  ;;  %3532 = vmatprep.subr.bf16.mxu1 %v5272_v17 }
 0x135   :  { %3860 = vmatprep.subr.bf16.mxu0 %v5275_v35 }
 0x137   :  { %3533 = vmatpush1.bf16.msra.mxu1 %v5270_v47 }
 0x138   :  { %3861 = vmatpush1.bf16.msra.mxu0 %v5273_v48  ;;  %3534 = vmatprep.subr.bf16.mxu1 %v5278_v50 }
 0x139   :  { %3862 = vmatprep.subr.bf16.mxu0 %v5281_v51 }
 0x13b   :  { %3535 = vmatpush1.bf16.msra.mxu1 %v5276_v53 }
 0x13c   :  { %3863 = vmatpush1.bf16.msra.mxu0 %v5279_v54  ;;  %3536 = vmatprep.subr.bf16.mxu1 %v5284_v55 }
 0x13d   :  { %3864 = vmatprep.subr.bf16.mxu0 %v5287_v57 }
 0x13f   :  { %3537 = vmatpush1.bf16.msra.mxu1 %v5282_v39 }
 0x140   :  { %3865 = vmatpush1.bf16.msra.mxu0 %v5285_v59  ;;  %3547 = vmatprep.subr.bf16.mxu1 %v5290_v60 }
 0x141   :  { %3875 = vmatprep.subr.bf16.mxu0 %v5293_v61 }
 0x142   :  { %3539 = vmatmul.mubr.bf16.vlgmr.msra.gmra.mrb[0].mxu1 %v6721_v62 }
 0x143   :  { %3867 = vmatmul.mubr.bf16.vlgmr.msra.gmra.mrb[0].mxu0 %v6725_v63  ;;  %3548 = vmatpush1.bf16.msra.mxu1 %v5288_v0 }
 0x144   :  { %3876 = vmatpush1.bf16.msra.mxu0 %v5291_v1  ;;  %3549 = vmatprep.subr.bf16.mxu1 %v5296_v43 }
 0x145   :  { %3877 = vmatprep.subr.bf16.mxu0 %v5299_v44  ;;  %3579 = vmatprep.mubr.bf16.mxu1 %v650_v2 }
 0x146   :  { %3907 = vmatprep.mubr.bf16.mxu0 %v748_v3 }
 0x147   :  { %3550 = vmatpush1.bf16.msra.mxu1 %v5294_v4 }
 0x148   :  { %3878 = vmatpush1.bf16.msra.mxu0 %v5297_v5  ;;  %3551 = vmatprep.subr.bf16.mxu1 %v5302_v58 }
 0x149   :  { %3879 = vmatprep.subr.bf16.mxu0 %v5305_v38 }
 0x14b   :  { %3552 = vmatpush1.bf16.msra.mxu1 %v5300_v6 }
 0x14c   :  { %3880 = vmatpush1.bf16.msra.mxu0 %v5303_v7  ;;  %3553 = vmatprep.subr.bf16.mxu1 %v5308_v8 }
 0x14d   :  { %3881 = vmatprep.subr.bf16.mxu0 %v5311_v9 }
 0x14f   :  { %3554 = vmatpush1.bf16.msra.mxu1 %v5306_v10 }
 0x150   :  { %3882 = vmatpush1.bf16.msra.mxu0 %v5309_v11  ;;  %3555 = vmatprep.subr.bf16.mxu1 %v5314_v12 }
 0x151   :  { %3883 = vmatprep.subr.bf16.mxu0 %v5317_v13 }
 0x152   :  { %10 = vsyncpa [#allocation3], 0  ;;  %v5318_v20 = vld [vmem:[%s7416_s1 + $0x550] ss:$8 sps:$4 sm:$0xff]   ;;  %v5326_v22 = vld [vmem:[%s7416_s1 + $0x564] ss:$8 sps:$4 sm:$0xff]   ;;  %v603_v0 = vcombine.high %v6478_v40, %v6478_v40  ;;  %v701_v1 = vcombine.high %v6483_v41, %v6483_v41  ;;  %v648_v8 = vcombine.high %v6721_v62, %v6721_v62  ;;  %v746_v9 = vcombine.high %v6725_v63, %v6725_v63 }
 0x153   :  { %3556 = vmatpush1.bf16.msra.mxu1 %v5312_v14  ;;  %v5321_v21 = vld [vmem:[%s7416_s1 + $0xd50] ss:$8 sps:$4 sm:$0xff]   ;;  %v5329_v52 = vld [vmem:[%s7416_s1 + $0xd64] ss:$8 sps:$4 sm:$0xff]   ;;  %v5324_v24 = vld [vmem:[%s7416_s1 + $0x560] ss:$8 sps:$4 sm:$0xff]  }
 0x154   :  { %3884 = vmatpush1.bf16.msra.mxu0 %v5315_v15  ;;  %3557 = vmatprep.subr.bf16.mxu1 %v5320_v18  ;;  %v5327_v25 = vld [vmem:[%s7416_s1 + $0xd60] ss:$8 sps:$4 sm:$0xff]   ;;  %v5332_v26 = vld [vmem:[%s7416_s1 + $0x574] ss:$8 sps:$4 sm:$0xff]   ;;  %v5330_v28 = vld [vmem:[%s7416_s1 + $0x570] ss:$8 sps:$4 sm:$0xff]   ;;  %v6918_v41 = vrot.slane %v603_v0, %v5785_v49  ;;  %v6921_v3 = vrot.slane %v701_v1, %v5785_v49 }
 0x155   :  { %3885 = vmatprep.subr.bf16.mxu0 %v5323_v19  ;;  %v5335_v27 = vld [vmem:[%s7416_s1 + $0xd74] ss:$8 sps:$4 sm:$0xff]   ;;  %v5333_v29 = vld [vmem:[%s7416_s1 + $0xd70] ss:$8 sps:$4 sm:$0xff]   ;;  %v5338_v30 = vld [vmem:[%s7416_s1 + $0x584] ss:$8 sps:$4 sm:$0xff]  }
 0x156   :  { %v5341_v31 = vld [vmem:[%s7416_s1 + $0xd84] ss:$8 sps:$4 sm:$0xff]   ;;  %v5336_v32 = vld [vmem:[%s7416_s1 + $0x580] ss:$8 sps:$4 sm:$0xff]   ;;  %v5344_v34 = vld [vmem:[%s7416_s1 + $0x594] ss:$8 sps:$4 sm:$0xff]   ;;  %v619_v6 = vcombine.high %v6918_v41, %v6918_v41  ;;  %v717_v7 = vcombine.high %v6921_v3, %v6921_v3 }
 0x157   :  { %3558 = vmatpush1.bf16.msra.mxu1 %v5318_v20  ;;  %v5339_v33 = vld [vmem:[%s7416_s1 + $0xd80] ss:$8 sps:$4 sm:$0xff]   ;;  %v5347_v16 = vld [vmem:[%s7416_s1 + $0xd94] ss:$8 sps:$4 sm:$0xff]   ;;  %v5342_v36 = vld [vmem:[%s7416_s1 + $0x590] ss:$8 sps:$4 sm:$0xff]  }
 0x158   :  { %3886 = vmatpush1.bf16.msra.mxu0 %v5321_v21  ;;  %3559 = vmatprep.subr.bf16.mxu1 %v5326_v22  ;;  %v5345_v37 = vld [vmem:[%s7416_s1 + $0xd90] ss:$8 sps:$4 sm:$0xff]   ;;  %v5350_v56 = vld [vmem:[%s7416_s1 + $0x5a4] ss:$8 sps:$4 sm:$0xff]   ;;  %v5348_v45 = vld [vmem:[%s7416_s1 + $0x5a0] ss:$8 sps:$4 sm:$0xff]   ;;  %v6956_v63 = vrot.slane %v619_v6, %v5785_v49  ;;  %v6959_v13 = vrot.slane %v717_v7, %v5785_v49 }
 0x159   :  { %3887 = vmatprep.subr.bf16.mxu0 %v5329_v52  ;;  %v5353_v23 = vld [vmem:[%s7416_s1 + $0xda4] ss:$8 sps:$4 sm:$0xff]   ;;  %v5351_v46 = vld [vmem:[%s7416_s1 + $0xda0] ss:$8 sps:$4 sm:$0xff]   ;;  %v5356_v17 = vld [vmem:[%s7416_s1 + $0x5b4] ss:$8 sps:$4 sm:$0xff]  }
 0x15a   :  { %v5359_v35 = vld [vmem:[%s7416_s1 + $0xdb4] ss:$8 sps:$4 sm:$0xff]   ;;  %v5354_v47 = vld [vmem:[%s7416_s1 + $0x5b0] ss:$8 sps:$4 sm:$0xff]   ;;  %v5362_v50 = vld [vmem:[%s7416_s1 + $0x5c4] ss:$8 sps:$4 sm:$0xff]  }
 0x15b   :  { %3560 = vmatpush1.bf16.msra.mxu1 %v5324_v24  ;;  %v5357_v48 = vld [vmem:[%s7416_s1 + $0xdb0] ss:$8 sps:$4 sm:$0xff]   ;;  %v5365_v51 = vld [vmem:[%s7416_s1 + $0xdc4] ss:$8 sps:$4 sm:$0xff]   ;;  %v5360_v53 = vld [vmem:[%s7416_s1 + $0x5c0] ss:$8 sps:$4 sm:$0xff]  }
 0x15c   :  { %3888 = vmatpush1.bf16.msra.mxu0 %v5327_v25  ;;  %3561 = vmatprep.subr.bf16.mxu1 %v5332_v26  ;;  %v5363_v54 = vld [vmem:[%s7416_s1 + $0xdc0] ss:$8 sps:$4 sm:$0xff]   ;;  %v5368_v55 = vld [vmem:[%s7416_s1 + $0x5d4] ss:$8 sps:$4 sm:$0xff]   ;;  %v5366_v39 = vld [vmem:[%s7416_s1 + $0x5d0] ss:$8 sps:$4 sm:$0xff]  }
 0x15d   :  { %3889 = vmatprep.subr.bf16.mxu0 %v5335_v27  ;;  %v5371_v57 = vld [vmem:[%s7416_s1 + $0xdd4] ss:$8 sps:$4 sm:$0xff]   ;;  %v5369_v59 = vld [vmem:[%s7416_s1 + $0xdd0] ss:$8 sps:$4 sm:$0xff]   ;;  %v5374_v60 = vld [vmem:[%s7416_s1 + $0x5e4] ss:$8 sps:$4 sm:$0xff]  }
 0x15e   :  { %v5377_v61 = vld [vmem:[%s7416_s1 + $0xde4] ss:$8 sps:$4 sm:$0xff]   ;;  %v5372_v43 = vld [vmem:[%s7416_s1 + $0x5e0] ss:$8 sps:$4 sm:$0xff]   ;;  %v5380_v2 = vld [vmem:[%s7416_s1 + $0x5f4] ss:$8 sps:$4 sm:$0xff]  }
 0x15f   :  { %3562 = vmatpush1.bf16.msra.mxu1 %v5330_v28  ;;  %v5375_v44 = vld [vmem:[%s7416_s1 + $0xde0] ss:$8 sps:$4 sm:$0xff]   ;;  %v5383_v40 = vld [vmem:[%s7416_s1 + $0xdf4] ss:$8 sps:$4 sm:$0xff]   ;;  %v5378_v4 = vld [vmem:[%s7416_s1 + $0x5f0] ss:$8 sps:$4 sm:$0xff]  }
 0x160   :  { %3890 = vmatpush1.bf16.msra.mxu0 %v5333_v29  ;;  %3563 = vmatprep.subr.bf16.mxu1 %v5338_v30  ;;  %v5381_v5 = vld [vmem:[%s7416_s1 + $0xdf0] ss:$8 sps:$4 sm:$0xff]   ;;  %v5386_v58 = vld [vmem:[%s7416_s1 + $0x604] ss:$8 sps:$4 sm:$0xff]   ;;  %v5384_v10 = vld [vmem:[%s7416_s1 + $0x600] ss:$8 sps:$4 sm:$0xff]  }
 0x161   :  { %3891 = vmatprep.subr.bf16.mxu0 %v5341_v31  ;;  %v5389_v38 = vld [vmem:[%s7416_s1 + $0xe04] ss:$8 sps:$4 sm:$0xff]   ;;  %v5387_v11 = vld [vmem:[%s7416_s1 + $0xe00] ss:$8 sps:$4 sm:$0xff]   ;;  %v5392_v12 = vld [vmem:[%s7416_s1 + $0x614] ss:$8 sps:$4 sm:$0xff]  }
 0x162   :  { %v5395_v62 = vld [vmem:[%s7416_s1 + $0xe14] ss:$8 sps:$4 sm:$0xff]   ;;  %v5390_v14 = vld [vmem:[%s7416_s1 + $0x610] ss:$8 sps:$4 sm:$0xff]   ;;  %v5398_v18 = vld [vmem:[%s7416_s1 + $0x624] ss:$8 sps:$4 sm:$0xff]  }
 0x163   :  { %3564 = vmatpush1.bf16.msra.mxu1 %v5336_v32  ;;  %v5393_v15 = vld [vmem:[%s7416_s1 + $0xe10] ss:$8 sps:$4 sm:$0xff]   ;;  %v5401_v19 = vld [vmem:[%s7416_s1 + $0xe24] ss:$8 sps:$4 sm:$0xff]   ;;  %v5396_v20 = vld [vmem:[%s7416_s1 + $0x620] ss:$8 sps:$4 sm:$0xff]  }
 0x164   :  { %3892 = vmatpush1.bf16.msra.mxu0 %v5339_v33  ;;  %3565 = vmatprep.subr.bf16.mxu1 %v5344_v34  ;;  %v5399_v21 = vld [vmem:[%s7416_s1 + $0xe20] ss:$8 sps:$4 sm:$0xff]   ;;  %v5404_v22 = vld [vmem:[%s7416_s1 + $0x634] ss:$8 sps:$4 sm:$0xff]   ;;  %v5402_v24 = vld [vmem:[%s7416_s1 + $0x630] ss:$8 sps:$4 sm:$0xff]  }
 0x165   :  { %3893 = vmatprep.subr.bf16.mxu0 %v5347_v16  ;;  %v5407_v52 = vld [vmem:[%s7416_s1 + $0xe34] ss:$8 sps:$4 sm:$0xff]   ;;  %v5405_v25 = vld [vmem:[%s7416_s1 + $0xe30] ss:$8 sps:$4 sm:$0xff]   ;;  %v5410_v26 = vld [vmem:[%s7416_s1 + $0x644] ss:$8 sps:$4 sm:$0xff]  }
 0x166   :  { %v5413_v27 = vld [vmem:[%s7416_s1 + $0xe44] ss:$8 sps:$4 sm:$0xff]   ;;  %v5408_v28 = vld [vmem:[%s7416_s1 + $0x640] ss:$8 sps:$4 sm:$0xff]   ;;  %v5416_v30 = vld [vmem:[%s7416_s1 + $0x654] ss:$8 sps:$4 sm:$0xff]  }
 0x167   :  { %3566 = vmatpush1.bf16.msra.mxu1 %v5342_v36  ;;  %v5411_v29 = vld [vmem:[%s7416_s1 + $0xe40] ss:$8 sps:$4 sm:$0xff]   ;;  %v5419_v31 = vld [vmem:[%s7416_s1 + $0xe54] ss:$8 sps:$4 sm:$0xff]   ;;  %v5414_v32 = vld [vmem:[%s7416_s1 + $0x650] ss:$8 sps:$4 sm:$0xff]  }
 0x168   :  { %3894 = vmatpush1.bf16.msra.mxu0 %v5345_v37  ;;  %3567 = vmatprep.subr.bf16.mxu1 %v5350_v56  ;;  %v5417_v33 = vld [vmem:[%s7416_s1 + $0xe50] ss:$8 sps:$4 sm:$0xff]   ;;  %v5422_v34 = vld [vmem:[%s7416_s1 + $0x664] ss:$8 sps:$4 sm:$0xff]   ;;  %v5420_v36 = vld [vmem:[%s7416_s1 + $0x660] ss:$8 sps:$4 sm:$0xff]  }
 0x169   :  { %3895 = vmatprep.subr.bf16.mxu0 %v5353_v23  ;;  %v5425_v16 = vld [vmem:[%s7416_s1 + $0xe64] ss:$8 sps:$4 sm:$0xff]   ;;  %v5423_v37 = vld [vmem:[%s7416_s1 + $0xe60] ss:$8 sps:$4 sm:$0xff]   ;;  %v5428_v56 = vld [vmem:[%s7416_s1 + $0x674] ss:$8 sps:$4 sm:$0xff]  }
 0x16a   :  { %v5431_v23 = vld [vmem:[%s7416_s1 + $0xe74] ss:$8 sps:$4 sm:$0xff]   ;;  %v5450_v0 = vld [vmem:[%s7416_s1 + $0x6b0] ss:$8 sps:$4 sm:$0xff]   ;;  %v5470_v6 = vld [vmem:[%s7416_s1 + $0x6e4] ss:$8 sps:$4 sm:$0xff]  }
 0x16b   :  { %3568 = vmatpush1.bf16.msra.mxu1 %v5348_v45  ;;  %v5426_v45 = vld [vmem:[%s7416_s1 + $0x670] ss:$8 sps:$4 sm:$0xff]   ;;  %v5473_v7 = vld [vmem:[%s7416_s1 + $0xee4] ss:$8 sps:$4 sm:$0xff]   ;;  %s5619_s10 = smov [#allocation2]   ;;  %vm4177_vm0 = vcmask 74752  }
 0x16c   :  { %3896 = vmatpush1.bf16.msra.mxu0 %v5351_v46  ;;  %3569 = vmatprep.subr.bf16.mxu1 %v5356_v17  ;;  %v5429_v46 = vld [vmem:[%s7416_s1 + $0xe70] ss:$8 sps:$4 sm:$0xff]   ;;  %v5434_v17 = vld [vmem:[%s7416_s1 + $0x684] ss:$8 sps:$4 sm:$0xff]   ;;  %s4185_s11 = sshll.u32 %s5619_s10, 4  ;;  %s4186_s11 = int_to_ptr.vmem [resolvable:$true] %s4185_s11 }
 0x16d   :  { %3897 = vmatprep.subr.bf16.mxu0 %v5359_v35  ;;  %v5437_v35 = vld [vmem:[%s7416_s1 + $0xe84] ss:$8 sps:$4 sm:$0xff]   ;;  %v5453_v1 = vld [vmem:[%s7416_s1 + $0xeb0] ss:$8 sps:$4 sm:$0xff]   ;;  %s5594_s12 = scalar_lea.vmem %s4186_s11, 32  ;;  %p5599_p1 = scmp.lt.s32.totalorder %s4186_s11, %s4186_s11 }
 0x16e   :  { %p5595_p0 = scmp.ne.s32.totalorder %s4186_s11, %s5594_s12  ;;  %p5600_p2 = scmp.lt.s32.totalorder %s5594_s12, %s5594_s12 }
 0x16f   :  { %3570 = vmatpush1.bf16.msra.mxu1 %v5354_v47  ;;  %v5432_v47 = vld [vmem:[%s7416_s1 + $0x680] ss:$8 sps:$4 sm:$0xff]  }
 0x170   :  { %3898 = vmatpush1.bf16.msra.mxu0 %v5357_v48  ;;  %3571 = vmatprep.subr.bf16.mxu1 %v5362_v50  ;;  %v5435_v48 = vld [vmem:[%s7416_s1 + $0xe80] ss:$8 sps:$4 sm:$0xff]   ;;  %v5440_v50 = vld [vmem:[%s7416_s1 + $0x694] ss:$8 sps:$4 sm:$0xff]   ;;  %p5601_p3 = por %p5600_p2, %p5599_p1 }
 0x171   :  { %3899 = vmatprep.subr.bf16.mxu0 %v5365_v51  ;;  %v5443_v51 = vld [vmem:[%s7416_s1 + $0xe94] ss:$8 sps:$4 sm:$0xff]  }
 0x172   :  { %p5602_p4 = pnand %p5601_p3, %p5595_p0 }
 0x173   :  { %3572 = vmatpush1.bf16.msra.mxu1 %v5360_v53  ;;  %v5438_v53 = vld [vmem:[%s7416_s1 + $0x690] ss:$8 sps:$4 sm:$0xff]  }
 0x174   :  { %3900 = vmatpush1.bf16.msra.mxu0 %v5363_v54  ;;  %3573 = vmatprep.subr.bf16.mxu1 %v5368_v55  ;;  %v5441_v54 = vld [vmem:[%s7416_s1 + $0xe90] ss:$8 sps:$4 sm:$0xff]   ;;  %v5446_v55 = vld [vmem:[%s7416_s1 + $0x6a4] ss:$8 sps:$4 sm:$0xff]  }
 0x175   :  { %3901 = vmatprep.subr.bf16.mxu0 %v5371_v57  ;;  %v5449_v57 = vld [vmem:[%s7416_s1 + $0xea4] ss:$8 sps:$4 sm:$0xff]  }
 0x177   :  { %3574 = vmatpush1.bf16.msra.mxu1 %v5366_v39  ;;  %v5444_v39 = vld [vmem:[%s7416_s1 + $0x6a0] ss:$8 sps:$4 sm:$0xff]  }
 0x178   :  { %3902 = vmatpush1.bf16.msra.mxu0 %v5369_v59  ;;  %3575 = vmatprep.subr.bf16.mxu1 %v5374_v60  ;;  %v5447_v59 = vld [vmem:[%s7416_s1 + $0xea0] ss:$8 sps:$4 sm:$0xff]   ;;  %v5452_v60 = vld [vmem:[%s7416_s1 + $0x6b4] ss:$8 sps:$4 sm:$0xff]  }
 0x179   :  { %3903 = vmatprep.subr.bf16.mxu0 %v5377_v61  ;;  %v5455_v61 = vld [vmem:[%s7416_s1 + $0xeb4] ss:$8 sps:$4 sm:$0xff]  }
 0x17b   :  { %3576 = vmatpush1.bf16.msra.mxu1 %v5372_v43  ;;  %v5458_v43 = vld [vmem:[%s7416_s1 + $0x6c4] ss:$8 sps:$4 sm:$0xff]  }
 0x17c   :  { %3904 = vmatpush1.bf16.msra.mxu0 %v5375_v44  ;;  %3577 = vmatprep.subr.bf16.mxu1 %v5380_v2  ;;  %v5461_v44 = vld [vmem:[%s7416_s1 + $0xec4] ss:$8 sps:$4 sm:$0xff]   ;;  %v5456_v2 = vld [vmem:[%s7416_s1 + $0x6c0] ss:$8 sps:$4 sm:$0xff]  }
 0x17d   :  { %3905 = vmatprep.subr.bf16.mxu0 %v5383_v40  ;;  %v5459_v40 = vld [vmem:[%s7416_s1 + $0xec0] ss:$8 sps:$4 sm:$0xff]  }
 0x17f   :  { %3578 = vmatpush1.bf16.msra.mxu1 %v5378_v4  ;;  %v5464_v4 = vld [vmem:[%s7416_s1 + $0x6d4] ss:$8 sps:$4 sm:$0xff]  }
 0x180   :  { %3906 = vmatpush1.bf16.msra.mxu0 %v5381_v5  ;;  %3588 = vmatprep.subr.bf16.mxu1 %v5386_v58  ;;  %v5467_v5 = vld [vmem:[%s7416_s1 + $0xed4] ss:$8 sps:$4 sm:$0xff]   ;;  %v5462_v58 = vld [vmem:[%s7416_s1 + $0x6d0] ss:$8 sps:$4 sm:$0xff]  }
 0x181   :  { %3916 = vmatprep.subr.bf16.mxu0 %v5389_v38  ;;  %v5465_v38 = vld [vmem:[%s7416_s1 + $0xed0] ss:$8 sps:$4 sm:$0xff]  }
 0x182   :  { %3580 = vmatmul.mubr.bf16.vlgmr.msra.gmra.mrb[0].mxu1 %v648_v8  ;;  %v5468_v8 = vld [vmem:[%s7416_s1 + $0x6e0] ss:$8 sps:$4 sm:$0xff]  }
 0x183   :  { %3908 = vmatmul.mubr.bf16.vlgmr.msra.gmra.mrb[0].mxu0 %v746_v9  ;;  %3589 = vmatpush1.bf16.msra.mxu1 %v5384_v10  ;;  %v5471_v9 = vld [vmem:[%s7416_s1 + $0xee0] ss:$8 sps:$4 sm:$0xff]   ;;  %v5476_v10 = vld [vmem:[%s7416_s1 + $0x6f4] ss:$8 sps:$4 sm:$0xff]  }
 0x184   :  { %3917 = vmatpush1.bf16.msra.mxu0 %v5387_v11  ;;  %3590 = vmatprep.subr.bf16.mxu1 %v5392_v12  ;;  %v5479_v11 = vld [vmem:[%s7416_s1 + $0xef4] ss:$8 sps:$4 sm:$0xff]   ;;  %v5474_v12 = vld [vmem:[%s7416_s1 + $0x6f0] ss:$8 sps:$4 sm:$0xff]  }
 0x185   :  { %3918 = vmatprep.subr.bf16.mxu0 %v5395_v62  ;;  %3620 = vmatprep.mubr.bf16.mxu1 %v6956_v63  ;;  %v5477_v62 = vld [vmem:[%s7416_s1 + $0xef0] ss:$8 sps:$4 sm:$0xff]  }
 0x186   :  { %3948 = vmatprep.mubr.bf16.mxu0 %v6959_v13 }
 0x187   :  { %3591 = vmatpush1.bf16.msra.mxu1 %v5390_v14  ;;  %v5483_v14 = vld [vmem:[%s7416_s1 + $0x704] ss:$8 sps:$4 sm:$0xff]  }
 0x188   :  { %3919 = vmatpush1.bf16.msra.mxu0 %v5393_v15  ;;  %3592 = vmatprep.subr.bf16.mxu1 %v5398_v18  ;;  %v5487_v15 = vld [vmem:[%s7416_s1 + $0xf04] ss:$8 sps:$4 sm:$0xff]   ;;  %v7145_v18 = vrot.slane %v6918_v41, %v5785_v49  ;;  %v5490_v41 = vld [vmem:[%s7416_s1 + $0x714] ss:$8 sps:$4 sm:$0xff]  }
 0x189   :  { %3920 = vmatprep.subr.bf16.mxu0 %v5401_v19  ;;  %v7149_v19 = vrot.slane %v6921_v3, %v5785_v49  ;;  %v5493_v49 = vld [vmem:[%s7416_s1 + $0xf14] ss:$8 sps:$4 sm:$0xff]   ;;  %v651_v3 = vcombine.high %v6956_v63, %v6956_v63  ;;  %v5496_v63 = vld [vmem:[%s7416_s1 + $0x724] ss:$8 sps:$4 sm:$0xff]  }
 0x18b   :  { %3593 = vmatpush1.bf16.msra.mxu1 %v5396_v20  ;;  %v5481_v20 = vld [vmem:[%s7416_s1 + $0x700] ss:$8 sps:$4 sm:$0xff]  }
 0x18c   :  { %3921 = vmatpush1.bf16.msra.mxu0 %v5399_v21  ;;  %3594 = vmatprep.subr.bf16.mxu1 %v5404_v22  ;;  %v5485_v21 = vld [vmem:[%s7416_s1 + $0xf00] ss:$8 sps:$4 sm:$0xff]   ;;  %v749_v22 = vcombine.high %v6959_v13, %v6959_v13  ;;  %v5499_v13 = vld [vmem:[%s7416_s1 + $0xf24] ss:$8 sps:$4 sm:$0xff]  }
 0x18d   :  { %3922 = vmatprep.subr.bf16.mxu0 %v5407_v52  ;;  %v5488_v52 = vld [vmem:[%s7416_s1 + $0x710] ss:$8 sps:$4 sm:$0xff]  }
 0x18f   :  { %3595 = vmatpush1.bf16.msra.mxu1 %v5402_v24  ;;  %v5491_v24 = vld [vmem:[%s7416_s1 + $0xf10] ss:$8 sps:$4 sm:$0xff]  }
 0x190   :  { %3923 = vmatpush1.bf16.msra.mxu0 %v5405_v25  ;;  %3596 = vmatprep.subr.bf16.mxu1 %v5410_v26  ;;  %v5494_v25 = vld [vmem:[%s7416_s1 + $0x720] ss:$8 sps:$4 sm:$0xff]  }
 0x191   :  { %3924 = vmatprep.subr.bf16.mxu0 %v5413_v27  ;;  %v5497_v26 = vld [vmem:[%s7416_s1 + $0xf20] ss:$8 sps:$4 sm:$0xff]   ;;  %v5502_v27 = vld [vmem:[%s7416_s1 + $0x734] ss:$8 sps:$4 sm:$0xff]  }
 0x193   :  { %3597 = vmatpush1.bf16.msra.mxu1 %v5408_v28  ;;  %v5505_v28 = vld [vmem:[%s7416_s1 + $0xf34] ss:$8 sps:$4 sm:$0xff]  }
 0x194   :  { %3925 = vmatpush1.bf16.msra.mxu0 %v5411_v29  ;;  %3598 = vmatprep.subr.bf16.mxu1 %v5416_v30  ;;  %v5500_v29 = vld [vmem:[%s7416_s1 + $0x730] ss:$8 sps:$4 sm:$0xff]  }
 0x195   :  { %3926 = vmatprep.subr.bf16.mxu0 %v5419_v31  ;;  %v5503_v30 = vld [vmem:[%s7416_s1 + $0xf30] ss:$8 sps:$4 sm:$0xff]   ;;  %v5508_v31 = vld [vmem:[%s7416_s1 + $0x744] ss:$8 sps:$4 sm:$0xff]  }
 0x197   :  { %3599 = vmatpush1.bf16.msra.mxu1 %v5414_v32  ;;  %v5511_v32 = vld [vmem:[%s7416_s1 + $0xf44] ss:$8 sps:$4 sm:$0xff]  }
 0x198   :  { %3927 = vmatpush1.bf16.msra.mxu0 %v5417_v33  ;;  %3600 = vmatprep.subr.bf16.mxu1 %v5422_v34  ;;  %v5506_v33 = vld [vmem:[%s7416_s1 + $0x740] ss:$8 sps:$4 sm:$0xff]  }
 0x199   :  { %3928 = vmatprep.subr.bf16.mxu0 %v5425_v16  ;;  %v5509_v34 = vld [vmem:[%s7416_s1 + $0xf40] ss:$8 sps:$4 sm:$0xff]   ;;  %v5514_v16 = vld [vmem:[%s7416_s1 + $0x754] ss:$8 sps:$4 sm:$0xff]  }
 0x19b   :  { %3601 = vmatpush1.bf16.msra.mxu1 %v5420_v36  ;;  %v5517_v36 = vld [vmem:[%s7416_s1 + $0xf54] ss:$8 sps:$4 sm:$0xff]  }
 0x19c   :  { %3929 = vmatpush1.bf16.msra.mxu0 %v5423_v37  ;;  %3602 = vmatprep.subr.bf16.mxu1 %v5428_v56  ;;  %v5512_v37 = vld [vmem:[%s7416_s1 + $0x750] ss:$8 sps:$4 sm:$0xff]  }
 0x19d   :  { %3930 = vmatprep.subr.bf16.mxu0 %v5431_v23  ;;  %v5515_v56 = vld [vmem:[%s7416_s1 + $0xf50] ss:$8 sps:$4 sm:$0xff]   ;;  %v5520_v23 = vld [vmem:[%s7416_s1 + $0x764] ss:$8 sps:$4 sm:$0xff]  }
 0x19f   :  { %3603 = vmatpush1.bf16.msra.mxu1 %v5426_v45  ;;  %v5523_v45 = vld [vmem:[%s7416_s1 + $0xf64] ss:$8 sps:$4 sm:$0xff]  }
 0x1a0   :  { %3931 = vmatpush1.bf16.msra.mxu0 %v5429_v46  ;;  %3604 = vmatprep.subr.bf16.mxu1 %v5434_v17  ;;  %v5518_v46 = vld [vmem:[%s7416_s1 + $0x760] ss:$8 sps:$4 sm:$0xff]  }
 0x1a1   :  { %3932 = vmatprep.subr.bf16.mxu0 %v5437_v35  ;;  %v5521_v17 = vld [vmem:[%s7416_s1 + $0xf60] ss:$8 sps:$4 sm:$0xff]   ;;  %v5526_v35 = vld [vmem:[%s7416_s1 + $0x774] ss:$8 sps:$4 sm:$0xff]  }
 0x1a3   :  { %3605 = vmatpush1.bf16.msra.mxu1 %v5432_v47  ;;  %v5529_v47 = vld [vmem:[%s7416_s1 + $0xf74] ss:$8 sps:$4 sm:$0xff]  }
 0x1a4   :  { %3933 = vmatpush1.bf16.msra.mxu0 %v5435_v48  ;;  %3606 = vmatprep.subr.bf16.mxu1 %v5440_v50  ;;  %v5524_v48 = vld [vmem:[%s7416_s1 + $0x770] ss:$8 sps:$4 sm:$0xff]  }
 0x1a5   :  { %3934 = vmatprep.subr.bf16.mxu0 %v5443_v51  ;;  %v5527_v50 = vld [vmem:[%s7416_s1 + $0xf70] ss:$8 sps:$4 sm:$0xff]   ;;  %v5532_v51 = vld [vmem:[%s7416_s1 + $0x784] ss:$8 sps:$4 sm:$0xff]  }
 0x1a7   :  { %3607 = vmatpush1.bf16.msra.mxu1 %v5438_v53  ;;  %v5535_v53 = vld [vmem:[%s7416_s1 + $0xf84] ss:$8 sps:$4 sm:$0xff]  }
 0x1a8   :  { %3935 = vmatpush1.bf16.msra.mxu0 %v5441_v54  ;;  %3608 = vmatprep.subr.bf16.mxu1 %v5446_v55  ;;  %v5530_v54 = vld [vmem:[%s7416_s1 + $0x780] ss:$8 sps:$4 sm:$0xff]  }
 0x1a9   :  { %3936 = vmatprep.subr.bf16.mxu0 %v5449_v57  ;;  %v5533_v55 = vld [vmem:[%s7416_s1 + $0xf80] ss:$8 sps:$4 sm:$0xff]   ;;  %v5538_v57 = vld [vmem:[%s7416_s1 + $0x794] ss:$8 sps:$4 sm:$0xff]  }
 0x1ab   :  { %3609 = vmatpush1.bf16.msra.mxu1 %v5444_v39  ;;  %v5541_v39 = vld [vmem:[%s7416_s1 + $0xf94] ss:$8 sps:$4 sm:$0xff]  }
 0x1ac   :  { %3937 = vmatpush1.bf16.msra.mxu0 %v5447_v59  ;;  %3610 = vmatprep.subr.bf16.mxu1 %v5452_v60  ;;  %v5536_v59 = vld [vmem:[%s7416_s1 + $0x790] ss:$8 sps:$4 sm:$0xff]  }
 0x1ad   :  { %3938 = vmatprep.subr.bf16.mxu0 %v5455_v61  ;;  %v5539_v60 = vld [vmem:[%s7416_s1 + $0xf90] ss:$8 sps:$4 sm:$0xff]   ;;  %v5544_v61 = vld [vmem:[%s7416_s1 + $0x7a4] ss:$8 sps:$4 sm:$0xff]  }
 0x1af   :  { %3611 = vmatpush1.bf16.msra.mxu1 %v5450_v0  ;;  %v5547_v0 = vld [vmem:[%s7416_s1 + $0xfa4] ss:$8 sps:$4 sm:$0xff]  }
 0x1b0   :  { %3939 = vmatpush1.bf16.msra.mxu0 %v5453_v1  ;;  %3612 = vmatprep.subr.bf16.mxu1 %v5458_v43  ;;  %v5542_v1 = vld [vmem:[%s7416_s1 + $0x7a0] ss:$8 sps:$4 sm:$0xff]  }
 0x1b1   :  { %3940 = vmatprep.subr.bf16.mxu0 %v5461_v44  ;;  %v5545_v43 = vld [vmem:[%s7416_s1 + $0xfa0] ss:$8 sps:$4 sm:$0xff]   ;;  %v5550_v44 = vld [vmem:[%s7416_s1 + $0x7b4] ss:$8 sps:$4 sm:$0xff]  }
 0x1b3   :  { %3613 = vmatpush1.bf16.msra.mxu1 %v5456_v2  ;;  %v5553_v2 = vld [vmem:[%s7416_s1 + $0xfb4] ss:$8 sps:$4 sm:$0xff]  }
 0x1b4   :  { %3941 = vmatpush1.bf16.msra.mxu0 %v5459_v40  ;;  %3614 = vmatprep.subr.bf16.mxu1 %v5464_v4  ;;  %v5548_v40 = vld [vmem:[%s7416_s1 + $0x7b0] ss:$8 sps:$4 sm:$0xff]  }
 0x1b5   :  { %3942 = vmatprep.subr.bf16.mxu0 %v5467_v5  ;;  %v5551_v4 = vld [vmem:[%s7416_s1 + $0xfb0] ss:$8 sps:$4 sm:$0xff]   ;;  %v5556_v5 = vld [vmem:[%s7416_s1 + $0x7c4] ss:$8 sps:$4 sm:$0xff]  }
 0x1b7   :  { %3615 = vmatpush1.bf16.msra.mxu1 %v5462_v58  ;;  %v5559_v58 = vld [vmem:[%s7416_s1 + $0xfc4] ss:$8 sps:$4 sm:$0xff]  }
 0x1b8   :  { %3943 = vmatpush1.bf16.msra.mxu0 %v5465_v38  ;;  %3616 = vmatprep.subr.bf16.mxu1 %v5470_v6  ;;  %v5554_v38 = vld [vmem:[%s7416_s1 + $0x7c0] ss:$8 sps:$4 sm:$0xff]  }
 0x1b9   :  { %3944 = vmatprep.subr.bf16.mxu0 %v5473_v7  ;;  %v5557_v6 = vld [vmem:[%s7416_s1 + $0xfc0] ss:$8 sps:$4 sm:$0xff]   ;;  %v5562_v7 = vld [vmem:[%s7416_s1 + $0x7d4] ss:$8 sps:$4 sm:$0xff]  }
 0x1bb   :  { %3617 = vmatpush1.bf16.msra.mxu1 %v5468_v8  ;;  %v5565_v8 = vld [vmem:[%s7416_s1 + $0xfd4] ss:$8 sps:$4 sm:$0xff]  }
 0x1bc   :  { %3945 = vmatpush1.bf16.msra.mxu0 %v5471_v9  ;;  %3618 = vmatprep.subr.bf16.mxu1 %v5476_v10  ;;  %v5560_v9 = vld [vmem:[%s7416_s1 + $0x7d0] ss:$8 sps:$4 sm:$0xff]  }
 0x1bd   :  { %3946 = vmatprep.subr.bf16.mxu0 %v5479_v11  ;;  %v5563_v10 = vld [vmem:[%s7416_s1 + $0xfd0] ss:$8 sps:$4 sm:$0xff]   ;;  %v5568_v11 = vld [vmem:[%s7416_s1 + $0x7e4] ss:$8 sps:$4 sm:$0xff]  }
 0x1bf   :  { %3619 = vmatpush1.bf16.msra.mxu1 %v5474_v12  ;;  %v5571_v12 = vld [vmem:[%s7416_s1 + $0xfe4] ss:$8 sps:$4 sm:$0xff]  }
 0x1c0   :  { %3947 = vmatpush1.bf16.msra.mxu0 %v5477_v62  ;;  %3629 = vmatprep.subr.bf16.mxu1 %v5483_v14  ;;  %v5566_v62 = vld [vmem:[%s7416_s1 + $0x7e0] ss:$8 sps:$4 sm:$0xff]  }
 0x1c1   :  { %3957 = vmatprep.subr.bf16.mxu0 %v5487_v15  ;;  %v5569_v14 = vld [vmem:[%s7416_s1 + $0xfe0] ss:$8 sps:$4 sm:$0xff]   ;;  %v5574_v15 = vld [vmem:[%s7416_s1 + $0x7f4] ss:$8 sps:$4 sm:$0xff]  }
 0x1c2   :  { %3621 = vmatmul.mubr.bf16.vlgmr.msra.gmra.mrb[0].mxu1 %v7145_v18 }
 0x1c3   :  { %3949 = vmatmul.mubr.bf16.vlgmr.msra.gmra.mrb[0].mxu0 %v7149_v19  ;;  %3630 = vmatpush1.bf16.msra.mxu1 %v5481_v20  ;;  %v5577_v20 = vld [vmem:[%s7416_s1 + $0xff4] ss:$8 sps:$4 sm:$0xff]  }
 0x1c4   :  { %3958 = vmatpush1.bf16.msra.mxu0 %v5485_v21  ;;  %3631 = vmatprep.subr.bf16.mxu1 %v5490_v41  ;;  %v5572_v21 = vld [vmem:[%s7416_s1 + $0x7f0] ss:$8 sps:$4 sm:$0xff]  }
 0x1c5   :  { %3959 = vmatprep.subr.bf16.mxu0 %v5493_v49  ;;  %3661 = vmatprep.mubr.bf16.mxu1 %v651_v3  ;;  %v5575_v41 = vld [vmem:[%s7416_s1 + $0xff0] ss:$8 sps:$4 sm:$0xff]   ;;  %v5578_v49 = vld [vmem:[%s7418_s3 + $0x40] sm:$0xff]   ;;  %v649_v3 = vcombine.high %v7145_v18, %v7145_v18  ;;  %v5581_v18 = vld [vmem:[%s7418_s3 + $0x8] sm:$0xff]  }
 0x1c6   :  { %3989 = vmatprep.mubr.bf16.mxu0 %v749_v22  ;;  %v747_v22 = vcombine.high %v7149_v19, %v7149_v19  ;;  %v5582_v19 = vld [vmem:[%s7418_s3 + $0x50] sm:$0xff]  }
 0x1c7   :  { %3632 = vmatpush1.bf16.msra.mxu1 %v5488_v52  ;;  %v5579_v52 = vld [vmem:[%s7418_s3] sm:$0xff]  }
 0x1c8   :  { %3960 = vmatpush1.bf16.msra.mxu0 %v5491_v24  ;;  %3633 = vmatprep.subr.bf16.mxu1 %v5496_v63  ;;  %v5580_v24 = vld [vmem:[%s7418_s3 + $0x48] sm:$0xff]   ;;  %v5583_v63 = vld [vmem:[%s7418_s3 + $0x10] sm:$0xff]  }
 0x1c9   :  { %3961 = vmatprep.subr.bf16.mxu0 %v5499_v13  ;;  %v5584_v13 = vld [vmem:[%s7418_s3 + $0x58] sm:$0xff]  }
 0x1cb   :  { %3634 = vmatpush1.bf16.msra.mxu1 %v5494_v25  ;;  %v5585_v25 = vld [vmem:[%s7418_s3 + $0x18] sm:$0xff]  }
 0x1cc   :  { %3962 = vmatpush1.bf16.msra.mxu0 %v5497_v26  ;;  %3635 = vmatprep.subr.bf16.mxu1 %v5502_v27  ;;  %v5586_v26 = vld [vmem:[%s7418_s3 + $0x60] sm:$0xff]  }
 0x1cd   :  { %3963 = vmatprep.subr.bf16.mxu0 %v5505_v28  ;;  %v5587_v27 = vld [vmem:[%s7418_s3 + $0x20] sm:$0xff]   ;;  %v5588_v28 = vld [vmem:[%s7418_s3 + $0x68] sm:$0xff]  }
 0x1cf   :  { %3636 = vmatpush1.bf16.msra.mxu1 %v5500_v29  ;;  %v5589_v29 = vld [vmem:[%s7418_s3 + $0x28] sm:$0xff]  }
 0x1d0   :  { %3964 = vmatpush1.bf16.msra.mxu0 %v5503_v30  ;;  %3637 = vmatprep.subr.bf16.mxu1 %v5508_v31  ;;  %v5590_v30 = vld [vmem:[%s7418_s3 + $0x70] sm:$0xff]  }
 0x1d1   :  { %3965 = vmatprep.subr.bf16.mxu0 %v5511_v32  ;;  %v5591_v31 = vld [vmem:[%s7418_s3 + $0x30] sm:$0xff]   ;;  %v5592_v32 = vld [vmem:[%s7418_s3 + $0x78] sm:$0xff]  }
 0x1d3   :  { %3638 = vmatpush1.bf16.msra.mxu1 %v5506_v33  ;;  %v5593_v33 = vld [vmem:[%s7418_s3 + $0x38] sm:$0xff]  }
 0x1d4   :  { %3966 = vmatpush1.bf16.msra.mxu0 %v5509_v34  ;;  %3639 = vmatprep.subr.bf16.mxu1 %v5514_v16  ;;  %v542_v34 = vsub.s32 0, %v5767_v42  ;;  %v538_v16 = vld [vmem:[%s7417_s2] sm:$0x3] }
 0x1d5   :  { %3967 = vmatprep.subr.bf16.mxu0 %v5517_v36  ;;  %v546_v36 = vsub.s32 1, %v5767_v42 }
 0x1d7   :  { %3640 = vmatpush1.bf16.msra.mxu1 %v5512_v37  ;;  %v543_v37 = vrot.slane %v538_v16, %v542_v34 }
 0x1d8   :  { %3968 = vmatpush1.bf16.msra.mxu0 %v5515_v56  ;;  %3641 = vmatprep.subr.bf16.mxu1 %v5520_v23  ;;  %v547_v56 = vrot.slane %v538_v16, %v546_v36 }
 0x1d9   :  { %3969 = vmatprep.subr.bf16.mxu0 %v5523_v45 }
 0x1db   :  { %3642 = vmatpush1.bf16.msra.mxu1 %v5518_v46 }
 0x1dc   :  { %3970 = vmatpush1.bf16.msra.mxu0 %v5521_v17  ;;  %3643 = vmatprep.subr.bf16.mxu1 %v5526_v35 }
 0x1dd   :  { %3971 = vmatprep.subr.bf16.mxu0 %v5529_v47 }
 0x1df   :  { %3644 = vmatpush1.bf16.msra.mxu1 %v5524_v48 }
 0x1e0   :  { %3972 = vmatpush1.bf16.msra.mxu0 %v5527_v50  ;;  %3645 = vmatprep.subr.bf16.mxu1 %v5532_v51 }
 0x1e1   :  { %3973 = vmatprep.subr.bf16.mxu0 %v5535_v53 }
 0x1e3   :  { %3646 = vmatpush1.bf16.msra.mxu1 %v5530_v54 }
 0x1e4   :  { %3974 = vmatpush1.bf16.msra.mxu0 %v5533_v55  ;;  %3647 = vmatprep.subr.bf16.mxu1 %v5538_v57 }
 0x1e5   :  { %3975 = vmatprep.subr.bf16.mxu0 %v5541_v39 }
 0x1e7   :  { %3648 = vmatpush1.bf16.msra.mxu1 %v5536_v59 }
 0x1e8   :  { %3976 = vmatpush1.bf16.msra.mxu0 %v5539_v60  ;;  %3649 = vmatprep.subr.bf16.mxu1 %v5544_v61  ;;  %v4705_v61 = vld [vmem:[%s7419_s4] ss:$0 sm:$0xff] }
 0x1e9   :  { %3977 = vmatprep.subr.bf16.mxu0 %v5547_v0 }
 0x1eb   :  { %3650 = vmatpush1.bf16.msra.mxu1 %v5542_v1 }
 0x1ec   :  { %3978 = vmatpush1.bf16.msra.mxu0 %v5545_v43  ;;  %3651 = vmatprep.subr.bf16.mxu1 %v5550_v44 }
 0x1ed   :  { %3979 = vmatprep.subr.bf16.mxu0 %v5553_v2 }
 0x1ef   :  { %3652 = vmatpush1.bf16.msra.mxu1 %v5548_v40 }
 0x1f0   :  { %3980 = vmatpush1.bf16.msra.mxu0 %v5551_v4  ;;  %3653 = vmatprep.subr.bf16.mxu1 %v5556_v5 }
 0x1f1   :  { %3981 = vmatprep.subr.bf16.mxu0 %v5559_v58 }
 0x1f3   :  { %3654 = vmatpush1.bf16.msra.mxu1 %v5554_v38 }
 0x1f4   :  { %3982 = vmatpush1.bf16.msra.mxu0 %v5557_v6  ;;  %3655 = vmatprep.subr.bf16.mxu1 %v5562_v7 }
 0x1f5   :  { %3983 = vmatprep.subr.bf16.mxu0 %v5565_v8 }
 0x1f7   :  { %3656 = vmatpush1.bf16.msra.mxu1 %v5560_v9 }
 0x1f8   :  { %3984 = vmatpush1.bf16.msra.mxu0 %v5563_v10  ;;  %3657 = vmatprep.subr.bf16.mxu1 %v5568_v11 }
 0x1f9   :  { %3985 = vmatprep.subr.bf16.mxu0 %v5571_v12 }
 0x1fb   :  { %3658 = vmatpush1.bf16.msra.mxu1 %v5566_v62 }
 0x1fc   :  { %3986 = vmatpush1.bf16.msra.mxu0 %v5569_v14  ;;  %3659 = vmatprep.subr.bf16.mxu1 %v5574_v15 }
 0x1fd   :  { %3987 = vmatprep.subr.bf16.mxu0 %v5577_v20 }
 0x1ff   :  { %3660 = vmatpush1.bf16.msra.mxu1 %v5572_v21 }
 0x200   :  { %3988 = vmatpush1.bf16.msra.mxu0 %v5575_v41  ;;  %4722 = vmatprep.subr.bf16.mxu1 %v5578_v49 }
 0x202   :  { %3662 = vmatmul.mubr.bf16.vlgmr.msra.gmra.mrb[0].mxu1 %v649_v3 }
 0x203   :  { %3990 = vmatmul.mubr.bf16.vlgmr.msra.gmra.mrb[0].mxu0 %v747_v22  ;;  %4723 = vmatpush3.bf16.msra.mxu1 %v5579_v52 }
 0x204   :  { %4724 = vmatprep.subr.bf16.mxu1 %v5580_v24 }
 0x207   :  { %4725 = vmatpush3.bf16.msra.mxu1 %v5581_v18 }
 0x208   :  { %4726 = vmatprep.subr.bf16.mxu1 %v5582_v19 }
 0x20b   :  { %4727 = vmatpush3.bf16.msra.mxu1 %v5583_v63 }
 0x20c   :  { %4728 = vmatprep.subr.bf16.mxu1 %v5584_v13 }
 0x20f   :  { %4729 = vmatpush3.bf16.msra.mxu1 %v5585_v25 }
 0x210   :  { %4730 = vmatprep.subr.bf16.mxu1 %v5586_v26 }
 0x213   :  { %4731 = vmatpush3.bf16.msra.mxu1 %v5587_v27 }
 0x214   :  { %4732 = vmatprep.subr.bf16.mxu1 %v5588_v28 }
 0x217   :  { %4733 = vmatpush3.bf16.msra.mxu1 %v5589_v29 }
 0x218   :  { %4734 = vmatprep.subr.bf16.mxu1 %v5590_v30 }
 0x21b   :  { %4735 = vmatpush3.bf16.msra.mxu1 %v5591_v31 }
 0x21c   :  { %4736 = vmatprep.subr.bf16.mxu1 %v5592_v32 }
 0x21f   :  { %4737 = vmatpush3.bf16.msra.mxu1 %v5593_v33 }
 0x2d5   :  { %v3663_v23 = vpop.f32.mrb[0].mxu1 }
 0x2d6   :  { %v3991_v45 = vpop.f32.mrb[0].mxu0  ;;  %v4744_v46 = vadd.f32 %v3663_v23, %v543_v37  ;;  %v3665_v17 = vpop.f32.mrb[1].mxu1 }
 0x2d7   :  { %v3993_v35 = vpop.f32.mrb[1].mxu0  ;;  %v4746_v47 = vadd.f32 %v3665_v17, %v547_v56  ;;  %v3667_v48 = vpop.f32.mrb[2].mxu1 }
 0x2d8   :  { %v3995_v50 = vpop.f32.mrb[2].mxu0  ;;  %v4745_v51 = vadd.f32 %v4744_v46, %v3991_v45  ;;  %v3668_v53 = vpop.f32.mrb[3].mxu1 }
 0x2d9   :  { %v3996_v54 = vpop.f32.mrb[3].mxu0  ;;  %v4747_v55 = vadd.f32 %v4746_v47, %v3993_v35 }
 0x2da   :  { %v3998_v57 = vmax.f32 %v4745_v51, 0.0 }
 0x2db   :  { %v3999_v39 = vmax.f32 %v4747_v55, 0.0 }
 0x2dc   :  { %v4000_v60 = vpack.c.bf16 %v3998_v57, %v3998_v57 }
 0x2dd   :  { %v4001_v59 = vpack.c.bf16 %v3999_v39, %v3999_v39 }
 0x2df   :  { %4169 = vmatprep.mubr.bf16.mxu1 %v4001_v59 }
 0x2e0   :  { %4170 = vmatmul.mubr.bf16.vlgmr.msra.gmra.mrb[4].mxu1 %v4000_v60 }
 0x3b3   :  { %v4738_v42 = vpop.f32.mrb[4].mxu1 }
 0x3b4   :  { %v4739_v0 = vpop.f32.mrb[5].mxu1 }
 0x3b5   :  { %v4740_v1 = vadd.f32 %v4739_v0, %v4738_v42  ;;  %v4741_v43 = vpop.f32.mrb[6].mxu1 }
 0x3b6   :  { %v4742_v44 = vpop.f32.mrb[7].mxu1 }
 0x3b7   :  { %v4172_v2 = vadd.f32 %v4740_v1, %v4705_v61 }
 0x3b9   :  { %4178 = vst.msk [vmem:[#allocation2] sm:$0x3] %vm4177_vm0, %v4172_v2 }
 0x3ba   :  { %5605 = shalt.err (!%p5602_p4)
}
 0x3bb   :  { %s5606_s4 = scalar_lea.hbm %s7420_s5, 32 }
 0x3bc   :  { %p5607_p5 = scmp.ne.s32.totalorder %s7420_s5, %s5606_s4  ;;  %p5610_p6 = scmp.lt.u32.totalorder %s5606_s4, %s7420_s5 }
 0x3be   :  { %p5612_p7 = pnand %p5610_p6, %p5607_p5 }
 0x3c0   :  { %5615 = shalt.err (!%p5612_p7)
}
 0x3c1   :  { %4188 = dma.vmem_to_hbm [thread:$0]  %s4186_s11, 32, %s7420_s5, [#allocation3]  }
 0x3c2   :  { %5616 = dma.done.wait [#allocation3], 32  }
 0x3c3   :  { %5617 = vsyncadd [#allocation3], 4294967264 }
 0x3c4   :  { %4192 = vsyncpa [#allocation3], 1 }

</bundles_post_ra>
